<compile_context>
chip_gen: v7x
topology: tpu7x:2x2x1
jax: 0.10.0
libtpu: 0.0.40
codegen_flags: <defaults>
</compile_context>

<pallas_src>
import jax
import jax.numpy as jnp
from jax.experimental import pallas as pl
from jax.experimental.pallas import tpu as pltpu

EPSILON = 1e-5
BN_EPS = 1e-5
MXU_DTYPE = jnp.bfloat16   # conv / pool / bcast matmuls in bf16 on the MXU, f32 accumulation


# ----------------------------------------------------------------------------------
# The single fused kernel: whole Up_dense_3_softmax forward for one batch block.
# ----------------------------------------------------------------------------------
def _up_dense_kernel(
        x1_ref, x2_ref, x3_ref, x4_ref, x5_ref,
        mc_a_ref, bc_a_ref, mc_b_ref, bc_b_ref, mc_cat_ref,     # self.conv (+ concat layout)
        m1_a_ref, b1_a_ref, m1_b_ref, b1_b_ref,                 # self.conv_1
        m2_a_ref, b2_a_ref, m2_b_ref, b2_b_ref,                 # self.conv_2
        m5_a_ref, b5_a_ref, m5_b_ref, b5_b_ref,                 # self.maxpool_conv_0 conv
        pool_ref, bcast_ref,
        o_ref):
    nb, img_h, wc_out = o_ref.shape
    rows = nb * img_h

    # Row masks for the 3x3 "SAME" zero padding along H.  Because the batch block is
    # stacked along the M/sublane axis, the same masks also kill the cross-item rows the
    # wrap-around roll drags in at item boundaries.
    ridx = jax.lax.broadcasted_iota(jnp.int32, (rows, 1), 0)
    top_row = (ridx % img_h) == 0
    bot_row = (ridx % img_h) == (img_h - 1)

    def conv3x3_bn_relu(x, m_ref, b_ref):
        """x: (rows, W*Cin) f32 slab -> relu(conv3x3(x)+bias): (rows, W*Cout) f32.
        One MXU push per layer (bf16 operands, f32 accumulation)."""
        up = jnp.where(top_row, 0.0, jnp.roll(x, 1, axis=0))    # row h-1 (zero at top edges)
        dn = jnp.where(bot_row, 0.0, jnp.roll(x, -1, axis=0))   # row h+1 (zero at bottom edges)
        taps = jnp.concatenate([up, x, dn], axis=1).astype(MXU_DTYPE)
        acc = jnp.dot(taps, m_ref[...], preferred_element_type=jnp.float32)
        return jnp.maximum(acc + b_ref[...], 0.0)

    def double_conv(x, ma, ba, mb, bb):
        return conv3x3_bn_relu(conv3x3_bn_relu(x, ma, ba), mb, bb)

    def slab(ref):
        v = ref[...]
        return v.reshape(rows, v.shape[-1])

    f1 = double_conv(slab(x1_ref), mc_a_ref, bc_a_ref, mc_b_ref, bc_b_ref)   # self.conv(x1)
    f2 = double_conv(slab(x2_ref), m1_a_ref, b1_a_ref, m1_b_ref, b1_b_ref)   # self.conv_1(x2)
    f3 = double_conv(slab(x3_ref), m2_a_ref, b2_a_ref, m2_b_ref, b2_b_ref)   # self.conv_2(x3)
    f5 = double_conv(slab(x5_ref), m5_a_ref, b5_a_ref, m5_b_ref, b5_b_ref)   # maxpool_conv_0(x5)
    t4 = slab(x4_ref)

    # ---- spatial softmax fusion: ONE pool matmul + ONE broadcast matmul (stacked) ----
    ts = jnp.concatenate([f2, f3, t4, f5], axis=0)                           # (4*rows, W*C)
    s = jnp.dot(ts.astype(MXU_DTYPE), pool_ref[...],
                preferred_element_type=jnp.float32)                          # (4*rows, W) channel means
    s1, s2, s3, s4 = (s[i * rows:(i + 1) * rows] for i in range(4))
    # max-stabilised but mathematically identical to exp(s_i) / (sum_j exp(s_j) + EPSILON)
    mx = jnp.maximum(jnp.maximum(jnp.maximum(s1, s2), jnp.maximum(s3, s4)), 0.0)
    e1 = jnp.exp(s1 - mx)
    e2 = jnp.exp(s2 - mx)
    e3 = jnp.exp(s3 - mx)
    e4 = jnp.exp(s4 - mx)
    inv = pl.reciprocal(e1 + e2 + e3 + e4 + EPSILON * jnp.exp(-mx), approx=True)
    w = jnp.concatenate([e1 * inv, e2 * inv, e3 * inv, e4 * inv], axis=0)    # (4*rows, W)
    wb = jnp.dot(w.astype(MXU_DTYPE), bcast_ref[...],
                 preferred_element_type=jnp.float32)                         # (4*rows, W*C) per-pixel weights
    weighted = wb * ts
    fused = (weighted[0:rows] + weighted[rows:2 * rows]
             + weighted[2 * rows:3 * rows] + weighted[3 * rows:4 * rows])

    cat = jnp.concatenate([fused, f1], axis=1)          # torch.cat([x_add, x1], dim=1), slab layout
    out = double_conv(cat, mc_cat_ref, bc_a_ref, mc_b_ref, bc_b_ref)         # self.conv re-used
    o_ref[...] = out.reshape(nb, img_h, wc_out).astype(o_ref.dtype)


# ----------------------------------------------------------------------------------
# One-time weight transforms (wrapper side): BN fold + 3x3 -> band matrix
# ----------------------------------------------------------------------------------
def _band_matrix(w_hwio, w_pix, splits=None):
    """(3,3,Cin,Cout) -> (3*w_pix*Cin, w_pix*Cout) block-banded matrix.
    `splits` describes the input-slab lane layout as channel-slab sizes
    (e.g. (cout, cout) for the concatenated [fused | x1] slab)."""
    cin = w_hwio.shape[2]
    if splits is None:
        splits = (cin,)
    assert sum(splits) == cin
    dy_blocks = []
    for dy in range(3):
        slabs, lo = [], 0
        for s in splits:
            m = None
            for dx in range(3):
                shift = jnp.eye(w_pix, k=1 - dx, dtype=w_hwio.dtype)   # dx shift + W zero-pad
                term = jnp.kron(shift, w_hwio[dy, dx, lo:lo + s, :])
                m = term if m is None else m + term
            slabs.append(m)
            lo += s
        dy_blocks.append(jnp.concatenate(slabs, axis=0))
    return jnp.concatenate(dy_blocks, axis=0)


def _layer_band(p, w_pix, splits=None):
    m = _band_matrix(p["w"], w_pix, splits).astype(MXU_DTYPE)
    bias = jnp.tile(p["bias"], w_pix)[None, :].astype(jnp.float32)      # (1, W*Cout)
    return m, bias


def build_kernel_params(params, w_pix, cout):
    conv_a, conv_b = params["conv"]
    in0 = conv_a["w"].shape[2]
    assert in0 == 2 * cout, "cat([x_add, x1]) -> self.conv requires in_channels_0 == 2*out_channels"
    mc_a, bc_a = _layer_band(conv_a, w_pix)
    mc_b, bc_b = _layer_band(conv_b, w_pix)
    mc_cat, _ = _layer_band(conv_a, w_pix, splits=(cout, in0 - cout))
    m1_a, b1_a = _layer_band(params["conv_1"][0], w_pix)
    m1_b, b1_b = _layer_band(params["conv_1"][1], w_pix)
    m2_a, b2_a = _layer_band(params["conv_2"][0], w_pix)
    m2_b, b2_b = _layer_band(params["conv_2"][1], w_pix)
    m5_a, b5_a = _layer_band(params["maxpool_conv_0"][0], w_pix)
    m5_b, b5_b = _layer_band(params["maxpool_conv_0"][1], w_pix)
    # channel-mean "pool" (W*C, W) and per-pixel lane expander (W, W*C); 1/C and 0/1 are
    # exact in bf16, so the bf16 MXU path only loses the bf16 rounding of the operands.
    pool = (jnp.kron(jnp.eye(w_pix), jnp.ones((cout, 1))) / cout).astype(MXU_DTYPE)
    bcast = jnp.kron(jnp.eye(w_pix), jnp.ones((1, cout))).astype(MXU_DTYPE)
    return (mc_a, bc_a, mc_b, bc_b, mc_cat,
            m1_a, b1_a, m1_b, b1_b,
            m2_a, b2_a, m2_b, b2_b,
            m5_a, b5_a, m5_b, b5_b,
            pool, bcast)


# ----------------------------------------------------------------------------------
# Plain-JAX glue: bilinear upsample (align_corners=True), pad, maxpool
# ----------------------------------------------------------------------------------
def upsample_bilinear_align_corners(x, scale):
    def interp(x, axis, out_size):
        in_size = x.shape[axis]
        pos = jnp.arange(out_size, dtype=jnp.float32) * (in_size - 1) / (out_size - 1)
        lo = jnp.floor(pos).astype(jnp.int32)
        hi = jnp.minimum(lo + 1, in_size - 1)
        frac = (pos - lo.astype(jnp.float32)).reshape(
            [out_size if a == axis else 1 for a in range(x.ndim)])
        return jnp.take(x, lo, axis=axis) * (1.0 - frac) + jnp.take(x, hi, axis=axis) * frac

    x = interp(x, 1, x.shape[1] * scale)
    x = interp(x, 2, x.shape[2] * scale)
    return x


def pad_to_hw(x, ht, wt):
    dy, dx = ht - x.shape[1], wt - x.shape[2]
    return jnp.pad(x, ((0, 0), (dy // 2, dy - dy // 2), (dx // 2, dx - dx // 2), (0, 0)))


def maxpool2(x):
    n, h, w, c = x.shape
    return x.reshape(n, h // 2, 2, w // 2, 2, c).max(axis=(2, 4))


# ----------------------------------------------------------------------------------
# Module forward: one pallas_call, batch-parallel grid, whole fused graph per step
# ----------------------------------------------------------------------------------
def up_dense_3_softmax(kernel_params, x1, x2, x3, x4, x5, *, items_per_step=1):
    n, ht, wt, cout = x4.shape
    assert n % items_per_step == 0
    x1 = pad_to_hw(upsample_bilinear_align_corners(x1, 2), ht, wt)
    x2 = pad_to_hw(upsample_bilinear_align_corners(x2, 4), ht, wt)
    x3 = pad_to_hw(upsample_bilinear_align_corners(x3, 2), ht, wt)
    x5 = maxpool2(x5)

    def slab(t):  # NHWC -> lane-dense (N, H, W*C)
        b, h, w, c = t.shape
        return t.reshape(b, h, w * c)

    acts = (slab(x1), slab(x2), slab(x3), slab(x4), slab(x5))
    params = tuple(kernel_params)
    nb = items_per_step

    act_specs = [pl.BlockSpec((nb, ht, a.shape[2]), lambda i: (i, 0, 0)) for a in acts]
    # Weights / pool / bcast: constant block index -> stay VMEM-resident across grid steps.
    param_specs = [pl.BlockSpec(a.shape, lambda i, _nd=a.ndim: (0,) * _nd) for a in params]

    out = pl.pallas_call(
        _up_dense_kernel,
        out_shape=jax.ShapeDtypeStruct((n, ht, wt * cout), x4.dtype),
        grid=(n // nb,),
        in_specs=act_specs + param_specs,
        out_specs=pl.BlockSpec((nb, ht, wt * cout), lambda i: (i, 0, 0)),
        compiler_params=pltpu.CompilerParams(dimension_semantics=("parallel",)),
    )(*acts, *params)
    return out.reshape(n, ht, wt, cout)


def _default_items_per_step(n):
    """v7x (2 TensorCores): 1 item per grid step so the parallel batch axis feeds both cores.
    Single-TC chips (v5e/v6e): fold the whole batch into the matmul M dimension."""
    try:
        kind = jax.devices()[0].device_kind.lower()
    except Exception:
        return 1
    return 1 if "v7" in kind else n


# ----------------------------------------------------------------------------------
# Parameter init (deterministic, synthetic); BN scale folded directly into the weights
# ----------------------------------------------------------------------------------
def _init_conv_bn(key, cin, cout):
    kw, kb, kg, kbt = jax.random.split(key, 4)
    w = jax.random.normal(kw, (3, 3, cin, cout), jnp.float32) / jnp.sqrt(9.0 * cin)
    b = 0.05 * jax.random.normal(kb, (cout,), jnp.float32)
    gamma = 1.0 + 0.1 * jax.random.normal(kg, (cout,), jnp.float32)
    beta = 0.1 * jax.random.normal(kbt, (cout,), jnp.float32)
    running_mean = jnp.zeros((cout,), jnp.float32)
    running_var = jnp.ones((cout,), jnp.float32)
    scale = gamma / jnp.sqrt(running_var + BN_EPS)
    return dict(w=w * scale[None, None, None, :],          # BN scale folded into weights
                bias=beta + (b - running_mean) * scale)    # conv bias + BN shift folded


def init_double_conv(key, cin, cout, cmid=None):
    cmid = cout if cmid is None else cmid
    k1, k2 = jax.random.split(key)
    return (_init_conv_bn(k1, cin, cmid), _init_conv_bn(k2, cmid, cout))


def init_up_dense_3_softmax(key, in0, in1, in2, cout):
    k = jax.random.split(key, 4)
    return dict(
        conv=init_double_conv(k[0], in0, cout, in0 // 2),
        conv_1=init_double_conv(k[1], in1, cout, in1 // 2),
        conv_2=init_double_conv(k[2], in0, cout, in0 // 2),
        maxpool_conv_0=init_double_conv(k[3], in2, cout),
    )


# ----------------------------------------------------------------------------------
# Pure-JAX reference (same folded params) to validate the band-matrix / fused kernel
# ----------------------------------------------------------------------------------
def _double_conv_ref(x, layer_params):
    for p in layer_params:
        x = jax.lax.conv_general_dilated(
            x, p["w"], window_strides=(1, 1), padding="SAME",
            dimension_numbers=("NHWC", "HWIO", "NHWC"))
        x = jnp.maximum(x + p["bias"], 0.0)
    return x


def _fusion_ref(t1, t2, t3, t4):
    e = [jnp.exp(jnp.mean(t, axis=-1, keepdims=True)) for t in (t1, t2, t3, t4)]
    d = e[0] + e[1] + e[2] + e[3] + EPSILON
    return (e[0] * t1 + e[1] * t2 + e[2] * t3 + e[3] * t4) / d


def up_dense_3_softmax_reference(params, x1, x2, x3, x4, x5):
    ht, wt = x4.shape[1], x4.shape[2]
    x1 = pad_to_hw(upsample_bilinear_align_corners(x1, 2), ht, wt)
    x2 = pad_to_hw(upsample_bilinear_align_corners(x2, 4), ht, wt)
    x3 = pad_to_hw(upsample_bilinear_align_corners(x3, 2), ht, wt)
    f1 = _double_conv_ref(x1, params["conv"])
    f2 = _double_conv_ref(x2, params["conv_1"])
    f3 = _double_conv_ref(x3, params["conv_2"])
    f5 = _double_conv_ref(maxpool2(x5), params["maxpool_conv_0"])
    fused = _fusion_ref(f2, f3, x4, f5)
    x = jnp.concatenate([fused, f1], axis=-1)
    return _double_conv_ref(x, params["conv"])


if __name__ == "__main__":
    root = jax.random.PRNGKey(0)
    kp, k1, k2, k3, k4, k5 = jax.random.split(root, 6)

    in0, in1, in2, cout = 16, 8, 8, 8      # in0 == 2*cout required by the final cat->conv
    N, H, W = 2, 16, 16

    params = init_up_dense_3_softmax(kp, in0, in1, in2, cout)
    kparams = build_kernel_params(params, W, cout)   # one-time weight -> band-matrix transform

    x1 = jax.random.normal(k1, (N, H // 2, W // 2, in0), jnp.float32)
    x2 = jax.random.normal(k2, (N, H // 4, W // 4, in1), jnp.float32)
    x3 = jax.random.normal(k3, (N, H // 2, W // 2, in0), jnp.float32)
    x4 = jax.random.normal(k4, (N, H, W, cout), jnp.float32)
    x5 = jax.random.normal(k5, (N, 2 * H, 2 * W, in2), jnp.float32)

    nb = _default_items_per_step(N)
    fwd = jax.jit(up_dense_3_softmax, static_argnames=("items_per_step",))
    out = jax.block_until_ready(fwd(kparams, x1, x2, x3, x4, x5, items_per_step=nb))
    assert out.shape == (N, H, W, cout), out.shape
    assert bool(jnp.all(jnp.isfinite(out)))

    ref = jax.block_until_ready(up_dense_3_softmax_reference(params, x1, x2, x3, x4, x5))
    max_err = float(jnp.max(jnp.abs(out - ref)))
    tol = max(0.1, 0.03 * float(jnp.max(jnp.abs(ref))))   # bf16 MXU path: ~3% of output range
    assert max_err < tol, f"kernel/reference mismatch, max abs err = {max_err} (tol {tol})"

    print("KERNEL_OK")
</pallas_src>

<mosaic_0001>
module attributes {stable_mosaic.version = 11 : i64} {
  func.func @_up_dense_kernel(%arg0: i32, %arg1: memref<2x16x256xf32, #tpu.memory_space<vmem>>, %arg2: memref<2x16x128xf32, #tpu.memory_space<vmem>>, %arg3: memref<2x16x256xf32, #tpu.memory_space<vmem>>, %arg4: memref<2x16x128xf32, #tpu.memory_space<vmem>>, %arg5: memref<2x16x128xf32, #tpu.memory_space<vmem>>, %arg6: memref<768x128xbf16, #tpu.memory_space<vmem>>, %arg7: memref<1x128xf32, #tpu.memory_space<vmem>>, %arg8: memref<384x128xbf16, #tpu.memory_space<vmem>>, %arg9: memref<1x128xf32, #tpu.memory_space<vmem>>, %arg10: memref<768x128xbf16, #tpu.memory_space<vmem>>, %arg11: memref<384x64xbf16, #tpu.memory_space<vmem>>, %arg12: memref<1x64xf32, #tpu.memory_space<vmem>>, %arg13: memref<192x128xbf16, #tpu.memory_space<vmem>>, %arg14: memref<1x128xf32, #tpu.memory_space<vmem>>, %arg15: memref<768x128xbf16, #tpu.memory_space<vmem>>, %arg16: memref<1x128xf32, #tpu.memory_space<vmem>>, %arg17: memref<384x128xbf16, #tpu.memory_space<vmem>>, %arg18: memref<1x128xf32, #tpu.memory_space<vmem>>, %arg19: memref<384x128xbf16, #tpu.memory_space<vmem>>, %arg20: memref<1x128xf32, #tpu.memory_space<vmem>>, %arg21: memref<384x128xbf16, #tpu.memory_space<vmem>>, %arg22: memref<1x128xf32, #tpu.memory_space<vmem>>, %arg23: memref<128x16xbf16, #tpu.memory_space<vmem>>, %arg24: memref<16x128xbf16, #tpu.memory_space<vmem>>, %arg25: memref<2x16x128xf32, #tpu.memory_space<vmem>>) attributes {dimension_semantics = [#tpu.dimension_semantics<parallel>], iteration_bounds = array<i64: 1>, scalar_prefetch = 0 : i64, scratch_operands = 0 : i64, tpu.core_type = #tpu.core_type<tc>, window_params = [{transform_indices = @transform_0, window_bounds = array<i64: 2, 16, 256>}, {transform_indices = @transform_1, window_bounds = array<i64: 2, 16, 128>}, {transform_indices = @transform_2, window_bounds = array<i64: 2, 16, 256>}, {transform_indices = @transform_3, window_bounds = array<i64: 2, 16, 128>}, {transform_indices = @transform_4, window_bounds = array<i64: 2, 16, 128>}, {pipeline_mode = #tpu.pipeline_mode<synchronous>, transform_indices = @transform_5, window_bounds = array<i64: 768, 128>}, {pipeline_mode = #tpu.pipeline_mode<synchronous>, transform_indices = @transform_6, window_bounds = array<i64: 1, 128>}, {pipeline_mode = #tpu.pipeline_mode<synchronous>, transform_indices = @transform_7, window_bounds = array<i64: 384, 128>}, {pipeline_mode = #tpu.pipeline_mode<synchronous>, transform_indices = @transform_8, window_bounds = array<i64: 1, 128>}, {pipeline_mode = #tpu.pipeline_mode<synchronous>, transform_indices = @transform_9, window_bounds = array<i64: 768, 128>}, {pipeline_mode = #tpu.pipeline_mode<synchronous>, transform_indices = @transform_10, window_bounds = array<i64: 384, 64>}, {pipeline_mode = #tpu.pipeline_mode<synchronous>, transform_indices = @transform_11, window_bounds = array<i64: 1, 64>}, {pipeline_mode = #tpu.pipeline_mode<synchronous>, transform_indices = @transform_12, window_bounds = array<i64: 192, 128>}, {pipeline_mode = #tpu.pipeline_mode<synchronous>, transform_indices = @transform_13, window_bounds = array<i64: 1, 128>}, {pipeline_mode = #tpu.pipeline_mode<synchronous>, transform_indices = @transform_14, window_bounds = array<i64: 768, 128>}, {pipeline_mode = #tpu.pipeline_mode<synchronous>, transform_indices = @transform_15, window_bounds = array<i64: 1, 128>}, {pipeline_mode = #tpu.pipeline_mode<synchronous>, transform_indices = @transform_16, window_bounds = array<i64: 384, 128>}, {pipeline_mode = #tpu.pipeline_mode<synchronous>, transform_indices = @transform_17, window_bounds = array<i64: 1, 128>}, {pipeline_mode = #tpu.pipeline_mode<synchronous>, transform_indices = @transform_18, window_bounds = array<i64: 384, 128>}, {pipeline_mode = #tpu.pipeline_mode<synchronous>, transform_indices = @transform_19, window_bounds = array<i64: 1, 128>}, {pipeline_mode = #tpu.pipeline_mode<synchronous>, transform_indices = @transform_20, window_bounds = array<i64: 384, 128>}, {pipeline_mode = #tpu.pipeline_mode<synchronous>, transform_indices = @transform_21, window_bounds = array<i64: 1, 128>}, {pipeline_mode = #tpu.pipeline_mode<synchronous>, transform_indices = @transform_22, window_bounds = array<i64: 128, 16>}, {pipeline_mode = #tpu.pipeline_mode<synchronous>, transform_indices = @transform_23, window_bounds = array<i64: 16, 128>}, {transform_indices = @transform_24, window_bounds = array<i64: 2, 16, 128>}]} {
    %0 = tpu.iota {dimensions = array<i32: 0>} : vector<32x1xi32>
    %c16_i32 = arith.constant 16 : i32
    %c0_i32 = arith.constant 0 : i32
    %1 = arith.cmpi eq, %c16_i32, %c0_i32 : i32
    %c1_i32 = arith.constant 1 : i32
    %2 = arith.select %1, %c1_i32, %c16_i32 : i32
    %3 = vector.broadcast %2 : i32 to vector<32x1xi32>
    %4 = arith.remsi %0, %3 : vector<32x1xi32>
    %c0_i32_0 = arith.constant 0 : i32
    %5 = vector.broadcast %c0_i32_0 : i32 to vector<32x1xi32>
    %6 = arith.cmpi ne, %4, %5 : vector<32x1xi32>
    %c0_i32_1 = arith.constant 0 : i32
    %7 = vector.broadcast %c0_i32_1 : i32 to vector<32x1xi32>
    %8 = arith.cmpi slt, %4, %7 : vector<32x1xi32>
    %c0_i32_2 = arith.constant 0 : i32
    %9 = arith.cmpi slt, %2, %c0_i32_2 : i32
    %10 = vector.broadcast %9 : i1 to vector<32x1xi1>
    %11 = vector.broadcast %10 : vector<32x1xi1> to vector<32x1xi1>
    %12 = arith.xori %8, %11 : vector<32x1xi1>
    %13 = arith.andi %12, %6 : vector<32x1xi1>
    %14 = vector.broadcast %2 : i32 to vector<32x1xi32>
    %15 = arith.addi %4, %14 : vector<32x1xi32>
    %16 = arith.select %13, %15, %4 : vector<32x1xi1>, vector<32x1xi32>
    %c0_i32_3 = arith.constant 0 : i32
    %17 = vector.broadcast %c0_i32_3 : i32 to vector<32x1xi32>
    %18 = arith.cmpi eq, %16, %17 : vector<32x1xi32>
    %c16_i32_4 = arith.constant 16 : i32
    %c0_i32_5 = arith.constant 0 : i32
    %19 = arith.cmpi eq, %c16_i32_4, %c0_i32_5 : i32
    %c1_i32_6 = arith.constant 1 : i32
    %20 = arith.select %19, %c1_i32_6, %c16_i32_4 : i32
    %21 = vector.broadcast %20 : i32 to vector<32x1xi32>
    %22 = arith.remsi %0, %21 : vector<32x1xi32>
    %c0_i32_7 = arith.constant 0 : i32
    %23 = vector.broadcast %c0_i32_7 : i32 to vector<32x1xi32>
    %24 = arith.cmpi ne, %22, %23 : vector<32x1xi32>
    %c0_i32_8 = arith.constant 0 : i32
    %25 = vector.broadcast %c0_i32_8 : i32 to vector<32x1xi32>
    %26 = arith.cmpi slt, %22, %25 : vector<32x1xi32>
    %c0_i32_9 = arith.constant 0 : i32
    %27 = arith.cmpi slt, %20, %c0_i32_9 : i32
    %28 = vector.broadcast %27 : i1 to vector<32x1xi1>
    %29 = vector.broadcast %28 : vector<32x1xi1> to vector<32x1xi1>
    %30 = arith.xori %26, %29 : vector<32x1xi1>
    %31 = arith.andi %30, %24 : vector<32x1xi1>
    %32 = vector.broadcast %20 : i32 to vector<32x1xi32>
    %33 = arith.addi %22, %32 : vector<32x1xi32>
    %34 = arith.select %31, %33, %22 : vector<32x1xi1>, vector<32x1xi32>
    %c15_i32 = arith.constant 15 : i32
    %35 = vector.broadcast %c15_i32 : i32 to vector<32x1xi32>
    %36 = arith.cmpi eq, %34, %35 : vector<32x1xi32>
    %c0 = arith.constant 0 : index
    %c0_10 = arith.constant 0 : index
    %c0_11 = arith.constant 0 : index
    %37 = vector.load %arg1[%c0, %c0_10, %c0_11] : memref<2x16x256xf32, #tpu.memory_space<vmem>>, vector<2x16x256xf32>
    %38 = vector.shape_cast %37 : vector<2x16x256xf32> to vector<32x256xf32>
    %39 = vector.extract_strided_slice %38 {offsets = [31, 0], sizes = [1, 256], strides = [1, 1]} : vector<32x256xf32> to vector<1x256xf32>
    %40 = vector.extract_strided_slice %38 {offsets = [0, 0], sizes = [31, 256], strides = [1, 1]} : vector<32x256xf32> to vector<31x256xf32>
    %41 = tpu.concatenate %39, %40 in 0 : vector<1x256xf32>, vector<31x256xf32> -> vector<32x256xf32>
    %cst = arith.constant 0.000000e+00 : f32
    %42 = vector.shape_cast %18 : vector<32x1xi1> to vector<32x1xi1>
    %43 = vector.broadcast %42 : vector<32x1xi1> to vector<32x256xi1>
    %44 = vector.broadcast %cst : f32 to vector<32x256xf32>
    %45 = arith.select %43, %44, %41 : vector<32x256xi1>, vector<32x256xf32>
    %46 = vector.extract_strided_slice %38 {offsets = [1, 0], sizes = [31, 256], strides = [1, 1]} : vector<32x256xf32> to vector<31x256xf32>
    %47 = vector.extract_strided_slice %38 {offsets = [0, 0], sizes = [1, 256], strides = [1, 1]} : vector<32x256xf32> to vector<1x256xf32>
    %48 = tpu.concatenate %46, %47 in 0 : vector<31x256xf32>, vector<1x256xf32> -> vector<32x256xf32>
    %cst_12 = arith.constant 0.000000e+00 : f32
    %49 = vector.shape_cast %36 : vector<32x1xi1> to vector<32x1xi1>
    %50 = vector.broadcast %49 : vector<32x1xi1> to vector<32x256xi1>
    %51 = vector.broadcast %cst_12 : f32 to vector<32x256xf32>
    %52 = arith.select %50, %51, %48 : vector<32x256xi1>, vector<32x256xf32>
    %53 = tpu.concatenate %45, %38, %52 in 1 : vector<32x256xf32>, vector<32x256xf32>, vector<32x256xf32> -> vector<32x768xf32>
    %54 = arith.truncf %53 : vector<32x768xf32> to vector<32x768xbf16>
    %c0_13 = arith.constant 0 : index
    %c0_14 = arith.constant 0 : index
    %55 = vector.load %arg6[%c0_13, %c0_14] : memref<768x128xbf16, #tpu.memory_space<vmem>>, vector<768x128xbf16>
    %cst_15 = arith.constant dense<0.000000e+00> : vector<32x128xf32>
    %56 = tpu.matmul %54, %55, %cst_15 {dimension_numbers = #tpu.dot_dimension_numbers<[1], [0], [0], [1], [0, 0, 1, 1], [], []>} : vector<32x768xbf16>, vector<768x128xbf16>, vector<32x128xf32> -> vector<32x128xf32>
    %c0_16 = arith.constant 0 : index
    %c0_17 = arith.constant 0 : index
    %57 = vector.load %arg7[%c0_16, %c0_17] : memref<1x128xf32, #tpu.memory_space<vmem>>, vector<1x128xf32>
    %58 = vector.broadcast %57 : vector<1x128xf32> to vector<32x128xf32>
    %59 = arith.addf %56, %58 : vector<32x128xf32>
    %cst_18 = arith.constant 0.000000e+00 : f32
    %60 = vector.broadcast %cst_18 : f32 to vector<32x128xf32>
    %61 = arith.maximumf %59, %60 : vector<32x128xf32>
    %62 = vector.extract_strided_slice %61 {offsets = [31, 0], sizes = [1, 128], strides = [1, 1]} : vector<32x128xf32> to vector<1x128xf32>
    %63 = vector.extract_strided_slice %61 {offsets = [0, 0], sizes = [31, 128], strides = [1, 1]} : vector<32x128xf32> to vector<31x128xf32>
    %64 = tpu.concatenate %62, %63 in 0 : vector<1x128xf32>, vector<31x128xf32> -> vector<32x128xf32>
    %cst_19 = arith.constant 0.000000e+00 : f32
    %65 = vector.shape_cast %18 : vector<32x1xi1> to vector<32x1xi1>
    %66 = vector.broadcast %65 : vector<32x1xi1> to vector<32x128xi1>
    %67 = vector.broadcast %cst_19 : f32 to vector<32x128xf32>
    %68 = arith.select %66, %67, %64 : vector<32x128xi1>, vector<32x128xf32>
    %69 = vector.extract_strided_slice %61 {offsets = [1, 0], sizes = [31, 128], strides = [1, 1]} : vector<32x128xf32> to vector<31x128xf32>
    %70 = vector.extract_strided_slice %61 {offsets = [0, 0], sizes = [1, 128], strides = [1, 1]} : vector<32x128xf32> to vector<1x128xf32>
    %71 = tpu.concatenate %69, %70 in 0 : vector<31x128xf32>, vector<1x128xf32> -> vector<32x128xf32>
    %cst_20 = arith.constant 0.000000e+00 : f32
    %72 = vector.shape_cast %36 : vector<32x1xi1> to vector<32x1xi1>
    %73 = vector.broadcast %72 : vector<32x1xi1> to vector<32x128xi1>
    %74 = vector.broadcast %cst_20 : f32 to vector<32x128xf32>
    %75 = arith.select %73, %74, %71 : vector<32x128xi1>, vector<32x128xf32>
    %76 = tpu.concatenate %68, %61, %75 in 1 : vector<32x128xf32>, vector<32x128xf32>, vector<32x128xf32> -> vector<32x384xf32>
    %77 = arith.truncf %76 : vector<32x384xf32> to vector<32x384xbf16>
    %c0_21 = arith.constant 0 : index
    %c0_22 = arith.constant 0 : index
    %78 = vector.load %arg8[%c0_21, %c0_22] : memref<384x128xbf16, #tpu.memory_space<vmem>>, vector<384x128xbf16>
    %cst_23 = arith.constant dense<0.000000e+00> : vector<32x128xf32>
    %79 = tpu.matmul %77, %78, %cst_23 {dimension_numbers = #tpu.dot_dimension_numbers<[1], [0], [0], [1], [0, 0, 1, 1], [], []>} : vector<32x384xbf16>, vector<384x128xbf16>, vector<32x128xf32> -> vector<32x128xf32>
    %c0_24 = arith.constant 0 : index
    %c0_25 = arith.constant 0 : index
    %80 = vector.load %arg9[%c0_24, %c0_25] : memref<1x128xf32, #tpu.memory_space<vmem>>, vector<1x128xf32>
    %81 = vector.broadcast %80 : vector<1x128xf32> to vector<32x128xf32>
    %82 = arith.addf %79, %81 : vector<32x128xf32>
    %cst_26 = arith.constant 0.000000e+00 : f32
    %83 = vector.broadcast %cst_26 : f32 to vector<32x128xf32>
    %84 = arith.maximumf %82, %83 : vector<32x128xf32>
    %c0_27 = arith.constant 0 : index
    %c0_28 = arith.constant 0 : index
    %c0_29 = arith.constant 0 : index
    %85 = vector.load %arg2[%c0_27, %c0_28, %c0_29] : memref<2x16x128xf32, #tpu.memory_space<vmem>>, vector<2x16x128xf32>
    %86 = vector.shape_cast %85 : vector<2x16x128xf32> to vector<32x128xf32>
    %87 = vector.extract_strided_slice %86 {offsets = [31, 0], sizes = [1, 128], strides = [1, 1]} : vector<32x128xf32> to vector<1x128xf32>
    %88 = vector.extract_strided_slice %86 {offsets = [0, 0], sizes = [31, 128], strides = [1, 1]} : vector<32x128xf32> to vector<31x128xf32>
    %89 = tpu.concatenate %87, %88 in 0 : vector<1x128xf32>, vector<31x128xf32> -> vector<32x128xf32>
    %cst_30 = arith.constant 0.000000e+00 : f32
    %90 = vector.shape_cast %18 : vector<32x1xi1> to vector<32x1xi1>
    %91 = vector.broadcast %90 : vector<32x1xi1> to vector<32x128xi1>
    %92 = vector.broadcast %cst_30 : f32 to vector<32x128xf32>
    %93 = arith.select %91, %92, %89 : vector<32x128xi1>, vector<32x128xf32>
    %94 = vector.extract_strided_slice %86 {offsets = [1, 0], sizes = [31, 128], strides = [1, 1]} : vector<32x128xf32> to vector<31x128xf32>
    %95 = vector.extract_strided_slice %86 {offsets = [0, 0], sizes = [1, 128], strides = [1, 1]} : vector<32x128xf32> to vector<1x128xf32>
    %96 = tpu.concatenate %94, %95 in 0 : vector<31x128xf32>, vector<1x128xf32> -> vector<32x128xf32>
    %cst_31 = arith.constant 0.000000e+00 : f32
    %97 = vector.shape_cast %36 : vector<32x1xi1> to vector<32x1xi1>
    %98 = vector.broadcast %97 : vector<32x1xi1> to vector<32x128xi1>
    %99 = vector.broadcast %cst_31 : f32 to vector<32x128xf32>
    %100 = arith.select %98, %99, %96 : vector<32x128xi1>, vector<32x128xf32>
    %101 = tpu.concatenate %93, %86, %100 in 1 : vector<32x128xf32>, vector<32x128xf32>, vector<32x128xf32> -> vector<32x384xf32>
    %102 = arith.truncf %101 : vector<32x384xf32> to vector<32x384xbf16>
    %c0_32 = arith.constant 0 : index
    %c0_33 = arith.constant 0 : index
    %103 = vector.load %arg11[%c0_32, %c0_33] : memref<384x64xbf16, #tpu.memory_space<vmem>>, vector<384x64xbf16>
    %cst_34 = arith.constant dense<0.000000e+00> : vector<32x64xf32>
    %104 = tpu.matmul %102, %103, %cst_34 {dimension_numbers = #tpu.dot_dimension_numbers<[1], [0], [0], [1], [0, 0, 1, 1], [], []>} : vector<32x384xbf16>, vector<384x64xbf16>, vector<32x64xf32> -> vector<32x64xf32>
    %c0_35 = arith.constant 0 : index
    %c0_36 = arith.constant 0 : index
    %105 = vector.load %arg12[%c0_35, %c0_36] : memref<1x64xf32, #tpu.memory_space<vmem>>, vector<1x64xf32>
    %106 = vector.broadcast %105 : vector<1x64xf32> to vector<32x64xf32>
    %107 = arith.addf %104, %106 : vector<32x64xf32>
    %cst_37 = arith.constant 0.000000e+00 : f32
    %108 = vector.broadcast %cst_37 : f32 to vector<32x64xf32>
    %109 = arith.maximumf %107, %108 : vector<32x64xf32>
    %110 = vector.extract_strided_slice %109 {offsets = [31, 0], sizes = [1, 64], strides = [1, 1]} : vector<32x64xf32> to vector<1x64xf32>
    %111 = vector.extract_strided_slice %109 {offsets = [0, 0], sizes = [31, 64], strides = [1, 1]} : vector<32x64xf32> to vector<31x64xf32>
    %112 = tpu.concatenate %110, %111 in 0 : vector<1x64xf32>, vector<31x64xf32> -> vector<32x64xf32>
    %cst_38 = arith.constant 0.000000e+00 : f32
    %113 = vector.shape_cast %18 : vector<32x1xi1> to vector<32x1xi1>
    %114 = vector.broadcast %113 : vector<32x1xi1> to vector<32x64xi1>
    %115 = vector.broadcast %cst_38 : f32 to vector<32x64xf32>
    %116 = arith.select %114, %115, %112 : vector<32x64xi1>, vector<32x64xf32>
    %117 = vector.extract_strided_slice %109 {offsets = [1, 0], sizes = [31, 64], strides = [1, 1]} : vector<32x64xf32> to vector<31x64xf32>
    %118 = vector.extract_strided_slice %109 {offsets = [0, 0], sizes = [1, 64], strides = [1, 1]} : vector<32x64xf32> to vector<1x64xf32>
    %119 = tpu.concatenate %117, %118 in 0 : vector<31x64xf32>, vector<1x64xf32> -> vector<32x64xf32>
    %cst_39 = arith.constant 0.000000e+00 : f32
    %120 = vector.shape_cast %36 : vector<32x1xi1> to vector<32x1xi1>
    %121 = vector.broadcast %120 : vector<32x1xi1> to vector<32x64xi1>
    %122 = vector.broadcast %cst_39 : f32 to vector<32x64xf32>
    %123 = arith.select %121, %122, %119 : vector<32x64xi1>, vector<32x64xf32>
    %124 = tpu.concatenate %116, %109, %123 in 1 : vector<32x64xf32>, vector<32x64xf32>, vector<32x64xf32> -> vector<32x192xf32>
    %125 = arith.truncf %124 : vector<32x192xf32> to vector<32x192xbf16>
    %c0_40 = arith.constant 0 : index
    %c0_41 = arith.constant 0 : index
    %126 = vector.load %arg13[%c0_40, %c0_41] : memref<192x128xbf16, #tpu.memory_space<vmem>>, vector<192x128xbf16>
    %cst_42 = arith.constant dense<0.000000e+00> : vector<32x128xf32>
    %127 = tpu.matmul %125, %126, %cst_42 {dimension_numbers = #tpu.dot_dimension_numbers<[1], [0], [0], [1], [0, 0, 1, 1], [], []>} : vector<32x192xbf16>, vector<192x128xbf16>, vector<32x128xf32> -> vector<32x128xf32>
    %c0_43 = arith.constant 0 : index
    %c0_44 = arith.constant 0 : index
    %128 = vector.load %arg14[%c0_43, %c0_44] : memref<1x128xf32, #tpu.memory_space<vmem>>, vector<1x128xf32>
    %129 = vector.broadcast %128 : vector<1x128xf32> to vector<32x128xf32>
    %130 = arith.addf %127, %129 : vector<32x128xf32>
    %cst_45 = arith.constant 0.000000e+00 : f32
    %131 = vector.broadcast %cst_45 : f32 to vector<32x128xf32>
    %132 = arith.maximumf %130, %131 : vector<32x128xf32>
    %c0_46 = arith.constant 0 : index
    %c0_47 = arith.constant 0 : index
    %c0_48 = arith.constant 0 : index
    %133 = vector.load %arg3[%c0_46, %c0_47, %c0_48] : memref<2x16x256xf32, #tpu.memory_space<vmem>>, vector<2x16x256xf32>
    %134 = vector.shape_cast %133 : vector<2x16x256xf32> to vector<32x256xf32>
    %135 = vector.extract_strided_slice %134 {offsets = [31, 0], sizes = [1, 256], strides = [1, 1]} : vector<32x256xf32> to vector<1x256xf32>
    %136 = vector.extract_strided_slice %134 {offsets = [0, 0], sizes = [31, 256], strides = [1, 1]} : vector<32x256xf32> to vector<31x256xf32>
    %137 = tpu.concatenate %135, %136 in 0 : vector<1x256xf32>, vector<31x256xf32> -> vector<32x256xf32>
    %cst_49 = arith.constant 0.000000e+00 : f32
    %138 = vector.shape_cast %18 : vector<32x1xi1> to vector<32x1xi1>
    %139 = vector.broadcast %138 : vector<32x1xi1> to vector<32x256xi1>
    %140 = vector.broadcast %cst_49 : f32 to vector<32x256xf32>
    %141 = arith.select %139, %140, %137 : vector<32x256xi1>, vector<32x256xf32>
    %142 = vector.extract_strided_slice %134 {offsets = [1, 0], sizes = [31, 256], strides = [1, 1]} : vector<32x256xf32> to vector<31x256xf32>
    %143 = vector.extract_strided_slice %134 {offsets = [0, 0], sizes = [1, 256], strides = [1, 1]} : vector<32x256xf32> to vector<1x256xf32>
    %144 = tpu.concatenate %142, %143 in 0 : vector<31x256xf32>, vector<1x256xf32> -> vector<32x256xf32>
    %cst_50 = arith.constant 0.000000e+00 : f32
    %145 = vector.shape_cast %36 : vector<32x1xi1> to vector<32x1xi1>
    %146 = vector.broadcast %145 : vector<32x1xi1> to vector<32x256xi1>
    %147 = vector.broadcast %cst_50 : f32 to vector<32x256xf32>
    %148 = arith.select %146, %147, %144 : vector<32x256xi1>, vector<32x256xf32>
    %149 = tpu.concatenate %141, %134, %148 in 1 : vector<32x256xf32>, vector<32x256xf32>, vector<32x256xf32> -> vector<32x768xf32>
    %150 = arith.truncf %149 : vector<32x768xf32> to vector<32x768xbf16>
    %c0_51 = arith.constant 0 : index
    %c0_52 = arith.constant 0 : index
    %151 = vector.load %arg15[%c0_51, %c0_52] : memref<768x128xbf16, #tpu.memory_space<vmem>>, vector<768x128xbf16>
    %cst_53 = arith.constant dense<0.000000e+00> : vector<32x128xf32>
    %152 = tpu.matmul %150, %151, %cst_53 {dimension_numbers = #tpu.dot_dimension_numbers<[1], [0], [0], [1], [0, 0, 1, 1], [], []>} : vector<32x768xbf16>, vector<768x128xbf16>, vector<32x128xf32> -> vector<32x128xf32>
    %c0_54 = arith.constant 0 : index
    %c0_55 = arith.constant 0 : index
    %153 = vector.load %arg16[%c0_54, %c0_55] : memref<1x128xf32, #tpu.memory_space<vmem>>, vector<1x128xf32>
    %154 = vector.broadcast %153 : vector<1x128xf32> to vector<32x128xf32>
    %155 = arith.addf %152, %154 : vector<32x128xf32>
    %cst_56 = arith.constant 0.000000e+00 : f32
    %156 = vector.broadcast %cst_56 : f32 to vector<32x128xf32>
    %157 = arith.maximumf %155, %156 : vector<32x128xf32>
    %158 = vector.extract_strided_slice %157 {offsets = [31, 0], sizes = [1, 128], strides = [1, 1]} : vector<32x128xf32> to vector<1x128xf32>
    %159 = vector.extract_strided_slice %157 {offsets = [0, 0], sizes = [31, 128], strides = [1, 1]} : vector<32x128xf32> to vector<31x128xf32>
    %160 = tpu.concatenate %158, %159 in 0 : vector<1x128xf32>, vector<31x128xf32> -> vector<32x128xf32>
    %cst_57 = arith.constant 0.000000e+00 : f32
    %161 = vector.shape_cast %18 : vector<32x1xi1> to vector<32x1xi1>
    %162 = vector.broadcast %161 : vector<32x1xi1> to vector<32x128xi1>
    %163 = vector.broadcast %cst_57 : f32 to vector<32x128xf32>
    %164 = arith.select %162, %163, %160 : vector<32x128xi1>, vector<32x128xf32>
    %165 = vector.extract_strided_slice %157 {offsets = [1, 0], sizes = [31, 128], strides = [1, 1]} : vector<32x128xf32> to vector<31x128xf32>
    %166 = vector.extract_strided_slice %157 {offsets = [0, 0], sizes = [1, 128], strides = [1, 1]} : vector<32x128xf32> to vector<1x128xf32>
    %167 = tpu.concatenate %165, %166 in 0 : vector<31x128xf32>, vector<1x128xf32> -> vector<32x128xf32>
    %cst_58 = arith.constant 0.000000e+00 : f32
    %168 = vector.shape_cast %36 : vector<32x1xi1> to vector<32x1xi1>
    %169 = vector.broadcast %168 : vector<32x1xi1> to vector<32x128xi1>
    %170 = vector.broadcast %cst_58 : f32 to vector<32x128xf32>
    %171 = arith.select %169, %170, %167 : vector<32x128xi1>, vector<32x128xf32>
    %172 = tpu.concatenate %164, %157, %171 in 1 : vector<32x128xf32>, vector<32x128xf32>, vector<32x128xf32> -> vector<32x384xf32>
    %173 = arith.truncf %172 : vector<32x384xf32> to vector<32x384xbf16>
    %c0_59 = arith.constant 0 : index
    %c0_60 = arith.constant 0 : index
    %174 = vector.load %arg17[%c0_59, %c0_60] : memref<384x128xbf16, #tpu.memory_space<vmem>>, vector<384x128xbf16>
    %cst_61 = arith.constant dense<0.000000e+00> : vector<32x128xf32>
    %175 = tpu.matmul %173, %174, %cst_61 {dimension_numbers = #tpu.dot_dimension_numbers<[1], [0], [0], [1], [0, 0, 1, 1], [], []>} : vector<32x384xbf16>, vector<384x128xbf16>, vector<32x128xf32> -> vector<32x128xf32>
    %c0_62 = arith.constant 0 : index
    %c0_63 = arith.constant 0 : index
    %176 = vector.load %arg18[%c0_62, %c0_63] : memref<1x128xf32, #tpu.memory_space<vmem>>, vector<1x128xf32>
    %177 = vector.broadcast %176 : vector<1x128xf32> to vector<32x128xf32>
    %178 = arith.addf %175, %177 : vector<32x128xf32>
    %cst_64 = arith.constant 0.000000e+00 : f32
    %179 = vector.broadcast %cst_64 : f32 to vector<32x128xf32>
    %180 = arith.maximumf %178, %179 : vector<32x128xf32>
    %c0_65 = arith.constant 0 : index
    %c0_66 = arith.constant 0 : index
    %c0_67 = arith.constant 0 : index
    %181 = vector.load %arg5[%c0_65, %c0_66, %c0_67] : memref<2x16x128xf32, #tpu.memory_space<vmem>>, vector<2x16x128xf32>
    %182 = vector.shape_cast %181 : vector<2x16x128xf32> to vector<32x128xf32>
    %183 = vector.extract_strided_slice %182 {offsets = [31, 0], sizes = [1, 128], strides = [1, 1]} : vector<32x128xf32> to vector<1x128xf32>
    %184 = vector.extract_strided_slice %182 {offsets = [0, 0], sizes = [31, 128], strides = [1, 1]} : vector<32x128xf32> to vector<31x128xf32>
    %185 = tpu.concatenate %183, %184 in 0 : vector<1x128xf32>, vector<31x128xf32> -> vector<32x128xf32>
    %cst_68 = arith.constant 0.000000e+00 : f32
    %186 = vector.shape_cast %18 : vector<32x1xi1> to vector<32x1xi1>
    %187 = vector.broadcast %186 : vector<32x1xi1> to vector<32x128xi1>
    %188 = vector.broadcast %cst_68 : f32 to vector<32x128xf32>
    %189 = arith.select %187, %188, %185 : vector<32x128xi1>, vector<32x128xf32>
    %190 = vector.extract_strided_slice %182 {offsets = [1, 0], sizes = [31, 128], strides = [1, 1]} : vector<32x128xf32> to vector<31x128xf32>
    %191 = vector.extract_strided_slice %182 {offsets = [0, 0], sizes = [1, 128], strides = [1, 1]} : vector<32x128xf32> to vector<1x128xf32>
    %192 = tpu.concatenate %190, %191 in 0 : vector<31x128xf32>, vector<1x128xf32> -> vector<32x128xf32>
    %cst_69 = arith.constant 0.000000e+00 : f32
    %193 = vector.shape_cast %36 : vector<32x1xi1> to vector<32x1xi1>
    %194 = vector.broadcast %193 : vector<32x1xi1> to vector<32x128xi1>
    %195 = vector.broadcast %cst_69 : f32 to vector<32x128xf32>
    %196 = arith.select %194, %195, %192 : vector<32x128xi1>, vector<32x128xf32>
    %197 = tpu.concatenate %189, %182, %196 in 1 : vector<32x128xf32>, vector<32x128xf32>, vector<32x128xf32> -> vector<32x384xf32>
    %198 = arith.truncf %197 : vector<32x384xf32> to vector<32x384xbf16>
    %c0_70 = arith.constant 0 : index
    %c0_71 = arith.constant 0 : index
    %199 = vector.load %arg19[%c0_70, %c0_71] : memref<384x128xbf16, #tpu.memory_space<vmem>>, vector<384x128xbf16>
    %cst_72 = arith.constant dense<0.000000e+00> : vector<32x128xf32>
    %200 = tpu.matmul %198, %199, %cst_72 {dimension_numbers = #tpu.dot_dimension_numbers<[1], [0], [0], [1], [0, 0, 1, 1], [], []>} : vector<32x384xbf16>, vector<384x128xbf16>, vector<32x128xf32> -> vector<32x128xf32>
    %c0_73 = arith.constant 0 : index
    %c0_74 = arith.constant 0 : index
    %201 = vector.load %arg20[%c0_73, %c0_74] : memref<1x128xf32, #tpu.memory_space<vmem>>, vector<1x128xf32>
    %202 = vector.broadcast %201 : vector<1x128xf32> to vector<32x128xf32>
    %203 = arith.addf %200, %202 : vector<32x128xf32>
    %cst_75 = arith.constant 0.000000e+00 : f32
    %204 = vector.broadcast %cst_75 : f32 to vector<32x128xf32>
    %205 = arith.maximumf %203, %204 : vector<32x128xf32>
    %206 = vector.extract_strided_slice %205 {offsets = [31, 0], sizes = [1, 128], strides = [1, 1]} : vector<32x128xf32> to vector<1x128xf32>
    %207 = vector.extract_strided_slice %205 {offsets = [0, 0], sizes = [31, 128], strides = [1, 1]} : vector<32x128xf32> to vector<31x128xf32>
    %208 = tpu.concatenate %206, %207 in 0 : vector<1x128xf32>, vector<31x128xf32> -> vector<32x128xf32>
    %cst_76 = arith.constant 0.000000e+00 : f32
    %209 = vector.shape_cast %18 : vector<32x1xi1> to vector<32x1xi1>
    %210 = vector.broadcast %209 : vector<32x1xi1> to vector<32x128xi1>
    %211 = vector.broadcast %cst_76 : f32 to vector<32x128xf32>
    %212 = arith.select %210, %211, %208 : vector<32x128xi1>, vector<32x128xf32>
    %213 = vector.extract_strided_slice %205 {offsets = [1, 0], sizes = [31, 128], strides = [1, 1]} : vector<32x128xf32> to vector<31x128xf32>
    %214 = vector.extract_strided_slice %205 {offsets = [0, 0], sizes = [1, 128], strides = [1, 1]} : vector<32x128xf32> to vector<1x128xf32>
    %215 = tpu.concatenate %213, %214 in 0 : vector<31x128xf32>, vector<1x128xf32> -> vector<32x128xf32>
    %cst_77 = arith.constant 0.000000e+00 : f32
    %216 = vector.shape_cast %36 : vector<32x1xi1> to vector<32x1xi1>
    %217 = vector.broadcast %216 : vector<32x1xi1> to vector<32x128xi1>
    %218 = vector.broadcast %cst_77 : f32 to vector<32x128xf32>
    %219 = arith.select %217, %218, %215 : vector<32x128xi1>, vector<32x128xf32>
    %220 = tpu.concatenate %212, %205, %219 in 1 : vector<32x128xf32>, vector<32x128xf32>, vector<32x128xf32> -> vector<32x384xf32>
    %221 = arith.truncf %220 : vector<32x384xf32> to vector<32x384xbf16>
    %c0_78 = arith.constant 0 : index
    %c0_79 = arith.constant 0 : index
    %222 = vector.load %arg21[%c0_78, %c0_79] : memref<384x128xbf16, #tpu.memory_space<vmem>>, vector<384x128xbf16>
    %cst_80 = arith.constant dense<0.000000e+00> : vector<32x128xf32>
    %223 = tpu.matmul %221, %222, %cst_80 {dimension_numbers = #tpu.dot_dimension_numbers<[1], [0], [0], [1], [0, 0, 1, 1], [], []>} : vector<32x384xbf16>, vector<384x128xbf16>, vector<32x128xf32> -> vector<32x128xf32>
    %c0_81 = arith.constant 0 : index
    %c0_82 = arith.constant 0 : index
    %224 = vector.load %arg22[%c0_81, %c0_82] : memref<1x128xf32, #tpu.memory_space<vmem>>, vector<1x128xf32>
    %225 = vector.broadcast %224 : vector<1x128xf32> to vector<32x128xf32>
    %226 = arith.addf %223, %225 : vector<32x128xf32>
    %cst_83 = arith.constant 0.000000e+00 : f32
    %227 = vector.broadcast %cst_83 : f32 to vector<32x128xf32>
    %228 = arith.maximumf %226, %227 : vector<32x128xf32>
    %c0_84 = arith.constant 0 : index
    %c0_85 = arith.constant 0 : index
    %c0_86 = arith.constant 0 : index
    %229 = vector.load %arg4[%c0_84, %c0_85, %c0_86] : memref<2x16x128xf32, #tpu.memory_space<vmem>>, vector<2x16x128xf32>
    %230 = vector.shape_cast %229 : vector<2x16x128xf32> to vector<32x128xf32>
    %231 = tpu.concatenate %132, %180, %230, %228 in 0 : vector<32x128xf32>, vector<32x128xf32>, vector<32x128xf32>, vector<32x128xf32> -> vector<128x128xf32>
    %232 = arith.truncf %231 : vector<128x128xf32> to vector<128x128xbf16>
    %c0_87 = arith.constant 0 : index
    %c0_88 = arith.constant 0 : index
    %233 = vector.load %arg23[%c0_87, %c0_88] : memref<128x16xbf16, #tpu.memory_space<vmem>>, vector<128x16xbf16>
    %cst_89 = arith.constant dense<0.000000e+00> : vector<128x16xf32>
    %234 = tpu.matmul %232, %233, %cst_89 {dimension_numbers = #tpu.dot_dimension_numbers<[1], [0], [0], [1], [0, 0, 1, 1], [], []>} : vector<128x128xbf16>, vector<128x16xbf16>, vector<128x16xf32> -> vector<128x16xf32>
    %235 = vector.extract_strided_slice %234 {offsets = [0, 0], sizes = [32, 16], strides = [1, 1]} : vector<128x16xf32> to vector<32x16xf32>
    %236 = vector.extract_strided_slice %234 {offsets = [32, 0], sizes = [32, 16], strides = [1, 1]} : vector<128x16xf32> to vector<32x16xf32>
    %237 = vector.extract_strided_slice %234 {offsets = [64, 0], sizes = [32, 16], strides = [1, 1]} : vector<128x16xf32> to vector<32x16xf32>
    %238 = vector.extract_strided_slice %234 {offsets = [96, 0], sizes = [32, 16], strides = [1, 1]} : vector<128x16xf32> to vector<32x16xf32>
    %239 = arith.maximumf %235, %236 : vector<32x16xf32>
    %240 = arith.maximumf %237, %238 : vector<32x16xf32>
    %241 = arith.maximumf %239, %240 : vector<32x16xf32>
    %cst_90 = arith.constant 0.000000e+00 : f32
    %242 = vector.broadcast %cst_90 : f32 to vector<32x16xf32>
    %243 = arith.maximumf %241, %242 : vector<32x16xf32>
    %244 = arith.subf %235, %243 : vector<32x16xf32>
    %245 = math.exp %244 : vector<32x16xf32>
    %246 = arith.subf %236, %243 : vector<32x16xf32>
    %247 = math.exp %246 : vector<32x16xf32>
    %248 = arith.subf %237, %243 : vector<32x16xf32>
    %249 = math.exp %248 : vector<32x16xf32>
    %250 = arith.subf %238, %243 : vector<32x16xf32>
    %251 = math.exp %250 : vector<32x16xf32>
    %252 = arith.addf %245, %247 : vector<32x16xf32>
    %253 = arith.addf %252, %249 : vector<32x16xf32>
    %254 = arith.addf %253, %251 : vector<32x16xf32>
    %cst_91 = arith.constant 0.000000e+00 : f32
    %255 = vector.broadcast %cst_91 : f32 to vector<32x16xf32>
    %256 = arith.subf %255, %243 : vector<32x16xf32>
    %257 = math.exp %256 : vector<32x16xf32>
    %cst_92 = arith.constant 9.99999974E-6 : f32
    %258 = vector.broadcast %cst_92 : f32 to vector<32x16xf32>
    %259 = arith.mulf %258, %257 : vector<32x16xf32>
    %260 = arith.addf %254, %259 : vector<32x16xf32>
    %261 = tpu.reciprocal %260 {approx = true} : vector<32x16xf32> -> vector<32x16xf32>
    %262 = arith.mulf %245, %261 : vector<32x16xf32>
    %263 = arith.mulf %247, %261 : vector<32x16xf32>
    %264 = arith.mulf %249, %261 : vector<32x16xf32>
    %265 = arith.mulf %251, %261 : vector<32x16xf32>
    %266 = tpu.concatenate %262, %263, %264, %265 in 0 : vector<32x16xf32>, vector<32x16xf32>, vector<32x16xf32>, vector<32x16xf32> -> vector<128x16xf32>
    %267 = arith.truncf %266 : vector<128x16xf32> to vector<128x16xbf16>
    %c0_93 = arith.constant 0 : index
    %c0_94 = arith.constant 0 : index
    %268 = vector.load %arg24[%c0_93, %c0_94] : memref<16x128xbf16, #tpu.memory_space<vmem>>, vector<16x128xbf16>
    %cst_95 = arith.constant dense<0.000000e+00> : vector<128x128xf32>
    %269 = tpu.matmul %267, %268, %cst_95 {dimension_numbers = #tpu.dot_dimension_numbers<[1], [0], [0], [1], [0, 0, 1, 1], [], []>} : vector<128x16xbf16>, vector<16x128xbf16>, vector<128x128xf32> -> vector<128x128xf32>
    %270 = arith.mulf %269, %231 : vector<128x128xf32>
    %271 = vector.extract_strided_slice %270 {offsets = [0, 0], sizes = [32, 128], strides = [1, 1]} : vector<128x128xf32> to vector<32x128xf32>
    %272 = vector.extract_strided_slice %270 {offsets = [32, 0], sizes = [32, 128], strides = [1, 1]} : vector<128x128xf32> to vector<32x128xf32>
    %273 = arith.addf %271, %272 : vector<32x128xf32>
    %274 = vector.extract_strided_slice %270 {offsets = [64, 0], sizes = [32, 128], strides = [1, 1]} : vector<128x128xf32> to vector<32x128xf32>
    %275 = arith.addf %273, %274 : vector<32x128xf32>
    %276 = vector.extract_strided_slice %270 {offsets = [96, 0], sizes = [32, 128], strides = [1, 1]} : vector<128x128xf32> to vector<32x128xf32>
    %277 = arith.addf %275, %276 : vector<32x128xf32>
    %278 = tpu.concatenate %277, %84 in 1 : vector<32x128xf32>, vector<32x128xf32> -> vector<32x256xf32>
    %279 = vector.extract_strided_slice %278 {offsets = [31, 0], sizes = [1, 256], strides = [1, 1]} : vector<32x256xf32> to vector<1x256xf32>
    %280 = vector.extract_strided_slice %278 {offsets = [0, 0], sizes = [31, 256], strides = [1, 1]} : vector<32x256xf32> to vector<31x256xf32>
    %281 = tpu.concatenate %279, %280 in 0 : vector<1x256xf32>, vector<31x256xf32> -> vector<32x256xf32>
    %cst_96 = arith.constant 0.000000e+00 : f32
    %282 = vector.shape_cast %18 : vector<32x1xi1> to vector<32x1xi1>
    %283 = vector.broadcast %282 : vector<32x1xi1> to vector<32x256xi1>
    %284 = vector.broadcast %cst_96 : f32 to vector<32x256xf32>
    %285 = arith.select %283, %284, %281 : vector<32x256xi1>, vector<32x256xf32>
    %286 = vector.extract_strided_slice %278 {offsets = [1, 0], sizes = [31, 256], strides = [1, 1]} : vector<32x256xf32> to vector<31x256xf32>
    %287 = vector.extract_strided_slice %278 {offsets = [0, 0], sizes = [1, 256], strides = [1, 1]} : vector<32x256xf32> to vector<1x256xf32>
    %288 = tpu.concatenate %286, %287 in 0 : vector<31x256xf32>, vector<1x256xf32> -> vector<32x256xf32>
    %cst_97 = arith.constant 0.000000e+00 : f32
    %289 = vector.shape_cast %36 : vector<32x1xi1> to vector<32x1xi1>
    %290 = vector.broadcast %289 : vector<32x1xi1> to vector<32x256xi1>
    %291 = vector.broadcast %cst_97 : f32 to vector<32x256xf32>
    %292 = arith.select %290, %291, %288 : vector<32x256xi1>, vector<32x256xf32>
    %293 = tpu.concatenate %285, %278, %292 in 1 : vector<32x256xf32>, vector<32x256xf32>, vector<32x256xf32> -> vector<32x768xf32>
    %294 = arith.truncf %293 : vector<32x768xf32> to vector<32x768xbf16>
    %c0_98 = arith.constant 0 : index
    %c0_99 = arith.constant 0 : index
    %295 = vector.load %arg10[%c0_98, %c0_99] : memref<768x128xbf16, #tpu.memory_space<vmem>>, vector<768x128xbf16>
    %cst_100 = arith.constant dense<0.000000e+00> : vector<32x128xf32>
    %296 = tpu.matmul %294, %295, %cst_100 {dimension_numbers = #tpu.dot_dimension_numbers<[1], [0], [0], [1], [0, 0, 1, 1], [], []>} : vector<32x768xbf16>, vector<768x128xbf16>, vector<32x128xf32> -> vector<32x128xf32>
    %c0_101 = arith.constant 0 : index
    %c0_102 = arith.constant 0 : index
    %297 = vector.load %arg7[%c0_101, %c0_102] : memref<1x128xf32, #tpu.memory_space<vmem>>, vector<1x128xf32>
    %298 = vector.broadcast %297 : vector<1x128xf32> to vector<32x128xf32>
    %299 = arith.addf %296, %298 : vector<32x128xf32>
    %cst_103 = arith.constant 0.000000e+00 : f32
    %300 = vector.broadcast %cst_103 : f32 to vector<32x128xf32>
    %301 = arith.maximumf %299, %300 : vector<32x128xf32>
    %302 = vector.extract_strided_slice %301 {offsets = [31, 0], sizes = [1, 128], strides = [1, 1]} : vector<32x128xf32> to vector<1x128xf32>
    %303 = vector.extract_strided_slice %301 {offsets = [0, 0], sizes = [31, 128], strides = [1, 1]} : vector<32x128xf32> to vector<31x128xf32>
    %304 = tpu.concatenate %302, %303 in 0 : vector<1x128xf32>, vector<31x128xf32> -> vector<32x128xf32>
    %cst_104 = arith.constant 0.000000e+00 : f32
    %305 = vector.shape_cast %18 : vector<32x1xi1> to vector<32x1xi1>
    %306 = vector.broadcast %305 : vector<32x1xi1> to vector<32x128xi1>
    %307 = vector.broadcast %cst_104 : f32 to vector<32x128xf32>
    %308 = arith.select %306, %307, %304 : vector<32x128xi1>, vector<32x128xf32>
    %309 = vector.extract_strided_slice %301 {offsets = [1, 0], sizes = [31, 128], strides = [1, 1]} : vector<32x128xf32> to vector<31x128xf32>
    %310 = vector.extract_strided_slice %301 {offsets = [0, 0], sizes = [1, 128], strides = [1, 1]} : vector<32x128xf32> to vector<1x128xf32>
    %311 = tpu.concatenate %309, %310 in 0 : vector<31x128xf32>, vector<1x128xf32> -> vector<32x128xf32>
    %cst_105 = arith.constant 0.000000e+00 : f32
    %312 = vector.shape_cast %36 : vector<32x1xi1> to vector<32x1xi1>
    %313 = vector.broadcast %312 : vector<32x1xi1> to vector<32x128xi1>
    %314 = vector.broadcast %cst_105 : f32 to vector<32x128xf32>
    %315 = arith.select %313, %314, %311 : vector<32x128xi1>, vector<32x128xf32>
    %316 = tpu.concatenate %308, %301, %315 in 1 : vector<32x128xf32>, vector<32x128xf32>, vector<32x128xf32> -> vector<32x384xf32>
    %317 = arith.truncf %316 : vector<32x384xf32> to vector<32x384xbf16>
    %c0_106 = arith.constant 0 : index
    %c0_107 = arith.constant 0 : index
    %318 = vector.load %arg8[%c0_106, %c0_107] : memref<384x128xbf16, #tpu.memory_space<vmem>>, vector<384x128xbf16>
    %cst_108 = arith.constant dense<0.000000e+00> : vector<32x128xf32>
    %319 = tpu.matmul %317, %318, %cst_108 {dimension_numbers = #tpu.dot_dimension_numbers<[1], [0], [0], [1], [0, 0, 1, 1], [], []>} : vector<32x384xbf16>, vector<384x128xbf16>, vector<32x128xf32> -> vector<32x128xf32>
    %c0_109 = arith.constant 0 : index
    %c0_110 = arith.constant 0 : index
    %320 = vector.load %arg9[%c0_109, %c0_110] : memref<1x128xf32, #tpu.memory_space<vmem>>, vector<1x128xf32>
    %321 = vector.broadcast %320 : vector<1x128xf32> to vector<32x128xf32>
    %322 = arith.addf %319, %321 : vector<32x128xf32>
    %cst_111 = arith.constant 0.000000e+00 : f32
    %323 = vector.broadcast %cst_111 : f32 to vector<32x128xf32>
    %324 = arith.maximumf %322, %323 : vector<32x128xf32>
    %325 = vector.shape_cast %324 : vector<32x128xf32> to vector<2x16x128xf32>
    %c0_112 = arith.constant 0 : index
    %c0_113 = arith.constant 0 : index
    %c0_114 = arith.constant 0 : index
    %326 = vector.load %arg25[%c0_112, %c0_113, %c0_114] : memref<2x16x128xf32, #tpu.memory_space<vmem>>, vector<2x16x128xf32>
    tpu.vector_store %arg25[%c0_112, %c0_113, %c0_114], %325 {strides = array<i32>} : memref<2x16x128xf32, #tpu.memory_space<vmem>>, vector<2x16x128xf32>,
    return
  }
  func.func @transform_0(%arg0: i32) -> (i32, i32, i32) {
    %c0_i32 = arith.constant 0 : i32
    %c0_i32_0 = arith.constant 0 : i32
    %c0_i32_1 = arith.constant 0 : i32
    return %arg0, %c0_i32, %c0_i32_0 : i32, i32, i32
  }
  func.func @transform_1(%arg0: i32) -> (i32, i32, i32) {
    %c0_i32 = arith.constant 0 : i32
    %c0_i32_0 = arith.constant 0 : i32
    %c0_i32_1 = arith.constant 0 : i32
    return %arg0, %c0_i32, %c0_i32_0 : i32, i32, i32
  }
  func.func @transform_2(%arg0: i32) -> (i32, i32, i32) {
    %c0_i32 = arith.constant 0 : i32
    %c0_i32_0 = arith.constant 0 : i32
    %c0_i32_1 = arith.constant 0 : i32
    return %arg0, %c0_i32, %c0_i32_0 : i32, i32, i32
  }
  func.func @transform_3(%arg0: i32) -> (i32, i32, i32) {
    %c0_i32 = arith.constant 0 : i32
    %c0_i32_0 = arith.constant 0 : i32
    %c0_i32_1 = arith.constant 0 : i32
    return %arg0, %c0_i32, %c0_i32_0 : i32, i32, i32
  }
  func.func @transform_4(%arg0: i32) -> (i32, i32, i32) {
    %c0_i32 = arith.constant 0 : i32
    %c0_i32_0 = arith.constant 0 : i32
    %c0_i32_1 = arith.constant 0 : i32
    return %arg0, %c0_i32, %c0_i32_0 : i32, i32, i32
  }
  func.func @transform_5(%arg0: i32) -> (i32, i32) {
    %c0_i32 = arith.constant 0 : i32
    %c0_i32_0 = arith.constant 0 : i32
    %c0_i32_1 = arith.constant 0 : i32
    return %c0_i32, %c0_i32_0 : i32, i32
  }
  func.func @transform_6(%arg0: i32) -> (i32, i32) {
    %c0_i32 = arith.constant 0 : i32
    %c0_i32_0 = arith.constant 0 : i32
    %c0_i32_1 = arith.constant 0 : i32
    return %c0_i32, %c0_i32_0 : i32, i32
  }
  func.func @transform_7(%arg0: i32) -> (i32, i32) {
    %c0_i32 = arith.constant 0 : i32
    %c0_i32_0 = arith.constant 0 : i32
    %c0_i32_1 = arith.constant 0 : i32
    return %c0_i32, %c0_i32_0 : i32, i32
  }
  func.func @transform_8(%arg0: i32) -> (i32, i32) {
    %c0_i32 = arith.constant 0 : i32
    %c0_i32_0 = arith.constant 0 : i32
    %c0_i32_1 = arith.constant 0 : i32
    return %c0_i32, %c0_i32_0 : i32, i32
  }
  func.func @transform_9(%arg0: i32) -> (i32, i32) {
    %c0_i32 = arith.constant 0 : i32
    %c0_i32_0 = arith.constant 0 : i32
    %c0_i32_1 = arith.constant 0 : i32
    return %c0_i32, %c0_i32_0 : i32, i32
  }
  func.func @transform_10(%arg0: i32) -> (i32, i32) {
    %c0_i32 = arith.constant 0 : i32
    %c0_i32_0 = arith.constant 0 : i32
    %c0_i32_1 = arith.constant 0 : i32
    return %c0_i32, %c0_i32_0 : i32, i32
  }
  func.func @transform_11(%arg0: i32) -> (i32, i32) {
    %c0_i32 = arith.constant 0 : i32
    %c0_i32_0 = arith.constant 0 : i32
    %c0_i32_1 = arith.constant 0 : i32
    return %c0_i32, %c0_i32_0 : i32, i32
  }
  func.func @transform_12(%arg0: i32) -> (i32, i32) {
    %c0_i32 = arith.constant 0 : i32
    %c0_i32_0 = arith.constant 0 : i32
    %c0_i32_1 = arith.constant 0 : i32
    return %c0_i32, %c0_i32_0 : i32, i32
  }
  func.func @transform_13(%arg0: i32) -> (i32, i32) {
    %c0_i32 = arith.constant 0 : i32
    %c0_i32_0 = arith.constant 0 : i32
    %c0_i32_1 = arith.constant 0 : i32
    return %c0_i32, %c0_i32_0 : i32, i32
  }
  func.func @transform_14(%arg0: i32) -> (i32, i32) {
    %c0_i32 = arith.constant 0 : i32
    %c0_i32_0 = arith.constant 0 : i32
    %c0_i32_1 = arith.constant 0 : i32
    return %c0_i32, %c0_i32_0 : i32, i32
  }
  func.func @transform_15(%arg0: i32) -> (i32, i32) {
    %c0_i32 = arith.constant 0 : i32
    %c0_i32_0 = arith.constant 0 : i32
    %c0_i32_1 = arith.constant 0 : i32
    return %c0_i32, %c0_i32_0 : i32, i32
  }
  func.func @transform_16(%arg0: i32) -> (i32, i32) {
    %c0_i32 = arith.constant 0 : i32
    %c0_i32_0 = arith.constant 0 : i32
    %c0_i32_1 = arith.constant 0 : i32
    return %c0_i32, %c0_i32_0 : i32, i32
  }
  func.func @transform_17(%arg0: i32) -> (i32, i32) {
    %c0_i32 = arith.constant 0 : i32
    %c0_i32_0 = arith.constant 0 : i32
    %c0_i32_1 = arith.constant 0 : i32
    return %c0_i32, %c0_i32_0 : i32, i32
  }
  func.func @transform_18(%arg0: i32) -> (i32, i32) {
    %c0_i32 = arith.constant 0 : i32
    %c0_i32_0 = arith.constant 0 : i32
    %c0_i32_1 = arith.constant 0 : i32
    return %c0_i32, %c0_i32_0 : i32, i32
  }
  func.func @transform_19(%arg0: i32) -> (i32, i32) {
    %c0_i32 = arith.constant 0 : i32
    %c0_i32_0 = arith.constant 0 : i32
    %c0_i32_1 = arith.constant 0 : i32
    return %c0_i32, %c0_i32_0 : i32, i32
  }
  func.func @transform_20(%arg0: i32) -> (i32, i32) {
    %c0_i32 = arith.constant 0 : i32
    %c0_i32_0 = arith.constant 0 : i32
    %c0_i32_1 = arith.constant 0 : i32
    return %c0_i32, %c0_i32_0 : i32, i32
  }
  func.func @transform_21(%arg0: i32) -> (i32, i32) {
    %c0_i32 = arith.constant 0 : i32
    %c0_i32_0 = arith.constant 0 : i32
    %c0_i32_1 = arith.constant 0 : i32
    return %c0_i32, %c0_i32_0 : i32, i32
  }
  func.func @transform_22(%arg0: i32) -> (i32, i32) {
    %c0_i32 = arith.constant 0 : i32
    %c0_i32_0 = arith.constant 0 : i32
    %c0_i32_1 = arith.constant 0 : i32
    return %c0_i32, %c0_i32_0 : i32, i32
  }
  func.func @transform_23(%arg0: i32) -> (i32, i32) {
    %c0_i32 = arith.constant 0 : i32
    %c0_i32_0 = arith.constant 0 : i32
    %c0_i32_1 = arith.constant 0 : i32
    return %c0_i32, %c0_i32_0 : i32, i32
  }
  func.func @transform_24(%arg0: i32) -> (i32, i32, i32) {
    %c0_i32 = arith.constant 0 : i32
    %c0_i32_0 = arith.constant 0 : i32
    %c0_i32_1 = arith.constant 0 : i32
    return %arg0, %c0_i32, %c0_i32_0 : i32, i32, i32
  }
}

</mosaic_0001>

<bundles_post_ra>
// kernel: up_dense_3_softmax.1
= control target key start
LH: loop header
LB: loop body
LE: loop exit
PB: predicated region body
PF: predicated region fallthrough
CT: control target
= control target key end

     0   :  { %v78_v18 = vlaneseq  ;;  %vm159_vm1 = vcmask 1040384   ;;  %vm6161_vm3 = vmmov 1   ;;  %vm198_vm8 = vcmask 1046528   ;;  %s8033_s5 = inlined_call_operand.vmem [shape: bf16[768,128], index: 5, kind: input, shape index: {}]   ;;  %s8034_s0 = inlined_call_operand.vmem [shape: f32[2,16,256], index: 0, kind: input, shape index: {}]   ;;  %s8035_s7 = inlined_call_operand.vmem [shape: bf16[384,128], index: 7, kind: input, shape index: {}]   ;;  %s8036_s10 = inlined_call_operand.vmem [shape: bf16[384,64], index: 10, kind: input, shape index: {}]   ;;  %s8037_s6 = inlined_call_operand.vmem [shape: f32[1,128], index: 6, kind: input, shape index: {}]   ;;  %s8038_s1 = inlined_call_operand.vmem [shape: f32[2,16,128], index: 1, kind: input, shape index: {}]   ;;  %s8039_s12 = inlined_call_operand.vmem [shape: bf16[192,128], index: 12, kind: input, shape index: {}]   ;;  %s8040_s14 = inlined_call_operand.vmem [shape: bf16[768,128], index: 14, kind: input, shape index: {}]   ;;  %s8041_s8 = inlined_call_operand.vmem [shape: f32[1,128], index: 8, kind: input, shape index: {}]   ;;  %s8042_s11 = inlined_call_operand.vmem [shape: f32[1,64], index: 11, kind: input, shape index: {}]   ;;  %s8043_s2 = inlined_call_operand.vmem [shape: f32[2,16,256], index: 2, kind: input, shape index: {}]   ;;  %s8044_s16 = inlined_call_operand.vmem [shape: bf16[384,128], index: 16, kind: input, shape index: {}]   ;;  %s8045_s18 = inlined_call_operand.vmem [shape: bf16[384,128], index: 18, kind: input, shape index: {}]   ;;  %s8046_s15 = inlined_call_operand.vmem [shape: f32[1,128], index: 15, kind: input, shape index: {}]   ;;  %s8047_s4 = inlined_call_operand.vmem [shape: f32[2,16,128], index: 4, kind: input, shape index: {}]   ;;  %s8048_s20 = inlined_call_operand.vmem [shape: bf16[384,128], index: 20, kind: input, shape index: {}]   ;;  %s8049_s22 = inlined_call_operand.vmem [shape: bf16[128,16], index: 22, kind: input, shape index: {}]   ;;  %s8050_s17 = inlined_call_operand.vmem [shape: f32[1,128], index: 17, kind: input, shape index: {}]   ;;  %s8051_s19 = inlined_call_operand.vmem [shape: f32[1,128], index: 19, kind: input, shape index: {}]   ;;  %s8052_s13 = inlined_call_operand.vmem [shape: f32[1,128], index: 13, kind: input, shape index: {}]   ;;  %s8053_s3 = inlined_call_operand.vmem [shape: f32[2,16,128], index: 3, kind: input, shape index: {}]   ;;  %s8054_s21 = inlined_call_operand.vmem [shape: f32[1,128], index: 21, kind: input, shape index: {}]   ;;  %s8055_s23 = inlined_call_operand.vmem [shape: bf16[16,128], index: 23, kind: input, shape index: {}]   ;;  %s8056_s9 = inlined_call_operand.vmem [shape: bf16[768,128], index: 9, kind: input, shape index: {}]   ;;  %s8057_s24 = inlined_call_operand.vmem [shape: f32[2,16,128], index: 24, kind: output, shape index: {}]  }
   0x1   :  { %8089 = sst [smem:[#allocation9_spill]] %s8033_s5  ;;  %vm1539_vm15 = vcmask 523264  }
   0x2   :  { %8090 = sst [smem:[#allocation10_spill]] %s8034_s0  ;;  %s8098_s27 = sld [smem:[#allocation9_spill]]  ;;  %v6355_v23 = vshrl.u32 %v78_v18, 7 }
   0x3   :  { %8091 = sst [smem:[#allocation11_spill]] %s8035_s7  ;;  %s8101_s30 = sld [smem:[#allocation10_spill]] }
   0x4   :  { %8092 = sst [smem:[#allocation12_spill]] %s8036_s10  ;;  %v87_v28 = vand.u32 15, %v6355_v23  ;;  %v81_v41 = vadd.s32 16, %v6355_v23  ;;  %v80_v60 = vadd.s32 8, %v6355_v23 }
   0x5   :  { %8093 = sst [smem:[#allocation13_spill]] %s8037_s6  ;;  %s8120_s25 = sld [smem:[#allocation12_spill]] }
   0x6   :  { %8094 = sst [smem:[#allocation14_spill]] %s8038_s1  ;;  %vm6382_vm0 = vcmp.eq.s32.totalorder %v87_v28, 0  ;;  %v101_v56 = vand.u32 15, %v81_v41  ;;  %s8121_s26 = sld [smem:[#allocation13_spill]] }
   0x7   :  { %8095 = sst [smem:[#allocation15_spill]] %s8039_s12  ;;  %vm4668_vm2 = vmneg %vm6382_vm0  ;;  %s8119_s12 = sld [smem:[#allocation11_spill]] }
   0x8   :  { %8096 = sst [smem:[#allocation16_spill]] %s8040_s14  ;;  %v5802_v0 = vld [vmem:[%s8098_s27 + $0x40] sm:$0xff]   ;;  %v5806_v4 = vld [vmem:[%s8098_s27 + $0x48] sm:$0xff]   ;;  %v5810_v8 = vld [vmem:[%s8098_s27 + $0x50] sm:$0xff]   ;;  %vm6458_vm5 = vcmp.eq.s32.totalorder %v101_v56, 0  ;;  %s8122_s7 = sld [smem:[#allocation14_spill]] }
   0x9   :  { %8097 = sst [smem:[#allocation17_spill]] %s8041_s8  ;;  %v5803_v1 = vld [vmem:[%s8098_s27] sm:$0xff]   ;;  %5114 = vmatprep.subr.bf16.mxu0 %v5802_v0  ;;  %v5807_v5 = vld [vmem:[%s8098_s27 + $0x8] sm:$0xff]   ;;  %v5811_v9 = vld [vmem:[%s8098_s27 + $0x10] sm:$0xff]   ;;  %s8123_s0 = sld [smem:[#allocation15_spill]] }
   0xa   :  { %v5804_v2 = vld [vmem:[%s8098_s27 + $0xc0] sm:$0xff]   ;;  %5115 = vmatpush3.bf16.msra.mxu0 %v5803_v1  ;;  %v5808_v6 = vld [vmem:[%s8098_s27 + $0xc8] sm:$0xff]   ;;  %v5812_v10 = vld [vmem:[%s8098_s27 + $0xd0] sm:$0xff]   ;;  %v94_v1 = vand.u32 15, %v80_v60  ;;  %s8124_s29 = sld [smem:[#allocation16_spill]]  ;;  %s8125_s10 = sld [smem:[#allocation17_spill]] }
   0xb   :  { %v5805_v3 = vld [vmem:[%s8098_s27 + $0x80] sm:$0xff]   ;;  %5142 = vmatprep.subr.bf16.mxu1 %v5804_v2  ;;  %5116 = vmatprep.subr.bf16.mxu0 %v5806_v4  ;;  %v5809_v7 = vld [vmem:[%s8098_s27 + $0x88] sm:$0xff]   ;;  %v5813_v11 = vld [vmem:[%s8098_s27 + $0x90] sm:$0xff]   ;;  %s6163_s14 = smov 64  }
   0xc   :  { %5143 = vmatpush3.bf16.msra.mxu1 %v5805_v3  ;;  %v5814_v12 = vld [vmem:[%s8098_s27 + $0x58] sm:$0xff]   ;;  %v5818_v16 = vld [vmem:[%s8098_s27 + $0x60] sm:$0xff]   ;;  %v5822_v21 = vld [vmem:[%s8098_s27 + $0x68] sm:$0xff]   ;;  %vm6478_vm7 = vcmp.eq.s32.totalorder %v94_v1, 15 }
   0xd   :  { %5144 = vmatprep.subr.bf16.mxu1 %v5808_v6  ;;  %v5815_v13 = vld [vmem:[%s8098_s27 + $0x18] sm:$0xff]   ;;  %v5819_v17 = vld [vmem:[%s8098_s27 + $0x20] sm:$0xff]   ;;  %v5823_v22 = vld [vmem:[%s8098_s27 + $0x28] sm:$0xff]  }
   0xe   :  { %5117 = vmatpush3.bf16.msra.mxu0 %v5807_v5  ;;  %v5816_v14 = vld [vmem:[%s8098_s27 + $0xd8] sm:$0xff]   ;;  %v5820_v19 = vld [vmem:[%s8098_s27 + $0xe0] sm:$0xff]   ;;  %v5824_v24 = vld [vmem:[%s8098_s27 + $0xe8] sm:$0xff]  }
   0xf   :  { %5118 = vmatprep.subr.bf16.mxu0 %v5810_v8  ;;  %v5817_v15 = vld [vmem:[%s8098_s27 + $0x98] sm:$0xff]   ;;  %v5821_v20 = vld [vmem:[%s8098_s27 + $0xa0] sm:$0xff]   ;;  %v5825_v25 = vld [vmem:[%s8098_s27 + $0xa8] sm:$0xff]  }
  0x10   :  { %5145 = vmatpush3.bf16.msra.mxu1 %v5809_v7  ;;  %v5826_v26 = vld [vmem:[%s8098_s27 + $0x70] sm:$0xff]   ;;  %v5830_v31 = vld [vmem:[%s8098_s27 + $0x78] sm:$0xff]   ;;  %v6392_v35 = vld [vmem:[%s8101_s30 + $0x8] sm:$0xff] }
  0x11   :  { %5146 = vmatprep.subr.bf16.mxu1 %v5812_v10  ;;  %v5827_v27 = vld [vmem:[%s8098_s27 + $0x30] sm:$0xff]   ;;  %v5831_v32 = vld [vmem:[%s8098_s27 + $0x38] sm:$0xff]   ;;  %v161_v39 = vrot.slane %v6392_v35, 7  ;;  %vm6411_vm4 = vmpackc.low %vm6161_vm3, %vm4668_vm2  ;;  %v202_v3 = vrot.slane %v6392_v35, 1 }
  0x12   :  { %5119 = vmatpush3.bf16.msra.mxu0 %v5811_v9  ;;  %v5828_v29 = vld [vmem:[%s8098_s27 + $0xf0] sm:$0xff]   ;;  %v5832_v34 = vld [vmem:[%s8098_s27 + $0xf8] sm:$0xff]   ;;  %v6425_v47 = vld [vmem:[%s8101_s30] sm:$0xff] }
  0x13   :  { %5120 = vmatprep.subr.bf16.mxu0 %v5814_v12  ;;  %v5829_v30 = vld [vmem:[%s8098_s27 + $0xb0] sm:$0xff]   ;;  %v6397_v36 = vld [vmem:[%s8101_s30 + $0x18] sm:$0xff]  ;;  %v160_v52 = vrot.slane %v6425_v47, 7  ;;  %v5834_v54 = vld [vmem:[%s8098_s27 + $0x140] sm:$0xff]  }
  0x14   :  { %5147 = vmatpush3.bf16.msra.mxu1 %v5813_v11  ;;  %v6402_v37 = vld [vmem:[%s8101_s30 + $0x38] sm:$0xff]  ;;  %v164_v40 = vrot.slane %v6397_v36, 7  ;;  %v244_v44 = vpack.c.bf16 %v6397_v36, %v6392_v35  ;;  %v6430_v48 = vld [vmem:[%s8101_s30 + $0x10] sm:$0xff]  ;;  %v5835_v59 = vld [vmem:[%s8098_s27 + $0x100] sm:$0xff]   ;;  %v203_v4 = vrot.slane %v6397_v36, 1 }
  0x15   :  { %5148 = vmatprep.subr.bf16.mxu1 %v5816_v14  ;;  %v150_v38 = vrot.slane %v6402_v37, 7  ;;  %v5833_v43 = vld [vmem:[%s8098_s27 + $0xb8] sm:$0xff]   ;;  %v6435_v49 = vld [vmem:[%s8101_s30 + $0x30] sm:$0xff]  ;;  %v162_v53 = vrot.slane %v6430_v48, 7  ;;  %v243_v55 = vpack.c.bf16 %v6430_v48, %v6425_v47  ;;  %v5836_v62 = vld [vmem:[%s8098_s27 + $0x148] sm:$0xff]   ;;  %v211_v41 = vrot.slane %v6402_v37, 1 }
  0x16   :  { %5121 = vmatpush3.bf16.msra.mxu0 %v5815_v13  ;;  %v165_v45 = vsel %vm159_vm1, %v161_v39, %v164_v40  ;;  %v149_v51 = vrot.slane %v6435_v49, 7  ;;  %725 = vmatprep.mubr.bf16.mxu1 %v244_v44  ;;  %v5837_v0 = vld [vmem:[%s8098_s27 + $0x108] sm:$0xff]   ;;  %v5838_v2 = vld [vmem:[%s8098_s27 + $0x150] sm:$0xff]   ;;  %vm4676_vm6 = vmneg %vm6458_vm5  ;;  %v204_v18 = vsel %vm198_vm8, %v202_v3, %v203_v4 }
  0x17   :  { %5122 = vmatprep.subr.bf16.mxu0 %v5818_v16  ;;  %v181_v46 = vsel %vm159_vm1, %v150_v38, %v161_v39  ;;  %v163_v57 = vsel %vm159_vm1, %v160_v52, %v162_v53  ;;  %v5839_v5 = vld [vmem:[%s8098_s27 + $0x110] sm:$0xff]   ;;  %v144_v6 = vld [vmem:[%s8101_s30 + $0x28] sm:$0xff]  ;;  %v5840_v8 = vld [vmem:[%s8098_s27 + $0x158] sm:$0xff]   ;;  %v8108_v16 = vmov 0  ;;  %v200_v39 = vrot.slane %v6430_v48, 1 }
  0x18   :  { %5149 = vmatpush3.bf16.msra.mxu1 %v5817_v15  ;;  %v4670_v50 = vpack.c.bf16 %v165_v45, %v181_v46  ;;  %v180_v58 = vsel %vm159_vm1, %v149_v51, %v160_v52  ;;  %v168_v9 = vrot.slane %v144_v6, 7  ;;  %v250_v10 = vpack.c.bf16 %v6402_v37, %v144_v6  ;;  %v143_v11 = vld [vmem:[%s8101_s30 + $0x20] sm:$0xff]  ;;  %v5841_v13 = vld [vmem:[%s8098_s27 + $0x118] sm:$0xff]   ;;  %vm6498_vm9 = vmpackc.low %vm6161_vm3, %vm4676_vm6 }
  0x19   :  { %5150 = vmatprep.subr.bf16.mxu1 %v5820_v19  ;;  %v4674_v61 = vpack.c.bf16 %v163_v57, %v180_v58  ;;  %v207_v12 = vrot.slane %v144_v6, 1  ;;  %v8109_v16 = vsel %vm6498_vm9, 4294967295, %v8108_v16  ;;  %vm4684_vm10 = vmneg %vm6478_vm7  ;;  %v5843_v28 = vld [vmem:[%s8098_s27 + $0x120] sm:$0xff]   ;;  %v5849_v45 = vld [vmem:[%s8098_s27 + $0x138] sm:$0xff]   ;;  %v224_v48 = vsel %vm198_vm8, %v211_v41, %v202_v3 }
  0x1a   :  { %5123 = vmatpush3.bf16.msra.mxu0 %v5819_v17  ;;  %4671 = vmatprep.mubr.msk.bf16.mxu0 %vm6411_vm4, %v4670_v50  ;;  %v169_v14 = vsel %vm159_vm1, %v164_v40, %v168_v9  ;;  %v171_v15 = vsel %vm159_vm1, %v168_v9, %v150_v38  ;;  %8110 = vst [vmem:[#allocation2_spill] sm:$0xff] %v8109_v16  ;;  %v166_v17 = vrot.slane %v143_v11, 7  ;;  %vm6520_vm11 = vmpackc.low %vm4684_vm10, %vm6161_vm3  ;;  %v199_v38 = vrot.slane %v6425_v47, 1  ;;  %v5851_v56 = vld [vmem:[%s8119_s12] sm:$0xff]   ;;  %v5853_v58 = vld [vmem:[%s8119_s12 + $0x48] sm:$0xff]  }
  0x1b   :  { %5124 = vmatprep.subr.bf16.mxu0 %v5822_v21  ;;  %v4678_v19 = vpack.c.bf16 %v171_v15, %v169_v14  ;;  %v208_v21 = vsel %vm198_vm8, %v203_v4, %v207_v12  ;;  %v205_v40 = vrot.slane %v143_v11, 1  ;;  %v212_v37 = vsel %vm198_vm8, %v207_v12, %v211_v41  ;;  %v5852_v57 = vld [vmem:[%s8119_s12 + $0x80] sm:$0xff]   ;;  %v5855_v60 = vld [vmem:[%s8119_s12 + $0x88] sm:$0xff]   ;;  %v5859_v1 = vld [vmem:[%s8119_s12 + $0x58] sm:$0xff]  }
  0x1c   :  { %5151 = vmatpush3.bf16.msra.mxu1 %v5821_v20  ;;  %v249_v20 = vpack.c.bf16 %v6435_v49, %v143_v11  ;;  %v201_v46 = vsel %vm198_vm8, %v199_v38, %v200_v39  ;;  %v209_v52 = vrot.slane %v6435_v49, 1  ;;  %v5850_v49 = vld [vmem:[%s8119_s12 + $0x40] sm:$0xff]   ;;  %v5861_v3 = vld [vmem:[%s8119_s12 + $0x98] sm:$0xff]   ;;  %v5866_v9 = vld [vmem:[%s8119_s12 + $0x28] sm:$0xff]  }
  0x1d   :  { %5152 = vmatprep.subr.bf16.mxu1 %v5824_v24  ;;  %v167_v24 = vsel %vm159_vm1, %v162_v53, %v166_v17  ;;  %v206_v47 = vsel %vm198_vm8, %v200_v39, %v205_v40  ;;  %v8116_v53 = vmov 0  ;;  %v5862_v4 = vld [vmem:[%s8119_s12 + $0x60] sm:$0xff]   ;;  %v5868_v11 = vld [vmem:[%s8119_s12 + $0x70] sm:$0xff]   ;;  %v5871_v14 = vld [vmem:[%s8119_s12 + $0x78] sm:$0xff]  }
  0x1e   :  { %5125 = vmatpush3.bf16.msra.mxu0 %v5823_v22  ;;  %v5842_v22 = vld [vmem:[%s8098_s27 + $0x160] sm:$0xff]   ;;  %v4690_v50 = vpack.c.bf16 %v206_v47, %v201_v46  ;;  %v210_v35 = vsel %vm198_vm8, %v205_v40, %v209_v52  ;;  %v5869_v12 = vld [vmem:[%s8119_s12 + $0x30] sm:$0xff]   ;;  %v5872_v15 = vld [vmem:[%s8119_s12 + $0x38] sm:$0xff]  }
  0x1f   :  { %5126 = vmatprep.subr.bf16.mxu0 %v5826_v26  ;;  %v5864_v6 = vld [vmem:[%s8119_s12 + $0xa0] sm:$0xff]   ;;  %v5941_v63 = vld [vmem:[%s8124_s29 + $0x98] sm:$0xff]  }
  0x20   :  { %5153 = vmatpush3.bf16.msra.mxu1 %v5825_v25  ;;  %v170_v25 = vsel %vm159_vm1, %v166_v17, %v149_v51  ;;  %v4694_v51 = vpack.c.bf16 %v224_v48, %v212_v37  ;;  %v5873_v17 = vld [vmem:[%s8119_s12 + $0xb8] sm:$0xff]   ;;  %v6160_v42 = vld [vmem:[%s8125_s10] ss:$0 sm:$0xff] }
  0x21   :  { %5154 = vmatprep.subr.bf16.mxu1 %v5828_v29  ;;  %v4682_v26 = vpack.c.bf16 %v170_v25, %v167_v24  ;;  %v8111_v29 = vmov 0 }
  0x22   :  { %5127 = vmatpush3.bf16.msra.mxu0 %v5827_v27  ;;  %v4686_v27 = vpack.c.bf16 %v208_v21, %v204_v18  ;;  %v8112_v29 = vsel %vm6520_vm11, 4294967295, %v8111_v29  ;;  %v5874_v18 = vld [vmem:[%s8120_s25 + $0x40] sm:$0xff]  }
  0x23   :  { %5128 = vmatprep.subr.bf16.mxu0 %v5830_v31  ;;  %8113 = vst [vmem:[#allocation3_spill] sm:$0xff] %v8112_v29  ;;  %v82_v31 = vadd.s32 24, %v6355_v23  ;;  %v5847_v23 = vld [vmem:[%s8098_s27 + $0x130] sm:$0xff]  }
  0x24   :  { %5155 = vmatpush3.bf16.msra.mxu1 %v5829_v30  ;;  %v5844_v30 = vld [vmem:[%s8098_s27 + $0x168] sm:$0xff]  }
  0x25   :  { %5156 = vmatprep.subr.bf16.mxu1 %v5832_v34  ;;  %v5846_v34 = vld [vmem:[%s8098_s27 + $0x170] sm:$0xff]   ;;  %v108_v36 = vand.u32 15, %v82_v31 }
  0x26   :  { %5129 = vmatpush3.bf16.msra.mxu0 %v5831_v32  ;;  %v5845_v32 = vld [vmem:[%s8098_s27 + $0x128] sm:$0xff]  }
  0x27   :  { %5170 = vmatprep.subr.bf16.mxu0 %v5834_v54  ;;  %vm6547_vm12 = vcmp.eq.s32.totalorder %v108_v36, 15  ;;  %v223_v54 = vsel %vm198_vm8, %v209_v52, %v199_v38 }
  0x28   :  { %5157 = vmatpush3.bf16.msra.mxu1 %v5833_v43  ;;  %v5848_v43 = vld [vmem:[%s8098_s27 + $0x178] sm:$0xff]   ;;  %vm4692_vm13 = vmneg %vm6547_vm12 }
  0x29   :  { %4675 = vmatmul.mubr.msk.bf16.vlgmr.msra.gmra.mrb[0].mxu0 %vm6411_vm4, %v4674_v61  ;;  %vm6564_vm14 = vmpackc.low %vm4692_vm13, %vm6161_vm3  ;;  %5198 = vmatprep.subr.bf16.mxu1 %v5850_v49  ;;  %v5856_v61 = vld [vmem:[%s8119_s12 + $0x50] sm:$0xff]  }
  0x2a   :  { %5171 = vmatpush3.bf16.msra.mxu0 %v5835_v59  ;;  %4679 = vmatprep.mubr.msk.bf16.mxu0 %vm6498_vm9, %v4678_v19  ;;  %v8117_v53 = vsel %vm6564_vm14, 4294967295, %v8116_v53  ;;  %v5854_v59 = vld [vmem:[%s8119_s12 + $0x8] sm:$0xff]   ;;  %v6654_v19 = vld [vmem:[%s8120_s25 + $0x80] sm:$0xff]  }
  0x2b   :  { %726 = vmatmul.mubr.bf16.vlgmr.msra.gmra.mrb[0].mxu1 %v243_v55  ;;  %5172 = vmatprep.subr.bf16.mxu0 %v5836_v62  ;;  %8118 = vst [vmem:[#allocation4_spill] sm:$0xff] %v8117_v53  ;;  %v4698_v55 = vpack.c.bf16 %v223_v54, %v210_v35  ;;  %v5857_v62 = vld [vmem:[%s8119_s12 + $0x10] sm:$0xff]  }
  0x2c   :  { %733 = vmatprep.mubr.bf16.mxu1 %v250_v10  ;;  %5199 = vmatpush3.bf16.msra.mxu1 %v5851_v56  ;;  %v5867_v10 = vld [vmem:[%s8119_s12 + $0xa8] sm:$0xff]  }
  0x2d   :  { %5200 = vmatprep.subr.bf16.mxu1 %v5853_v58 }
  0x2e   :  { %5173 = vmatpush3.bf16.msra.mxu0 %v5837_v0  ;;  %v5858_v0 = vld [vmem:[%s8119_s12 + $0x90] sm:$0xff]  }
  0x2f   :  { %5174 = vmatprep.subr.bf16.mxu0 %v5838_v2  ;;  %v5860_v2 = vld [vmem:[%s8119_s12 + $0x18] sm:$0xff]  }
  0x30   :  { %5201 = vmatpush3.bf16.msra.mxu1 %v5854_v59 }
  0x31   :  { %4683 = vmatmul.mubr.msk.bf16.gmra.mrb[4].mxu0 %vm6498_vm9, %v4682_v26  ;;  %5202 = vmatprep.subr.bf16.mxu1 %v5856_v61  ;;  %v4619_v26 = vld [vmem:[%s8121_s26] ss:$0 sm:$0xff] }
  0x32   :  { %5175 = vmatpush3.bf16.msra.mxu0 %v5839_v5  ;;  %4687 = vmatprep.mubr.msk.bf16.mxu0 %vm6520_vm11, %v4686_v27  ;;  %v5863_v5 = vld [vmem:[%s8119_s12 + $0x20] sm:$0xff]  }
  0x33   :  { %5176 = vmatprep.subr.bf16.mxu0 %v5840_v8  ;;  %734 = vmatmul.mubr.bf16.gmra.mrb[4].mxu1 %v249_v20  ;;  %v5865_v8 = vld [vmem:[%s8119_s12 + $0x68] sm:$0xff]  }
  0x34   :  { %5203 = vmatpush3.bf16.msra.mxu1 %v5857_v62 }
  0x35   :  { %5204 = vmatprep.subr.bf16.mxu1 %v5859_v1 }
  0x36   :  { %5177 = vmatpush3.bf16.msra.mxu0 %v5841_v13  ;;  %v5870_v13 = vld [vmem:[%s8119_s12 + $0xb0] sm:$0xff]  }
  0x37   :  { %5178 = vmatprep.subr.bf16.mxu0 %v5842_v22 }
  0x38   :  { %5205 = vmatpush3.bf16.msra.mxu1 %v5860_v2 }
  0x39   :  { %5206 = vmatprep.subr.bf16.mxu1 %v5862_v4 }
  0x3a   :  { %5179 = vmatpush3.bf16.msra.mxu0 %v5843_v28 }
  0x3b   :  { %5180 = vmatprep.subr.bf16.mxu0 %v5844_v30 }
  0x3c   :  { %5207 = vmatpush3.bf16.msra.mxu1 %v5863_v5 }
  0x3d   :  { %5208 = vmatprep.subr.bf16.mxu1 %v5865_v8 }
  0x3e   :  { %5181 = vmatpush3.bf16.msra.mxu0 %v5845_v32 }
  0x3f   :  { %5182 = vmatprep.subr.bf16.mxu0 %v5846_v34 }
  0x40   :  { %5209 = vmatpush3.bf16.msra.mxu1 %v5866_v9 }
  0x41   :  { %5210 = vmatprep.subr.bf16.mxu1 %v5868_v11 }
  0x42   :  { %5183 = vmatpush3.bf16.msra.mxu0 %v5847_v23 }
  0x43   :  { %5184 = vmatprep.subr.bf16.mxu0 %v5848_v43 }
  0x44   :  { %5211 = vmatpush3.bf16.msra.mxu1 %v5869_v12 }
  0x45   :  { %5212 = vmatprep.subr.bf16.mxu1 %v5871_v14 }
  0x46   :  { %5185 = vmatpush3.bf16.msra.mxu0 %v5849_v45 }
  0x47   :  { %5619 = vmatprep.subr.bf16.mxu0 %v5852_v57 }
  0x48   :  { %5213 = vmatpush3.bf16.msra.mxu1 %v5872_v15 }
  0x49   :  { %4691 = vmatmul.mubr.msk.bf16.vlgmr.msra.gmra.mrb[8].mxu0 %vm6520_vm11, %v4690_v50  ;;  %5236 = vmatprep.subr.bf16.mxu1 %v5874_v18 }
  0x4a   :  { %4695 = vmatprep.mubr.msk.bf16.mxu0 %vm6564_vm14, %v4694_v51  ;;  %5620 = vmatpush3.bf16.msra.mxu0 %v5852_v57 }
  0x4b   :  { %5621 = vmatprep.subr.bf16.mxu0 %v5855_v60 }
  0x4e   :  { %5622 = vmatpush3.bf16.msra.mxu0 %v5855_v60 }
  0x4f   :  { %5623 = vmatprep.subr.bf16.mxu0 %v5858_v0 }
  0x51   :  { %4699 = vmatmul.mubr.msk.bf16.gmra.mrb[12].mxu0 %vm6564_vm14, %v4698_v55 }
  0x52   :  { %5624 = vmatpush3.bf16.msra.mxu0 %v5858_v0 }
  0x53   :  { %5625 = vmatprep.subr.bf16.mxu0 %v5861_v3 }
  0x56   :  { %5626 = vmatpush3.bf16.msra.mxu0 %v5861_v3 }
  0x57   :  { %5627 = vmatprep.subr.bf16.mxu0 %v5864_v6 }
  0x5a   :  { %5628 = vmatpush3.bf16.msra.mxu0 %v5864_v6 }
  0x5b   :  { %5629 = vmatprep.subr.bf16.mxu0 %v5867_v10 }
  0x5e   :  { %5630 = vmatpush3.bf16.msra.mxu0 %v5867_v10 }
  0x5f   :  { %5631 = vmatprep.subr.bf16.mxu0 %v5870_v13 }
  0x62   :  { %5632 = vmatpush3.bf16.msra.mxu0 %v5870_v13 }
  0x63   :  { %5633 = vmatprep.subr.bf16.mxu0 %v5873_v17 }
  0x66   :  { %5634 = vmatpush3.bf16.msra.mxu0 %v5873_v17 }
  0x67   :  { %5639 = vmatprep.subr.bf16.mxu0 %v6654_v19 }
  0xfc   :  { %v5130_v22 = vpop.f32.mrb[0].mxu0 }
  0xfd   :  { %v5131_v27 = vpop.f32.mrb[1].mxu0 }
  0xfe   :  { %v5158_v20 = vpop.f32.mrb[0].mxu1  ;;  %v5132_v30 = vadd.f32 %v5131_v27, %v5130_v22  ;;  %v5133_v31 = vpop.f32.mrb[2].mxu0  ;;  %v6665_v22 = vld [vmem:[%s8122_s7] sm:$0xff] }
  0xff   :  { %v5159_v21 = vpop.f32.mrb[1].mxu1  ;;  %v5134_v34 = vpop.f32.mrb[3].mxu0 }
 0x100   :  { %v5160_v24 = vadd.f32 %v5159_v21, %v5158_v20  ;;  %v5161_v25 = vpop.f32.mrb[2].mxu1  ;;  %v679_v36 = vadd.f32 %v5132_v30, %v4619_v26  ;;  %v5135_v38 = vadd.f32 %v5134_v34, %v5133_v31 }
 0x101   :  { %v5162_v28 = vpop.f32.mrb[3].mxu1 }
 0x102   :  { %v5163_v32 = vadd.f32 %v5162_v28, %v5161_v25  ;;  %v682_v39 = vadd.f32 %v5135_v38, %v4619_v26  ;;  %v728_v40 = vadd.f32 %v5160_v24, %v679_v36  ;;  %v6670_v24 = vld [vmem:[%s8122_s7 + $0x8] sm:$0xff]  ;;  %v6675_v25 = vld [vmem:[%s8122_s7 + $0x10] sm:$0xff]  ;;  %v1165_v28 = vrot.slane %v6665_v22, 1 }
 0x103   :  { %v1166_v30 = vrot.slane %v6670_v24, 1  ;;  %v1168_v31 = vrot.slane %v6675_v25, 1 }
 0x104   :  { %v731_v23 = vadd.f32 %v5163_v32, %v682_v39  ;;  %v5136_v47 = vpop.f32.mrb[4].mxu0 }
 0x105   :  { %v5137_v48 = vpop.f32.mrb[5].mxu0 }
 0x106   :  { %v5164_v41 = vpop.f32.mrb[4].mxu1  ;;  %v5138_v51 = vadd.f32 %v5137_v48, %v5136_v47  ;;  %v5139_v52 = vpop.f32.mrb[6].mxu0 }
 0x107   :  { %v5165_v43 = vpop.f32.mrb[5].mxu1  ;;  %v5140_v35 = vpop.f32.mrb[7].mxu0 }
 0x108   :  { %v5166_v45 = vadd.f32 %v5165_v43, %v5164_v41  ;;  %v5167_v46 = vpop.f32.mrb[6].mxu1  ;;  %v687_v54 = vadd.f32 %v5138_v51, %v4619_v26  ;;  %v5141_v55 = vadd.f32 %v5140_v35, %v5139_v52 }
 0x109   :  { %v5168_v37 = vpop.f32.mrb[7].mxu1 }
 0x10a   :  { %v5169_v50 = vadd.f32 %v5168_v37, %v5167_v46  ;;  %v690_v49 = vadd.f32 %v5141_v55, %v4619_v26  ;;  %v736_v56 = vadd.f32 %v5166_v45, %v687_v54  ;;  %v1167_v45 = vsel %vm198_vm8, %v1165_v28, %v1166_v30  ;;  %v5877_v54 = vld [vmem:[%s8120_s25 + $0x48] sm:$0xff]  }
 0x10b   :  { %v1169_v46 = vsel %vm198_vm8, %v1166_v30, %v1168_v31 }
 0x10c   :  { %v739_v57 = vadd.f32 %v5169_v50, %v690_v49  ;;  %v5875_v50 = vld [vmem:[%s8120_s25] sm:$0xff]   ;;  %v5879_v49 = vld [vmem:[%s8120_s25 + $0x88] sm:$0xff]  }
 0x11c   :  { %v5186_v58 = vpop.f32.mrb[8].mxu0 }
 0x11d   :  { %v5187_v59 = vpop.f32.mrb[9].mxu0 }
 0x11e   :  { %v5188_v60 = vadd.f32 %v5187_v59, %v5186_v58  ;;  %v5189_v61 = vpop.f32.mrb[10].mxu0  ;;  %v5880_v58 = vld [vmem:[%s8120_s25 + $0x50] sm:$0xff]  }
 0x11f   :  { %v5190_v62 = vpop.f32.mrb[11].mxu0  ;;  %v5882_v59 = vld [vmem:[%s8120_s25 + $0x90] sm:$0xff]  }
 0x120   :  { %v777_v0 = vadd.f32 %v5188_v60, %v728_v40  ;;  %v5191_v1 = vadd.f32 %v5190_v62, %v5189_v61  ;;  %v5881_v60 = vld [vmem:[%s8120_s25 + $0x10] sm:$0xff]   ;;  %v5883_v61 = vld [vmem:[%s8120_s25 + $0x58] sm:$0xff]  }
 0x121   :  { %v5885_v62 = vld [vmem:[%s8120_s25 + $0x98] sm:$0xff]  }
 0x122   :  { %v791_v2 = vmax.f32 %v777_v0, 0.0  ;;  %v780_v3 = vadd.f32 %v5191_v1, %v731_v23  ;;  %v5884_v0 = vld [vmem:[%s8120_s25 + $0x18] sm:$0xff]   ;;  %v5886_v1 = vld [vmem:[%s8120_s25 + $0x60] sm:$0xff]  }
 0x124   :  { %v792_v4 = vmax.f32 %v780_v3, 0.0  ;;  %v5192_v5 = vpop.f32.mrb[12].mxu0  ;;  %v801_v6 = vrot.slane %v791_v2, 7  ;;  %v816_v8 = vrot.slane %v791_v2, 1  ;;  %v5887_v3 = vld [vmem:[%s8120_s25 + $0x20] sm:$0xff]  }
 0x125   :  { %v5193_v9 = vpop.f32.mrb[13].mxu0 }
 0x126   :  { %v802_v10 = vrot.slane %v792_v4, 7  ;;  %v817_v11 = vrot.slane %v792_v4, 1  ;;  %v5194_v12 = vadd.f32 %v5193_v9, %v5192_v5  ;;  %v5195_v13 = vpop.f32.mrb[14].mxu0  ;;  %v834_v14 = vpack.c.bf16 %v792_v4, %v791_v2  ;;  %v5888_v2 = vld [vmem:[%s8120_s25 + $0xa0] sm:$0xff]   ;;  %v5889_v4 = vld [vmem:[%s8120_s25 + $0x68] sm:$0xff]   ;;  %v1143_v9 = vld [vmem:[%s8122_s7 + $0x18] sm:$0xff] }
 0x127   :  { %v5196_v15 = vpop.f32.mrb[15].mxu0  ;;  %v5891_v5 = vld [vmem:[%s8120_s25 + $0xa8] sm:$0xff]  }
 0x128   :  { %v803_v17 = vsel %vm159_vm1, %v801_v6, %v802_v10  ;;  %v785_v18 = vadd.f32 %v5194_v12, %v736_v56  ;;  %v5197_v20 = vadd.f32 %v5196_v15, %v5195_v13  ;;  %1070 = vmatprep.mubr.bf16.mxu1 %v834_v14  ;;  %v818_v21 = vsel %vm198_vm8, %v816_v8, %v817_v11  ;;  %v5895_v15 = vld [vmem:[%s8120_s25 + $0x78] sm:$0xff]  }
 0x129   :  { %v4776_v56 = vpack.c.bf16 %v1169_v46, %v1167_v45  ;;  %v1145_v12 = vrot.slane %v1143_v9, 7  ;;  %v1150_v13 = vrot.slane %v6665_v22, 7  ;;  %v1151_v14 = vrot.slane %v6670_v24, 7  ;;  %v5906_v45 = vld [vmem:[%s8124_s29 + $0x8] sm:$0xff]   ;;  %v5901_v46 = vld [vmem:[%s8123_s0 + $0x18] sm:$0xff]  }
 0x12a   :  { %v793_v26 = vmax.f32 %v785_v18, 0.0  ;;  %v788_v27 = vadd.f32 %v5197_v20, %v739_v57  ;;  %v5878_v57 = vld [vmem:[%s8120_s25 + $0x8] sm:$0xff]   ;;  %v5897_v18 = vld [vmem:[%s8120_s25 + $0xb8] sm:$0xff]  }
 0x12b   :  { %v5896_v20 = vld [vmem:[%s8120_s25 + $0x38] sm:$0xff]  }
 0x12c   :  { %v804_v32 = vrot.slane %v793_v26, 7  ;;  %v819_v34 = vrot.slane %v793_v26, 1  ;;  %v794_v36 = vmax.f32 %v788_v27, 0.0 }
 0x12e   :  { %v796_v38 = vrot.slane %v794_v36, 7  ;;  %v821_v39 = vrot.slane %v794_v36, 1  ;;  %v820_v40 = vsel %vm198_vm8, %v817_v11, %v819_v34  ;;  %v837_v23 = vpack.c.bf16 %v794_v36, %v793_v26  ;;  %v5893_v11 = vld [vmem:[%s8120_s25 + $0x30] sm:$0xff]  }
 0x12f   :  { %v4735_v41 = vpack.c.bf16 %v820_v40, %v818_v21  ;;  %v805_v43 = vsel %vm159_vm1, %v802_v10, %v804_v32  ;;  %v5894_v10 = vld [vmem:[%s8120_s25 + $0xb0] sm:$0xff]   ;;  %v1152_v21 = vsel %vm159_vm1, %v1150_v13, %v1151_v14  ;;  %v1153_v36 = vrot.slane %v6675_v25, 7  ;;  %v5902_v40 = vld [vmem:[%s8124_s29 + $0x40] sm:$0xff]  }
 0x130   :  { %v811_v47 = vsel %vm159_vm1, %v796_v38, %v801_v6  ;;  %v822_v37 = vsel %vm198_vm8, %v819_v34, %v821_v39  ;;  %v828_v48 = vsel %vm198_vm8, %v821_v39, %v816_v8  ;;  %v806_v51 = vsel %vm159_vm1, %v804_v32, %v796_v38  ;;  %v5890_v6 = vld [vmem:[%s8120_s25 + $0x28] sm:$0xff]   ;;  %v5892_v8 = vld [vmem:[%s8120_s25 + $0x70] sm:$0xff]  }
 0x131   :  { %v4727_v52 = vpack.c.bf16 %v803_v17, %v811_v47  ;;  %v4739_v35 = vpack.c.bf16 %v828_v48, %v822_v37  ;;  %5635 = vmatprep.mubr.msk.bf16.mxu0 %vm6520_vm11, %v4735_v41  ;;  %v4731_v55 = vpack.c.bf16 %v806_v51, %v805_v43  ;;  %v1170_v17 = vrot.slane %v1143_v9, 1  ;;  %v5899_v39 = vld [vmem:[%s8123_s0 + $0x8] sm:$0xff]   ;;  %v5900_v41 = vld [vmem:[%s8123_s0 + $0x10] sm:$0xff]   ;;  %v5911_v48 = vld [vmem:[%s8124_s29 + $0x58] sm:$0xff]  }
 0x132   :  { %v1186_v34 = vpack.c.bf16 %v1143_v9, %v6675_v25  ;;  %v6162_v38 = vmov 0   ;;  %v5898_v25 = vld [vmem:[%s8123_s0] sm:$0xff]   ;;  %v5905_v43 = vld [vmem:[%s8124_s29 + $0x48] sm:$0xff]   ;;  %v5908_v47 = vld [vmem:[%s8124_s29 + $0x50] sm:$0xff]  }
 0x133   :  { %4728 = vmatmul.mubr.msk.bf16.vlgmr.msra.gmra.mrb[8].mxu1 %vm6411_vm4, %v4727_v52  ;;  %5636 = vmatmul.mubr.msk.bf16.vlgmr.msra.gmra.mrb[16].mxu0 %vm6564_vm14, %v4739_v35  ;;  %v1171_v26 = vsel %vm198_vm8, %v1168_v31, %v1170_v17  ;;  %v1177_v27 = vsel %vm198_vm8, %v1170_v17, %v1165_v28  ;;  %v1155_v28 = vsel %vm159_vm1, %v1153_v36, %v1145_v12  ;;  %v5909_v37 = vld [vmem:[%s8124_s29 + $0x10] sm:$0xff]   ;;  %v5912_v51 = vld [vmem:[%s8124_s29 + $0x18] sm:$0xff]   ;;  %v5914_v52 = vld [vmem:[%s8124_s29 + $0x60] sm:$0xff]  }
 0x134   :  { %5237 = vmatpush3.bf16.msra.mxu1 %v5875_v50  ;;  %1078 = vmatprep.mubr.bf16.mxu1 %v837_v23  ;;  %v4780_v32 = vpack.c.bf16 %v1177_v27, %v1171_v26  ;;  %v5903_v23 = vld [vmem:[%s8124_s29] sm:$0xff]   ;;  %v5907_v35 = vld [vmem:[%s8123_s0 + $0x28] sm:$0xff]  }
 0x135   :  { %5640 = vmatpush3.bf16.msra.mxu0 %v6654_v19  ;;  %5238 = vmatprep.subr.bf16.mxu1 %v5877_v54  ;;  %v1183_v19 = vpack.c.bf16 %v6670_v24, %v6665_v22  ;;  %v1160_v24 = vsel %vm159_vm1, %v1145_v12, %v1150_v13  ;;  %v1154_v22 = vsel %vm159_vm1, %v1151_v14, %v1153_v36  ;;  %v5904_v50 = vld [vmem:[%s8123_s0 + $0x20] sm:$0xff]  }
 0x136   :  { %5641 = vmatprep.subr.bf16.mxu0 %v5879_v49  ;;  %5655 = vmatprep.mubr.msk.bf16.mxu0 %vm6520_vm11, %v4776_v56  ;;  %v4768_v30 = vpack.c.bf16 %v1152_v21, %v1160_v24  ;;  %v4772_v31 = vpack.c.bf16 %v1155_v28, %v1154_v22  ;;  %v5915_v54 = vld [vmem:[%s8124_s29 + $0x20] sm:$0xff]   ;;  %v5918_v56 = vld [vmem:[%s8124_s29 + $0x28] sm:$0xff]  }
 0x138   :  { %5239 = vmatpush3.bf16.msra.mxu1 %v5878_v57  ;;  %v5913_v57 = vld [vmem:[%s8123_s0 + $0x38] sm:$0xff]  }
 0x139   :  { %5642 = vmatpush3.bf16.msra.mxu0 %v5879_v49  ;;  %5240 = vmatprep.subr.bf16.mxu1 %v5880_v58  ;;  %v5910_v49 = vld [vmem:[%s8123_s0 + $0x30] sm:$0xff]  }
 0x13a   :  { %5643 = vmatprep.subr.bf16.mxu0 %v5882_v59  ;;  %v5920_v58 = vld [vmem:[%s8124_s29 + $0x70] sm:$0xff]  }
 0x13b   :  { %4732 = vmatmul.mubr.msk.bf16.gmra.mrb[12].mxu1 %vm6498_vm9, %v4731_v55  ;;  %v5917_v55 = vld [vmem:[%s8124_s29 + $0x68] sm:$0xff]  }
 0x13c   :  { %5241 = vmatpush3.bf16.msra.mxu1 %v5881_v60  ;;  %1419 = vmatprep.mubr.bf16.mxu1 %v1183_v19  ;;  %v5923_v60 = vld [vmem:[%s8124_s29 + $0x78] sm:$0xff]   ;;  %v5916_v19 = vld [vmem:[%s8123_s0 + $0x40] sm:$0xff]  }
 0x13d   :  { %5644 = vmatpush3.bf16.msra.mxu0 %v5882_v59  ;;  %5242 = vmatprep.subr.bf16.mxu1 %v5883_v61  ;;  %v5921_v59 = vld [vmem:[%s8124_s29 + $0x30] sm:$0xff]   ;;  %v5919_v61 = vld [vmem:[%s8123_s0 + $0x48] sm:$0xff]  }
 0x13e   :  { %5645 = vmatprep.subr.bf16.mxu0 %v5885_v62 }
 0x140   :  { %5243 = vmatpush3.bf16.msra.mxu1 %v5884_v0 }
 0x141   :  { %5646 = vmatpush3.bf16.msra.mxu0 %v5885_v62  ;;  %5244 = vmatprep.subr.bf16.mxu1 %v5886_v1  ;;  %v5922_v62 = vld [vmem:[%s8123_s0 + $0x50] sm:$0xff]  }
 0x142   :  { %5647 = vmatprep.subr.bf16.mxu0 %v5888_v2 }
 0x144   :  { %5245 = vmatpush3.bf16.msra.mxu1 %v5887_v3  ;;  %v4700_v3 = vld [vmem:[%s8125_s10] ss:$0 sm:$0xff] }
 0x145   :  { %5648 = vmatpush3.bf16.msra.mxu0 %v5888_v2  ;;  %5246 = vmatprep.subr.bf16.mxu1 %v5889_v4 }
 0x146   :  { %5649 = vmatprep.subr.bf16.mxu0 %v5891_v5 }
 0x148   :  { %5247 = vmatpush3.bf16.msra.mxu1 %v5890_v6 }
 0x149   :  { %5650 = vmatpush3.bf16.msra.mxu0 %v5891_v5  ;;  %5248 = vmatprep.subr.bf16.mxu1 %v5892_v8 }
 0x14a   :  { %5651 = vmatprep.subr.bf16.mxu0 %v5894_v10 }
 0x14c   :  { %5249 = vmatpush3.bf16.msra.mxu1 %v5893_v11 }
 0x14d   :  { %5652 = vmatpush3.bf16.msra.mxu0 %v5894_v10  ;;  %5250 = vmatprep.subr.bf16.mxu1 %v5895_v15 }
 0x14e   :  { %5653 = vmatprep.subr.bf16.mxu0 %v5897_v18 }
 0x150   :  { %5251 = vmatpush3.bf16.msra.mxu1 %v5896_v20 }
 0x151   :  { %5654 = vmatpush3.bf16.msra.mxu0 %v5897_v18  ;;  %1657 = vmatprep.subr.bf16.mxu1 %v6162_v38 }
 0x152   :  { %5274 = vmatprep.subr.bf16.mxu0 %v5902_v40 }
 0x153   :  { %4769 = vmatmul.mubr.msk.bf16.vlgmr.msra.gmra.mrb[16].mxu1 %vm6411_vm4, %v4768_v30 }
 0x154   :  { %5656 = vmatmul.mubr.msk.bf16.vlgmr.msra.gmra.mrb[20].mxu0 %vm6564_vm14, %v4780_v32  ;;  %1427 = vmatprep.mubr.bf16.mxu1 %v1186_v34 }
 0x155   :  { %1658 = vmatpush1.bf16.msra.mxu1 %v5898_v25  ;;  %5275 = vmatpush3.bf16.msra.mxu0 %v5903_v23 }
 0x156   :  { %1659 = vmatprep.subr.bf16.mxu1 %v6162_v38  ;;  %5276 = vmatprep.subr.bf16.mxu0 %v5905_v43 }
 0x159   :  { %1660 = vmatpush1.bf16.msra.mxu1 %v5899_v39  ;;  %5277 = vmatpush3.bf16.msra.mxu0 %v5906_v45 }
 0x15a   :  { %1661 = vmatprep.subr.bf16.mxu1 %v6162_v38  ;;  %5278 = vmatprep.subr.bf16.mxu0 %v5908_v47 }
 0x15b   :  { %4773 = vmatmul.mubr.msk.bf16.gmra.mrb[20].mxu1 %vm6498_vm9, %v4772_v31 }
 0x15d   :  { %1662 = vmatpush1.bf16.msra.mxu1 %v5900_v41  ;;  %5279 = vmatpush3.bf16.msra.mxu0 %v5909_v37 }
 0x15e   :  { %1663 = vmatprep.subr.bf16.mxu1 %v6162_v38  ;;  %5280 = vmatprep.subr.bf16.mxu0 %v5911_v48 }
 0x161   :  { %1664 = vmatpush1.bf16.msra.mxu1 %v5901_v46  ;;  %5281 = vmatpush3.bf16.msra.mxu0 %v5912_v51 }
 0x162   :  { %1665 = vmatprep.subr.bf16.mxu1 %v6162_v38  ;;  %5282 = vmatprep.subr.bf16.mxu0 %v5914_v52 }
 0x165   :  { %1666 = vmatpush1.bf16.msra.mxu1 %v5904_v50  ;;  %5283 = vmatpush3.bf16.msra.mxu0 %v5915_v54 }
 0x166   :  { %1667 = vmatprep.subr.bf16.mxu1 %v6162_v38  ;;  %5284 = vmatprep.subr.bf16.mxu0 %v5917_v55 }
 0x169   :  { %1668 = vmatpush1.bf16.msra.mxu1 %v5907_v35  ;;  %5285 = vmatpush3.bf16.msra.mxu0 %v5918_v56 }
 0x16a   :  { %1669 = vmatprep.subr.bf16.mxu1 %v6162_v38  ;;  %5286 = vmatprep.subr.bf16.mxu0 %v5920_v58 }
 0x16d   :  { %1670 = vmatpush1.bf16.msra.mxu1 %v5910_v49  ;;  %5287 = vmatpush3.bf16.msra.mxu0 %v5921_v59  ;;  %v6942_v59 = vld [vmem:[%s8042_s11] ss:$0 sm:$0xff] }
 0x16e   :  { %1671 = vmatprep.subr.bf16.mxu1 %v6162_v38  ;;  %5288 = vmatprep.subr.bf16.mxu0 %v5923_v60  ;;  %v6947_v60 = vld [vmem:[%s8043_s2 + $0x8] sm:$0xff] }
 0x171   :  { %1672 = vmatpush1.bf16.msra.mxu1 %v5913_v57 }
 0x172   :  { %1673 = vmatprep.subr.bf16.mxu1 %v6162_v38 }
 0x175   :  { %1674 = vmatpush1.bf16.msra.mxu1 %v5916_v19  ;;  %v6952_v19 = vld [vmem:[%s8043_s2 + $0x18] sm:$0xff] }
 0x176   :  { %1675 = vmatprep.subr.bf16.mxu1 %v6162_v38 }
 0x179   :  { %1676 = vmatpush1.bf16.msra.mxu1 %v5919_v61  ;;  %v6957_v61 = vld [vmem:[%s8043_s2 + $0x38] sm:$0xff] }
 0x17a   :  { %1677 = vmatprep.subr.bf16.mxu1 %v6162_v38 }
 0x17d   :  { %1678 = vmatpush1.bf16.msra.mxu1 %v5922_v62 }
 0x17e   :  { %1679 = vmatprep.subr.bf16.mxu1 %v6162_v38 }
 0x206   :  { %v5214_v0 = vpop.f32.mrb[8].mxu1  ;;  %v5637_v1 = vpop.f32.mrb[16].mxu0 }
 0x207   :  { %v5215_v2 = vpop.f32.mrb[9].mxu1  ;;  %v1121_v4 = vpop.f32.mrb[17].mxu0 }
 0x208   :  { %v5216_v5 = vadd.f32 %v5215_v2, %v5214_v0  ;;  %v5217_v6 = vpop.f32.mrb[10].mxu1  ;;  %v5638_v8 = vpop.f32.mrb[18].mxu0  ;;  %v5924_v0 = vld [vmem:[%s8124_s29 + $0x38] sm:$0xff]   ;;  %v1731_v2 = vrot.slane %v6947_v60, 7 }
 0x209   :  { %v5218_v9 = vpop.f32.mrb[11].mxu1  ;;  %v1124_v10 = vpop.f32.mrb[19].mxu0  ;;  %5289 = vmatpush3.bf16.msra.mxu0 %v5924_v0 }
 0x20a   :  { %v1073_v11 = vadd.f32 %v5216_v5, %v4700_v3  ;;  %v5219_v12 = vadd.f32 %v5218_v9, %v5217_v6  ;;  %v6976_v9 = vld [vmem:[%s8043_s2 + $0x10] sm:$0xff] }
 0x20c   :  { %v1122_v13 = vadd.f32 %v1121_v4, %v1073_v11  ;;  %v1076_v14 = vadd.f32 %v5219_v12, %v4700_v3  ;;  %v6968_v4 = vld [vmem:[%s8043_s2] sm:$0xff] }
 0x20d   :  { %v1730_v11 = vrot.slane %v6968_v4, 7 }
 0x20e   :  { %v6887_v15 = vmax.f32 %v1122_v13, 0.0  ;;  %v1125_v17 = vadd.f32 %v1124_v10, %v1076_v14  ;;  %v5220_v18 = vpop.f32.mrb[12].mxu1  ;;  %v6981_v10 = vld [vmem:[%s8043_s2 + $0x30] sm:$0xff] }
 0x20f   :  { %v5221_v20 = vpop.f32.mrb[13].mxu1 }
 0x210   :  { %v6889_v21 = vmax.f32 %v1125_v17, 0.0  ;;  %v5222_v24 = vadd.f32 %v5221_v20, %v5220_v18  ;;  %v5223_v26 = vpop.f32.mrb[14].mxu1  ;;  %v3855_v27 = vrot.slane %v6887_v15, 7  ;;  %v3887_v30 = vrot.slane %v6887_v15, 1 }
 0x211   :  { %v5224_v32 = vpop.f32.mrb[15].mxu1  ;;  %v1720_v20 = vrot.slane %v6981_v10, 7 }
 0x212   :  { %v3858_v34 = vrot.slane %v6889_v21, 7  ;;  %v3888_v36 = vrot.slane %v6889_v21, 1  ;;  %v1081_v22 = vadd.f32 %v5222_v24, %v4700_v3  ;;  %v5225_v28 = vadd.f32 %v5224_v32, %v5223_v26 }
 0x213   :  { %v3921_v31 = vpack.c.bf16 %v6889_v21, %v6887_v15  ;;  %v1732_v32 = vrot.slane %v6976_v9, 7 }
 0x214   :  { %v1130_v38 = vadd.f32 %v5637_v1, %v1081_v22  ;;  %v1084_v25 = vadd.f32 %v5225_v28, %v4700_v3  ;;  %v6898_v39 = vsel %vm159_vm1, %v3855_v27, %v3858_v34  ;;  %v6901_v40 = vsel %vm198_vm8, %v3887_v30, %v3888_v36 }
 0x215   :  { %8126 = vst [vmem:[#allocation5_spill] sm:$0xff] %v6901_v40  ;;  %v1721_v1 = vrot.slane %v6957_v61, 7  ;;  %v1734_v3 = vrot.slane %v6952_v19, 7  ;;  %v1750_v28 = vsel %vm159_vm1, %v1720_v20, %v1730_v11 }
 0x216   :  { %v6903_v23 = vmax.f32 %v1130_v38, 0.0  ;;  %v1133_v41 = vadd.f32 %v5638_v8, %v1084_v25  ;;  %v5925_v8 = vld [vmem:[%s8123_s0 + $0x58] sm:$0xff]   ;;  %v5927_v38 = vld [vmem:[%s8124_s29 + $0xc0] sm:$0xff]   ;;  %v1733_v25 = vsel %vm159_vm1, %v1730_v11, %v1732_v32 }
 0x217   :  { %v1735_v17 = vsel %vm159_vm1, %v1731_v2, %v1734_v3  ;;  %v1751_v18 = vsel %vm159_vm1, %v1721_v1, %v1731_v2  ;;  %1680 = vmatpush1.bf16.msra.mxu1 %v5925_v8  ;;  %v5930_v2 = vld [vmem:[%s8124_s29 + $0x148] sm:$0xff]  }
 0x218   :  { %v3862_v43 = vrot.slane %v6903_v23, 7  ;;  %v3892_v45 = vrot.slane %v6903_v23, 1  ;;  %v6907_v46 = vmax.f32 %v1133_v41, 0.0  ;;  %v5928_v41 = vld [vmem:[%s8124_s29 + $0x100] sm:$0xff]   ;;  %5302 = vmatprep.subr.bf16.mxu1 %v5927_v38  ;;  %v5932_v8 = vld [vmem:[%s8124_s29 + $0x108] sm:$0xff]  }
 0x21a   :  { %v3845_v47 = vrot.slane %v6907_v46, 7  ;;  %v3896_v37 = vrot.slane %v6907_v46, 1  ;;  %v6914_v50 = vsel %vm159_vm1, %v3858_v34, %v3862_v43  ;;  %v6917_v51 = vsel %vm198_vm8, %v3888_v36, %v3892_v45 }
 0x21b   :  { %8127 = vst [vmem:[#allocation6_spill] sm:$0xff] %v6917_v51 }
 0x21c   :  { %v6920_v52 = vsel %vm159_vm1, %v3845_v47, %v3855_v27  ;;  %v6923_v35 = vsel %vm159_vm1, %v3862_v43, %v3845_v47  ;;  %v6928_v55 = vsel %vm198_vm8, %v3892_v45, %v3896_v37  ;;  %v6935_v57 = vsel %vm198_vm8, %v3896_v37, %v3887_v30  ;;  %v5926_v30 = vld [vmem:[%s8124_s29 + $0x140] sm:$0xff]  }
 0x21d   :  { %8128 = vst [vmem:[#allocation7_spill] sm:$0xff] %v6928_v55  ;;  %8129 = vst [vmem:[#allocation8_spill] sm:$0xff] %v6935_v57  ;;  %v4848_v27 = vpack.c.bf16 %v1735_v17, %v1751_v18  ;;  %5330 = vmatprep.subr.bf16.mxu0 %v5926_v30  ;;  %v4852_v47 = vpack.c.bf16 %v1733_v25, %v1750_v28  ;;  %v5936_v28 = vld [vmem:[%s8124_s29 + $0x110] sm:$0xff]  }
 0x21f   :  { %4849 = vmatprep.mubr.msk.bf16.mxu0 %vm6411_vm4, %v4848_v27 }
 0x220   :  { %4853 = vmatmul.mubr.msk.bf16.vlgmr.msra.gmra.mrb[24].mxu0 %vm6411_vm4, %v4852_v47 }
 0x221   :  { %5331 = vmatpush3.bf16.msra.mxu0 %v5928_v41 }
 0x222   :  { %5332 = vmatprep.subr.bf16.mxu0 %v5930_v2 }
 0x225   :  { %5333 = vmatpush3.bf16.msra.mxu0 %v5932_v8 }
 0x226   :  { %v5252_v62 = vpop.f32.mrb[16].mxu1 }
 0x227   :  { %v5253_v5 = vpop.f32.mrb[17].mxu1  ;;  %v5657_v6 = vpop.f32.mrb[20].mxu0 }
 0x228   :  { %v5254_v12 = vadd.f32 %v5253_v5, %v5252_v62  ;;  %v5255_v13 = vpop.f32.mrb[18].mxu1  ;;  %v1470_v14 = vpop.f32.mrb[21].mxu0 }
 0x229   :  { %v5256_v24 = vpop.f32.mrb[19].mxu1  ;;  %v5658_v26 = vpop.f32.mrb[22].mxu0 }
 0x22a   :  { %v1422_v34 = vadd.f32 %v5254_v12, %v6942_v59  ;;  %v5257_v36 = vadd.f32 %v5256_v24, %v5255_v13  ;;  %v1473_v22 = vpop.f32.mrb[23].mxu0 }
 0x22c   :  { %v1471_v43 = vadd.f32 %v1470_v14, %v1422_v34  ;;  %v1425_v45 = vadd.f32 %v5257_v36, %v6942_v59  ;;  %v5934_v36 = vld [vmem:[%s8124_s29 + $0x150] sm:$0xff]  }
 0x22d   :  { %5334 = vmatprep.subr.bf16.mxu0 %v5934_v36 }
 0x22e   :  { %v1485_v37 = vmax.f32 %v1471_v43, 0.0  ;;  %v1474_v62 = vadd.f32 %v1473_v22, %v1425_v45  ;;  %v5258_v0 = vpop.f32.mrb[20].mxu1  ;;  %5335 = vmatpush3.bf16.msra.mxu0 %v5936_v28  ;;  %v7074_v28 = vld [vmem:[%s8043_s2 + $0x20] sm:$0xff] }
 0x22f   :  { %v5259_v5 = vpop.f32.mrb[21].mxu1 }
 0x230   :  { %v1486_v11 = vmax.f32 %v1474_v62, 0.0  ;;  %v5260_v12 = vadd.f32 %v5259_v5, %v5258_v0  ;;  %v5261_v13 = vpop.f32.mrb[22].mxu1  ;;  %v1495_v14 = vrot.slane %v1485_v37, 7  ;;  %v1510_v17 = vrot.slane %v1485_v37, 1 }
 0x231   :  { %v5262_v18 = vpop.f32.mrb[23].mxu1 }
 0x232   :  { %v1496_v24 = vrot.slane %v1486_v11, 7  ;;  %v1511_v27 = vrot.slane %v1486_v11, 1  ;;  %v1430_v30 = vadd.f32 %v5260_v12, %v6942_v59  ;;  %v5263_v34 = vadd.f32 %v5262_v18, %v5261_v13  ;;  %v5944_v18 = vld [vmem:[%s8124_s29 + $0x120] sm:$0xff]  }
 0x233   :  { %v5792_v22 = vpack.i.bf16 %v1486_v11, %v1485_v37  ;;  %v5938_v37 = vld [vmem:[%s8124_s29 + $0x158] sm:$0xff]  }
 0x234   :  { %v1479_v38 = vadd.f32 %v5657_v6, %v1430_v30  ;;  %v1433_v25 = vadd.f32 %v5263_v34, %v6942_v59  ;;  %v1512_v41 = vsel %vm198_vm8, %v1510_v17, %v1511_v27  ;;  %v7029_v43 = vsel %vm159_vm1, %v1495_v14, %v1496_v24  ;;  %v5940_v6 = vld [vmem:[%s8124_s29 + $0x118] sm:$0xff]   ;;  %5336 = vmatprep.subr.bf16.mxu0 %v5938_v37 }
 0x235   :  { %5793 = vrot.lane.b32.xlu0 %v5792_v22, %s6163_s14  ;;  %5337 = vmatpush3.bf16.msra.mxu0 %v5940_v6  ;;  %v7062_v22 = vld [vmem:[%s8043_s2 + $0x28] sm:$0xff] }
 0x236   :  { %v1487_v45 = vmax.f32 %v1479_v38, 0.0  ;;  %v1482_v47 = vadd.f32 %v5658_v26, %v1433_v25  ;;  %v5942_v26 = vld [vmem:[%s8124_s29 + $0x160] sm:$0xff]   ;;  %v1738_v44 = vrot.slane %v7062_v22, 7  ;;  %v5948_v38 = vld [vmem:[%s8124_s29 + $0x128] sm:$0xff]   ;;  %v1736_v25 = vrot.slane %v7074_v28, 7 }
 0x237   :  { %5338 = vmatprep.subr.bf16.mxu0 %v5942_v26 }
 0x238   :  { %v1498_v59 = vrot.slane %v1487_v45, 7  ;;  %v1513_v62 = vrot.slane %v1487_v45, 1  ;;  %v1488_v0 = vmax.f32 %v1482_v47, 0.0  ;;  %v1737_v37 = vsel %vm159_vm1, %v1732_v32, %v1736_v25 }
 0x239   :  { %5339 = vmatpush3.bf16.msra.mxu0 %v5944_v18  ;;  %v1740_v6 = vsel %vm159_vm1, %v1736_v25, %v1720_v20  ;;  %v1761_v20 = vrot.slane %v6976_v9, 1  ;;  %v1766_v32 = vrot.slane %v7074_v28, 1  ;;  %v1770_v25 = vrot.slane %v6981_v10, 1 }
 0x23a   :  { %v1490_v2 = vrot.slane %v1488_v0, 7  ;;  %v1515_v5 = vrot.slane %v1488_v0, 1  ;;  %v5797_v8 = vpack.i.bf16 %v1488_v0, %v1487_v45  ;;  %v1514_v11 = vsel %vm198_vm8, %v1511_v27, %v1513_v62  ;;  %v5954_v0 = vld [vmem:[%s8124_s29 + $0x178] sm:$0xff]  }
 0x23b   :  { %v1524_v12 = vsel %vm6478_vm7, 0.0, %v1514_v11  ;;  %v7044_v13 = vsel %vm159_vm1, %v1496_v24, %v1498_v59  ;;  %v1741_v45 = vsel %vm159_vm1, %v1738_v44, %v1721_v1  ;;  %v5952_v1 = vld [vmem:[%s8124_s29 + $0x130] sm:$0xff]   ;;  %v5956_v11 = vld [vmem:[%s8124_s29 + $0x138] sm:$0xff]  }
 0x23c   :  { %5798 = vrot.lane.b32.xlu0 %v5797_v8, %s6163_s14  ;;  %v1545_v30 = vpack.c.bf16 %v1524_v12, %v1512_v41  ;;  %v7050_v27 = vsel %vm159_vm1, %v1490_v2, %v1495_v14  ;;  %v1516_v34 = vsel %vm198_vm8, %v1513_v62, %v1515_v5  ;;  %v1522_v36 = vsel %vm198_vm8, %v1515_v5, %v1510_v17  ;;  %v5946_v17 = vld [vmem:[%s8124_s29 + $0x168] sm:$0xff]   ;;  %v5950_v62 = vld [vmem:[%s8124_s29 + $0x170] sm:$0xff]  }
 0x23d   :  { %v1526_v7 = vsel %vm6547_vm12, 0.0, %v1522_v36  ;;  %v7057_v24 = vsel %vm159_vm1, %v1498_v59, %v1490_v2  ;;  %5340 = vmatprep.subr.bf16.mxu0 %v5946_v17  ;;  %v1739_v41 = vsel %vm159_vm1, %v1734_v3, %v1738_v44  ;;  %v4860_v59 = vpack.c.bf16 %v1740_v6, %v1737_v37 }
 0x23e   :  { %4795 = vmatprep.mubr.msk.bf16.mxu1 %vm1539_vm15, %v1545_v30  ;;  %v7065_v14 = vpack.c.bf16 %v1526_v7, %v1516_v34  ;;  %v4856_v47 = vpack.c.bf16 %v1741_v45, %v1739_v41  ;;  %5341 = vmatpush3.bf16.msra.mxu0 %v5948_v38  ;;  %v1760_v3 = vrot.slane %v6968_v4, 1  ;;  %v1763_v2 = vrot.slane %v6947_v60, 1 }
 0x23f   :  { %5342 = vmatprep.subr.bf16.mxu0 %v5950_v62  ;;  %v1764_v5 = vrot.slane %v6952_v19, 1  ;;  %v1768_v8 = vrot.slane %v7062_v22, 1  ;;  %v1767_v34 = vsel %vm198_vm8, %v1761_v20, %v1766_v32  ;;  %v1797_v36 = vpack.c.bf16 %v6952_v19, %v6947_v60 }
 0x240   :  { %4857 = vmatprep.mubr.msk.bf16.mxu0 %vm6498_vm9, %v4856_v47  ;;  %v1762_v30 = vsel %vm198_vm8, %v1760_v3, %v1761_v20  ;;  %v1796_v17 = vpack.c.bf16 %v6976_v9, %v6968_v4  ;;  %v1772_v44 = vrot.slane %v6957_v61, 1  ;;  %v1803_v38 = vpack.c.bf16 %v6957_v61, %v7062_v22  ;;  %v5931_v20 = vld [vmem:[%s8124_s29 + $0xc8] sm:$0xff]   ;;  %v5960_v4 = vld [vmem:[%s8044_s16 + $0x80] sm:$0xff]  }
 0x241   :  { %4861 = vmatmul.mubr.msk.bf16.gmra.mrb[28].mxu0 %vm6498_vm9, %v4860_v59  ;;  %v1765_v26 = vsel %vm198_vm8, %v1763_v2, %v1764_v5  ;;  %v1769_v12 = vsel %vm198_vm8, %v1764_v5, %v1768_v8  ;;  %v4868_v7 = vpack.c.bf16 %v1767_v34, %v1762_v30  ;;  %v1802_v60 = vpack.c.bf16 %v6981_v10, %v7074_v28  ;;  %v5951_v30 = vld [vmem:[%s8124_s29 + $0xf0] sm:$0xff]   ;;  %v5961_v9 = vld [vmem:[%s8044_s16 + $0x48] sm:$0xff]  }
 0x242   :  { %5343 = vmatpush3.bf16.msra.mxu0 %v5952_v1  ;;  %v4864_v18 = vpack.c.bf16 %v1769_v12, %v1765_v26  ;;  %v1773_v19 = vsel %vm198_vm8, %v1768_v8, %v1772_v44  ;;  %v1785_v41 = vsel %vm198_vm8, %v1772_v44, %v1763_v2  ;;  %v1771_v47 = vsel %vm198_vm8, %v1766_v32, %v1770_v25  ;;  %v5929_v1 = vld [vmem:[%s8124_s29 + $0x80] sm:$0xff]   ;;  %v5939_v26 = vld [vmem:[%s8124_s29 + $0xd8] sm:$0xff]   ;;  %v5947_v12 = vld [vmem:[%s8124_s29 + $0xe8] sm:$0xff]  }
 0x243   :  { %5344 = vmatprep.subr.bf16.mxu0 %v5954_v0  ;;  %v4872_v45 = vpack.c.bf16 %v1785_v41, %v1773_v19  ;;  %v1784_v37 = vsel %vm198_vm8, %v1770_v25, %v1760_v3  ;;  %v1506_v10 = vsel %vm6382_vm0, 0.0, %v7050_v27  ;;  %v5933_v27 = vld [vmem:[%s8124_s29 + $0x88] sm:$0xff]   ;;  %v5935_v0 = vld [vmem:[%s8124_s29 + $0xd0] sm:$0xff]   ;;  %v1508_v2 = vsel %vm6458_vm5, 0.0, %v7044_v13  ;;  %v5943_v13 = vld [vmem:[%s8124_s29 + $0xe0] sm:$0xff]  }
 0x244   :  { %4865 = vmatprep.mubr.msk.bf16.mxu0 %vm6520_vm11, %v4864_v18  ;;  %v4876_v61 = vpack.c.bf16 %v1784_v37, %v1771_v47  ;;  %v5949_v18 = vld [vmem:[%s8124_s29 + $0xa8] sm:$0xff]   ;;  %v5953_v34 = vld [vmem:[%s8124_s29 + $0xb0] sm:$0xff]   ;;  %v5958_v37 = vld [vmem:[%s8044_s16 + $0x40] sm:$0xff]   ;;  %vm3692_vm0 = vcmask 130048  }
 0x246   :  { %5345 = vmatpush3.bf16.msra.mxu0 %v5956_v11  ;;  %v5937_v11 = vld [vmem:[%s8124_s29 + $0x90] sm:$0xff]  }
 0x247   :  { %5659 = vmatprep.subr.bf16.mxu0 %v5960_v4 }
 0x249   :  { %4869 = vmatmul.mubr.msk.bf16.vlgmr.msra.gmra.mrb[32].mxu0 %vm6520_vm11, %v4868_v7  ;;  %v5957_v7 = vld [vmem:[%s8124_s29 + $0xb8] sm:$0xff]  }
 0x24a   :  { %4873 = vmatprep.mubr.msk.bf16.mxu0 %vm6564_vm14, %v4872_v45  ;;  %5660 = vmatpush3.bf16.msra.mxu0 %v5960_v4  ;;  %v5982_v4 = vld [vmem:[%s8045_s18 + $0x40] sm:$0xff]  }
 0x251   :  { %4877 = vmatmul.mubr.msk.bf16.gmra.mrb[36].mxu0 %vm6564_vm14, %v4876_v61  ;;  %v5959_v61 = vld [vmem:[%s8044_s16] sm:$0xff]  }
 0x2a7   :  { %v5794_v22 = vpop.permute.xlu0 %5793 }
 0x2a8   :  { %v5796_v6 = vunpack.i.h.bf16 %v5794_v22  ;;  %v5795_v59 = vunpack.i.l.bf16 %v5794_v22 }
 0x2aa   :  { %v1540_v28 = vsel %vm1539_vm15, %v1506_v10, %v5795_v59  ;;  %v1541_v62 = vsel %vm1539_vm15, %v7029_v43, %v5796_v6 }
 0x2ab   :  { %v1544_v3 = vpack.c.bf16 %v1541_v62, %v1540_v28  ;;  %v5964_v62 = vld [vmem:[%s8044_s16 + $0x50] sm:$0xff]  }
 0x2ad   :  { %1690 = vmatmul.mubr.bf16.vlgmr.msra.gmra.mrb[24].mxu1 %v1544_v3  ;;  %v5966_v3 = vld [vmem:[%s8044_s16 + $0x90] sm:$0xff]  }
 0x2ae   :  { %5303 = vmatpush3.bf16.msra.mxu1 %v5929_v1  ;;  %4796 = vmatprep.mubr.msk.bf16.mxu1 %vm1539_vm15, %v7065_v14  ;;  %v5799_v33 = vpop.permute.xlu0 %5798  ;;  %v5965_v1 = vld [vmem:[%s8044_s16 + $0x10] sm:$0xff]  }
 0x2af   :  { %v5801_v43 = vunpack.i.h.bf16 %v5799_v33  ;;  %v5800_v32 = vunpack.i.l.bf16 %v5799_v33  ;;  %5304 = vmatprep.subr.bf16.mxu1 %v5931_v20 }
 0x2b1   :  { %v1542_v5 = vsel %vm1539_vm15, %v1508_v2, %v5800_v32  ;;  %v1543_v14 = vsel %vm1539_vm15, %v7057_v24, %v5801_v43  ;;  %v5945_v24 = vld [vmem:[%s8124_s29 + $0xa0] sm:$0xff]   ;;  %v5969_v2 = vld [vmem:[%s8044_s16 + $0x98] sm:$0xff]  }
 0x2b2   :  { %5305 = vmatpush3.bf16.msra.mxu1 %v5933_v27  ;;  %v1546_v8 = vpack.c.bf16 %v1543_v14, %v1542_v5  ;;  %v5967_v27 = vld [vmem:[%s8044_s16 + $0x58] sm:$0xff]  }
 0x2b3   :  { %5306 = vmatprep.subr.bf16.mxu1 %v5935_v0  ;;  %v5968_v0 = vld [vmem:[%s8044_s16 + $0x18] sm:$0xff]  }
 0x2b5   :  { %1698 = vmatmul.mubr.bf16.gmra.mrb[28].mxu1 %v1546_v8  ;;  %v5970_v8 = vld [vmem:[%s8044_s16 + $0x60] sm:$0xff]  }
 0x2b6   :  { %5307 = vmatpush3.bf16.msra.mxu1 %v5937_v11  ;;  %2278 = vmatprep.mubr.bf16.mxu1 %v1797_v36  ;;  %v5955_v36 = vld [vmem:[%s8124_s29 + $0xf8] sm:$0xff]   ;;  %v5971_v11 = vld [vmem:[%s8044_s16 + $0x20] sm:$0xff]  }
 0x2b7   :  { %5308 = vmatprep.subr.bf16.mxu1 %v5939_v26  ;;  %v5972_v26 = vld [vmem:[%s8044_s16 + $0xa0] sm:$0xff]  }
 0x2ba   :  { %5309 = vmatpush3.bf16.msra.mxu1 %v5941_v63 }
 0x2bb   :  { %5310 = vmatprep.subr.bf16.mxu1 %v5943_v13 }
 0x2be   :  { %5311 = vmatpush3.bf16.msra.mxu1 %v5945_v24  ;;  %v5973_v24 = vld [vmem:[%s8044_s16 + $0x68] sm:$0xff]  }
 0x2bf   :  { %5312 = vmatprep.subr.bf16.mxu1 %v5947_v12 }
 0x2c2   :  { %5313 = vmatpush3.bf16.msra.mxu1 %v5949_v18 }
 0x2c3   :  { %5314 = vmatprep.subr.bf16.mxu1 %v5951_v30  ;;  %v5974_v30 = vld [vmem:[%s8044_s16 + $0x28] sm:$0xff]  }
 0x2c6   :  { %5315 = vmatpush3.bf16.msra.mxu1 %v5953_v34  ;;  %v5975_v34 = vld [vmem:[%s8044_s16 + $0xa8] sm:$0xff]  }
 0x2c7   :  { %5316 = vmatprep.subr.bf16.mxu1 %v5955_v36 }
 0x2ca   :  { %5317 = vmatpush3.bf16.msra.mxu1 %v5957_v7 }
 0x2cb   :  { %5358 = vmatprep.subr.bf16.mxu1 %v5958_v37  ;;  %v5980_v37 = vld [vmem:[%s8044_s16 + $0x38] sm:$0xff]  }
 0x2cd   :  { %2279 = vmatmul.mubr.bf16.vlgmr.msra.gmra.mrb[32].mxu1 %v1796_v17  ;;  %v5962_v17 = vld [vmem:[%s8044_s16 + $0x8] sm:$0xff]  }
 0x2ce   :  { %2286 = vmatprep.mubr.bf16.mxu1 %v1803_v38  ;;  %5359 = vmatpush3.bf16.msra.mxu1 %v5959_v61  ;;  %v5963_v38 = vld [vmem:[%s8044_s16 + $0x88] sm:$0xff]   ;;  %v5981_v61 = vld [vmem:[%s8044_s16 + $0xb8] sm:$0xff]  }
 0x2cf   :  { %5360 = vmatprep.subr.bf16.mxu1 %v5961_v9  ;;  %5661 = vmatprep.subr.bf16.mxu0 %v5963_v38  ;;  %v7296_v9 = vld [vmem:[%s8045_s18 + $0x80] sm:$0xff]  }
 0x2d0   :  { %5662 = vmatpush3.bf16.msra.mxu0 %v5963_v38 }
 0x2d1   :  { %5663 = vmatprep.subr.bf16.mxu0 %v5966_v3 }
 0x2d2   :  { %5361 = vmatpush3.bf16.msra.mxu1 %v5962_v17 }
 0x2d3   :  { %5362 = vmatprep.subr.bf16.mxu1 %v5964_v62 }
 0x2d4   :  { %5664 = vmatpush3.bf16.msra.mxu0 %v5966_v3  ;;  %v4797_v3 = vld [vmem:[%s8046_s15] ss:$0 sm:$0xff] }
 0x2d5   :  { %2287 = vmatmul.mubr.bf16.gmra.mrb[36].mxu1 %v1802_v60  ;;  %5665 = vmatprep.subr.bf16.mxu0 %v5969_v2 }
 0x2d6   :  { %5363 = vmatpush3.bf16.msra.mxu1 %v5965_v1 }
 0x2d7   :  { %5364 = vmatprep.subr.bf16.mxu1 %v5967_v27 }
 0x2d8   :  { %5666 = vmatpush3.bf16.msra.mxu0 %v5969_v2 }
 0x2d9   :  { %5667 = vmatprep.subr.bf16.mxu0 %v5972_v26 }
 0x2da   :  { %5365 = vmatpush3.bf16.msra.mxu1 %v5968_v0 }
 0x2db   :  { %5366 = vmatprep.subr.bf16.mxu1 %v5970_v8 }
 0x2dc   :  { %5668 = vmatpush3.bf16.msra.mxu0 %v5972_v26 }
 0x2dd   :  { %5669 = vmatprep.subr.bf16.mxu0 %v5975_v34 }
 0x2de   :  { %5367 = vmatpush3.bf16.msra.mxu1 %v5971_v11 }
 0x2df   :  { %5368 = vmatprep.subr.bf16.mxu1 %v5973_v24 }
 0x2e0   :  { %5670 = vmatpush3.bf16.msra.mxu0 %v5975_v34 }
 0x2e2   :  { %5369 = vmatpush3.bf16.msra.mxu1 %v5974_v30 }
 0x2f3   :  { %v5290_v44 = vpop.f32.mrb[24].mxu0 }
 0x2f4   :  { %v5291_v25 = vpop.f32.mrb[25].mxu0 }
 0x2f5   :  { %v7202_v19 = vadd.f32 %v5291_v25, %v5290_v44  ;;  %v5293_v41 = vpop.f32.mrb[26].mxu0  ;;  %v5976_v44 = vld [vmem:[%s8044_s16 + $0x70] sm:$0xff]  }
 0x2f6   :  { %v5294_v45 = vpop.f32.mrb[27].mxu0  ;;  %v5977_v25 = vld [vmem:[%s8044_s16 + $0x30] sm:$0xff]   ;;  %5370 = vmatprep.subr.bf16.mxu1 %v5976_v44 }
 0x2f7   :  { %v7204_v47 = vadd.f32 %v5294_v45, %v5293_v41  ;;  %v5978_v41 = vld [vmem:[%s8044_s16 + $0xb0] sm:$0xff]   ;;  %5371 = vmatpush3.bf16.msra.mxu1 %v5977_v25  ;;  %v5979_v45 = vld [vmem:[%s8044_s16 + $0x78] sm:$0xff]   ;;  %v2232_v27 = vadd.f32 %v7202_v19, %v4797_v3 }
 0x2f8   :  { %5671 = vmatprep.subr.bf16.mxu0 %v5978_v41  ;;  %5372 = vmatprep.subr.bf16.mxu1 %v5979_v45 }
 0x2f9   :  { %5672 = vmatpush3.bf16.msra.mxu0 %v5978_v41 }
 0x2fa   :  { %5673 = vmatprep.subr.bf16.mxu0 %v5981_v61 }
 0x2fb   :  { %5373 = vmatpush3.bf16.msra.mxu1 %v5980_v37 }
 0x2fc   :  { %5396 = vmatprep.subr.bf16.mxu1 %v5982_v4 }
 0x2fd   :  { %5674 = vmatpush3.bf16.msra.mxu0 %v5981_v61 }
 0x2fe   :  { %5679 = vmatprep.subr.bf16.mxu0 %v7296_v9 }
 0x314   :  { %v5296_v60 = vpop.f32.mrb[28].mxu0 }
 0x315   :  { %v5297_v22 = vpop.f32.mrb[29].mxu0 }
 0x316   :  { %v7224_v6 = vadd.f32 %v5297_v22, %v5296_v60  ;;  %v5299_v59 = vpop.f32.mrb[30].mxu0 }
 0x317   :  { %v5300_v10 = vpop.f32.mrb[31].mxu0 }
 0x318   :  { %v7226_v28 = vadd.f32 %v5300_v10, %v5299_v59  ;;  %v2240_v34 = vadd.f32 %v7224_v6, %v4797_v3 }
 0x31a   :  { %v2243_v25 = vadd.f32 %v7226_v28, %v4797_v3 }
 0x31c   :  { %v5346_v20 = vpop.f32.mrb[32].mxu0 }
 0x31d   :  { %v5347_v33 = vpop.f32.mrb[33].mxu0 }
 0x31e   :  { %v7240_v43 = vadd.f32 %v5347_v33, %v5346_v20  ;;  %v5349_v32 = vpop.f32.mrb[34].mxu0 }
 0x31f   :  { %v5350_v5 = vpop.f32.mrb[35].mxu0 }
 0x320   :  { %v7248_v14 = vadd.f32 %v5350_v5, %v5349_v32  ;;  %v2235_v5 = vadd.f32 %v7204_v47, %v4797_v3 }
 0x324   :  { %v5352_v63 = vpop.f32.mrb[36].mxu0 }
 0x325   :  { %v5353_v13 = vpop.f32.mrb[37].mxu0 }
 0x326   :  { %v7262_v12 = vadd.f32 %v5353_v13, %v5352_v63  ;;  %v5355_v18 = vpop.f32.mrb[38].mxu0 }
 0x327   :  { %v5356_v36 = vpop.f32.mrb[39].mxu0 }
 0x328   :  { %v7270_v7 = vadd.f32 %v5356_v36, %v5355_v18 }
 0x380   :  { %v7299_v17 = vpop.f32.mrb[24].mxu1 }
 0x381   :  { %v1693_v38 = vpop.f32.mrb[25].mxu1 }
 0x382   :  { %v7301_v60 = vpop.f32.mrb[26].mxu1 }
 0x383   :  { %v1696_v22 = vpop.f32.mrb[27].mxu1 }
 0x388   :  { %v7303_v59 = vpop.f32.mrb[28].mxu1 }
 0x389   :  { %v1701_v10 = vpop.f32.mrb[29].mxu1 }
 0x38a   :  { %v7305_v62 = vpop.f32.mrb[30].mxu1 }
 0x38b   :  { %v1704_v1 = vpop.f32.mrb[31].mxu1 }
 0x38c   :  { %v7322_v1 = vld [vmem:[%s8047_s4 + $0x10] sm:$0xff] }
 0x3a0   :  { %v5318_v20 = vpop.f32.mrb[32].mxu1 }
 0x3a1   :  { %v5319_v33 = vpop.f32.mrb[33].mxu1 }
 0x3a2   :  { %v5320_v32 = vadd.f32 %v5319_v33, %v5318_v20  ;;  %v5321_v0 = vpop.f32.mrb[34].mxu1  ;;  %v7328_v20 = vld [vmem:[%s8047_s4] sm:$0xff] }
 0x3a3   :  { %v5322_v2 = vpop.f32.mrb[35].mxu1  ;;  %v2718_v33 = vrot.slane %v7328_v20, 1 }
 0x3a4   :  { %v2281_v8 = vadd.f32 %v5320_v32, %v2232_v27  ;;  %v5323_v11 = vadd.f32 %v5322_v2, %v5321_v0  ;;  %v2721_v32 = vrot.slane %v7322_v1, 1 }
 0x3a6   :  { %v2330_v26 = vadd.f32 %v7240_v43, %v2281_v8  ;;  %v2284_v63 = vadd.f32 %v5323_v11, %v2235_v5 }
 0x3a8   :  { %v2344_v13 = vmax.f32 %v2330_v26, 0.0  ;;  %v2333_v24 = vadd.f32 %v7248_v14, %v2284_v63  ;;  %v5324_v18 = vpop.f32.mrb[36].mxu1 }
 0x3a9   :  { %v5325_v30 = vpop.f32.mrb[37].mxu1 }
 0x3aa   :  { %v2345_v36 = vmax.f32 %v2333_v24, 0.0  ;;  %v5326_v44 = vadd.f32 %v5325_v30, %v5324_v18  ;;  %v5327_v19 = vpop.f32.mrb[38].mxu1  ;;  %v2354_v41 = vrot.slane %v2344_v13, 7  ;;  %v2369_v45 = vrot.slane %v2344_v13, 1 }
 0x3ab   :  { %v5328_v47 = vpop.f32.mrb[39].mxu1 }
 0x3ac   :  { %v2355_v37 = vrot.slane %v2345_v36, 7  ;;  %v2370_v61 = vrot.slane %v2345_v36, 1  ;;  %v2289_v4 = vadd.f32 %v5326_v44, %v2240_v34  ;;  %v5329_v43 = vadd.f32 %v5328_v47, %v5327_v19  ;;  %v5983_v44 = vld [vmem:[%s8045_s18] sm:$0xff]  }
 0x3ad   :  { %v2387_v38 = vpack.c.bf16 %v2345_v36, %v2344_v13 }
 0x3ae   :  { %v2356_v22 = vsel %vm159_vm1, %v2354_v41, %v2355_v37  ;;  %v2338_v14 = vadd.f32 %v7262_v12, %v2289_v4  ;;  %v2292_v10 = vadd.f32 %v5329_v43, %v2243_v25  ;;  %v2371_v6 = vsel %vm198_vm8, %v2369_v45, %v2370_v61  ;;  %v7333_v12 = vld [vmem:[%s8047_s4 + $0x8] sm:$0xff]  ;;  %v5987_v43 = vld [vmem:[%s8045_s18 + $0x50] sm:$0xff]  }
 0x3af   :  { %2623 = vmatprep.mubr.bf16.mxu1 %v2387_v38  ;;  %v2719_v27 = vrot.slane %v7333_v12, 1  ;;  %v5986_v4 = vld [vmem:[%s8045_s18 + $0x8] sm:$0xff]   ;;  %v5991_v38 = vld [vmem:[%s8045_s18 + $0x90] sm:$0xff]  }
 0x3b0   :  { %v2346_v28 = vmax.f32 %v2338_v14, 0.0  ;;  %v2341_v3 = vadd.f32 %v7270_v7, %v2292_v10  ;;  %v5990_v14 = vld [vmem:[%s8045_s18 + $0x58] sm:$0xff]  }
 0x3b1   :  { %v2720_v24 = vsel %vm198_vm8, %v2718_v33, %v2719_v27  ;;  %v2722_v18 = vsel %vm198_vm8, %v2719_v27, %v2721_v32  ;;  %v5994_v10 = vld [vmem:[%s8045_s18 + $0x98] sm:$0xff]   ;;  %v5995_v27 = vld [vmem:[%s8045_s18 + $0x20] sm:$0xff]  }
 0x3b2   :  { %v2357_v0 = vrot.slane %v2346_v28, 7  ;;  %v2372_v2 = vrot.slane %v2346_v28, 1  ;;  %v2347_v5 = vmax.f32 %v2341_v3, 0.0  ;;  %v5997_v3 = vld [vmem:[%s8045_s18 + $0xa0] sm:$0xff]  }
 0x3b4   :  { %v2349_v7 = vrot.slane %v2347_v5, 7  ;;  %v2374_v8 = vrot.slane %v2347_v5, 1  ;;  %v2373_v11 = vsel %vm198_vm8, %v2370_v61, %v2372_v2  ;;  %v2390_v26 = vpack.c.bf16 %v2347_v5, %v2346_v28  ;;  %v5993_v28 = vld [vmem:[%s8045_s18 + $0x60] sm:$0xff]   ;;  %v5998_v5 = vld [vmem:[%s8045_s18 + $0x28] sm:$0xff]  }
 0x3b5   :  { %v4913_v63 = vpack.c.bf16 %v2373_v11, %v2371_v6  ;;  %v2358_v13 = vsel %vm159_vm1, %v2355_v37, %v2357_v0  ;;  %v5984_v37 = vld [vmem:[%s8045_s18 + $0x48] sm:$0xff]   ;;  %v4954_v61 = vpack.c.bf16 %v2722_v18, %v2720_v24  ;;  %v5992_v6 = vld [vmem:[%s8045_s18 + $0x18] sm:$0xff]   ;;  %v6003_v11 = vld [vmem:[%s8045_s18 + $0xb0] sm:$0xff]   ;;  %v2704_v24 = vrot.slane %v7333_v12, 7 }
 0x3b6   :  { %v2364_v30 = vsel %vm159_vm1, %v2349_v7, %v2354_v41  ;;  %v2375_v34 = vsel %vm198_vm8, %v2372_v2, %v2374_v8  ;;  %v2381_v36 = vsel %vm198_vm8, %v2374_v8, %v2369_v45  ;;  %v2359_v19 = vsel %vm159_vm1, %v2357_v0, %v2349_v7  ;;  %v5988_v45 = vld [vmem:[%s8045_s18 + $0x88] sm:$0xff]   ;;  %v5999_v7 = vld [vmem:[%s8045_s18 + $0x70] sm:$0xff]   ;;  %v2696_v8 = vld [vmem:[%s8047_s4 + $0x18] sm:$0xff] }
 0x3b7   :  { %v4905_v25 = vpack.c.bf16 %v2356_v22, %v2364_v30  ;;  %v4917_v47 = vpack.c.bf16 %v2381_v36, %v2375_v34  ;;  %5675 = vmatprep.mubr.msk.bf16.mxu0 %vm6520_vm11, %v4913_v63  ;;  %v4909_v41 = vpack.c.bf16 %v2359_v19, %v2358_v13  ;;  %v5989_v22 = vld [vmem:[%s8045_s18 + $0x10] sm:$0xff]   ;;  %v5996_v0 = vld [vmem:[%s8045_s18 + $0x68] sm:$0xff]   ;;  %v2698_v63 = vrot.slane %v2696_v8, 7  ;;  %v6002_v18 = vld [vmem:[%s8045_s18 + $0x78] sm:$0xff]  }
 0x3b8   :  { %v6000_v2 = vld [vmem:[%s8045_s18 + $0xa8] sm:$0xff]   ;;  %v2703_v13 = vrot.slane %v7328_v20, 7  ;;  %v2723_v30 = vrot.slane %v2696_v8, 1  ;;  %v6005_v34 = vld [vmem:[%s8045_s18 + $0xb8] sm:$0xff]  }
 0x3b9   :  { %4906 = vmatmul.mubr.msk.bf16.vlgmr.msra.gmra.mrb[40].mxu1 %vm6411_vm4, %v4905_v25  ;;  %5676 = vmatmul.mubr.msk.bf16.vlgmr.msra.gmra.mrb[40].mxu0 %vm6564_vm14, %v4917_v47  ;;  %v6004_v36 = vld [vmem:[%s8045_s18 + $0x38] sm:$0xff]  }
 0x3ba   :  { %5397 = vmatpush3.bf16.msra.mxu1 %v5983_v44  ;;  %2631 = vmatprep.mubr.bf16.mxu1 %v2390_v26  ;;  %v6001_v26 = vld [vmem:[%s8045_s18 + $0x30] sm:$0xff]   ;;  %v2705_v44 = vsel %vm159_vm1, %v2703_v13, %v2704_v24  ;;  %v2724_v19 = vsel %vm198_vm8, %v2721_v32, %v2723_v30  ;;  %v2730_v25 = vsel %vm198_vm8, %v2723_v30, %v2718_v33  ;;  %v7527_v30 = vld [vmem:[%s8049_s22] sm:$0xff]  }
 0x3bb   :  { %5398 = vmatprep.subr.bf16.mxu1 %v5984_v37  ;;  %5680 = vmatpush3.bf16.msra.mxu0 %v7296_v9  ;;  %v2736_v9 = vpack.c.bf16 %v7333_v12, %v7328_v20  ;;  %v2713_v12 = vsel %vm159_vm1, %v2698_v63, %v2703_v13  ;;  %v4958_v37 = vpack.c.bf16 %v2730_v25, %v2724_v19  ;;  %v6027_v13 = vld [vmem:[%s8048_s20 + $0x78] sm:$0xff]  }
 0x3bc   :  { %5681 = vmatprep.subr.bf16.mxu0 %v5988_v45  ;;  %5695 = vmatprep.mubr.msk.bf16.mxu0 %vm6520_vm11, %v4954_v61  ;;  %v4946_v47 = vpack.c.bf16 %v2705_v44, %v2713_v12  ;;  %v6007_v61 = vld [vmem:[%s8048_s20] sm:$0xff]  }
 0x3bd   :  { %v4878_v12 = vld [vmem:[%s8050_s17] ss:$0 sm:$0xff] }
 0x3be   :  { %5399 = vmatpush3.bf16.msra.mxu1 %v5986_v4  ;;  %v6008_v4 = vld [vmem:[%s8048_s20 + $0x80] sm:$0xff]  }
 0x3bf   :  { %5400 = vmatprep.subr.bf16.mxu1 %v5987_v43  ;;  %5682 = vmatpush3.bf16.msra.mxu0 %v5988_v45  ;;  %v2706_v45 = vrot.slane %v7322_v1, 7  ;;  %v6009_v43 = vld [vmem:[%s8048_s20 + $0x48] sm:$0xff]  }
 0x3c0   :  { %5683 = vmatprep.subr.bf16.mxu0 %v5991_v38 }
 0x3c1   :  { %4910 = vmatmul.mubr.msk.bf16.gmra.mrb[44].mxu1 %vm6498_vm9, %v4909_v41  ;;  %v2739_v41 = vpack.c.bf16 %v2696_v8, %v7322_v1  ;;  %v2707_v20 = vsel %vm159_vm1, %v2704_v24, %v2706_v45  ;;  %v2708_v33 = vsel %vm159_vm1, %v2706_v45, %v2698_v63  ;;  %v6006_v1 = vld [vmem:[%s8048_s20 + $0x40] sm:$0xff]   ;;  %v6023_v8 = vld [vmem:[%s8048_s20 + $0xa8] sm:$0xff]   ;;  %v6026_v63 = vld [vmem:[%s8048_s20 + $0xb0] sm:$0xff]  }
 0x3c2   :  { %5401 = vmatpush3.bf16.msra.mxu1 %v5989_v22  ;;  %2972 = vmatprep.mubr.bf16.mxu1 %v2736_v9  ;;  %v4950_v32 = vpack.c.bf16 %v2708_v33, %v2707_v20  ;;  %v6011_v22 = vld [vmem:[%s8048_s20 + $0x88] sm:$0xff]   ;;  %v6012_v9 = vld [vmem:[%s8048_s20 + $0x50] sm:$0xff]   ;;  %v6028_v24 = vld [vmem:[%s8048_s20 + $0x38] sm:$0xff]  }
 0x3c3   :  { %5402 = vmatprep.subr.bf16.mxu1 %v5990_v14  ;;  %5684 = vmatpush3.bf16.msra.mxu0 %v5991_v38  ;;  %v6010_v38 = vld [vmem:[%s8048_s20 + $0x8] sm:$0xff]   ;;  %v6013_v14 = vld [vmem:[%s8048_s20 + $0x10] sm:$0xff]  }
 0x3c4   :  { %5685 = vmatprep.subr.bf16.mxu0 %v5994_v10 }
 0x3c6   :  { %5403 = vmatpush3.bf16.msra.mxu1 %v5992_v6  ;;  %v6015_v6 = vld [vmem:[%s8048_s20 + $0x58] sm:$0xff]  }
 0x3c7   :  { %5404 = vmatprep.subr.bf16.mxu1 %v5993_v28  ;;  %5686 = vmatpush3.bf16.msra.mxu0 %v5994_v10  ;;  %v6014_v10 = vld [vmem:[%s8048_s20 + $0x90] sm:$0xff]   ;;  %v6016_v28 = vld [vmem:[%s8048_s20 + $0x18] sm:$0xff]  }
 0x3c8   :  { %5687 = vmatprep.subr.bf16.mxu0 %v5997_v3 }
 0x3ca   :  { %5405 = vmatpush3.bf16.msra.mxu1 %v5995_v27  ;;  %v6018_v27 = vld [vmem:[%s8048_s20 + $0x60] sm:$0xff]  }
 0x3cb   :  { %5406 = vmatprep.subr.bf16.mxu1 %v5996_v0  ;;  %5688 = vmatpush3.bf16.msra.mxu0 %v5997_v3  ;;  %v6017_v3 = vld [vmem:[%s8048_s20 + $0x98] sm:$0xff]   ;;  %v6019_v0 = vld [vmem:[%s8048_s20 + $0x20] sm:$0xff]  }
 0x3cc   :  { %5689 = vmatprep.subr.bf16.mxu0 %v6000_v2 }
 0x3ce   :  { %5407 = vmatpush3.bf16.msra.mxu1 %v5998_v5  ;;  %v6021_v5 = vld [vmem:[%s8048_s20 + $0x68] sm:$0xff]  }
 0x3cf   :  { %5408 = vmatprep.subr.bf16.mxu1 %v5999_v7  ;;  %5690 = vmatpush3.bf16.msra.mxu0 %v6000_v2  ;;  %v6020_v2 = vld [vmem:[%s8048_s20 + $0xa0] sm:$0xff]   ;;  %v6022_v7 = vld [vmem:[%s8048_s20 + $0x28] sm:$0xff]  }
 0x3d0   :  { %5691 = vmatprep.subr.bf16.mxu0 %v6003_v11 }
 0x3d2   :  { %5409 = vmatpush3.bf16.msra.mxu1 %v6001_v26  ;;  %v6025_v26 = vld [vmem:[%s8048_s20 + $0x30] sm:$0xff]  }
 0x3d3   :  { %5410 = vmatprep.subr.bf16.mxu1 %v6002_v18  ;;  %5692 = vmatpush3.bf16.msra.mxu0 %v6003_v11  ;;  %v6024_v11 = vld [vmem:[%s8048_s20 + $0x70] sm:$0xff]   ;;  %v6029_v18 = vld [vmem:[%s8048_s20 + $0xb8] sm:$0xff]  }
 0x3d4   :  { %5693 = vmatprep.subr.bf16.mxu0 %v6005_v34 }
 0x3d6   :  { %5411 = vmatpush3.bf16.msra.mxu1 %v6004_v36 }
 0x3d7   :  { %5694 = vmatpush3.bf16.msra.mxu0 %v6005_v34  ;;  %5434 = vmatprep.subr.bf16.mxu1 %v6006_v1 }
 0x3d8   :  { %5699 = vmatprep.subr.bf16.mxu0 %v6008_v4 }
 0x3d9   :  { %4947 = vmatmul.mubr.msk.bf16.vlgmr.msra.gmra.mrb[48].mxu1 %vm6411_vm4, %v4946_v47 }
 0x3da   :  { %5696 = vmatmul.mubr.msk.bf16.vlgmr.msra.gmra.mrb[44].mxu0 %vm6564_vm14, %v4958_v37  ;;  %2980 = vmatprep.mubr.bf16.mxu1 %v2739_v41 }
 0x3db   :  { %5435 = vmatpush3.bf16.msra.mxu1 %v6007_v61  ;;  %5700 = vmatpush3.bf16.msra.mxu0 %v6008_v4 }
 0x3dc   :  { %5436 = vmatprep.subr.bf16.mxu1 %v6009_v43  ;;  %5701 = vmatprep.subr.bf16.mxu0 %v6011_v22 }
 0x3df   :  { %5437 = vmatpush3.bf16.msra.mxu1 %v6010_v38  ;;  %5702 = vmatpush3.bf16.msra.mxu0 %v6011_v22 }
 0x3e0   :  { %5438 = vmatprep.subr.bf16.mxu1 %v6012_v9  ;;  %5703 = vmatprep.subr.bf16.mxu0 %v6014_v10 }
 0x3e1   :  { %4951 = vmatmul.mubr.msk.bf16.gmra.mrb[52].mxu1 %vm6498_vm9, %v4950_v32 }
 0x3e3   :  { %5439 = vmatpush3.bf16.msra.mxu1 %v6013_v14  ;;  %5704 = vmatpush3.bf16.msra.mxu0 %v6014_v10 }
 0x3e4   :  { %5440 = vmatprep.subr.bf16.mxu1 %v6015_v6  ;;  %5705 = vmatprep.subr.bf16.mxu0 %v6017_v3 }
 0x3e7   :  { %5441 = vmatpush3.bf16.msra.mxu1 %v6016_v28  ;;  %5706 = vmatpush3.bf16.msra.mxu0 %v6017_v3 }
 0x3e8   :  { %5442 = vmatprep.subr.bf16.mxu1 %v6018_v27  ;;  %5707 = vmatprep.subr.bf16.mxu0 %v6020_v2 }
 0x3eb   :  { %5443 = vmatpush3.bf16.msra.mxu1 %v6019_v0  ;;  %5708 = vmatpush3.bf16.msra.mxu0 %v6020_v2 }
 0x3ec   :  { %5444 = vmatprep.subr.bf16.mxu1 %v6021_v5  ;;  %5709 = vmatprep.subr.bf16.mxu0 %v6023_v8  ;;  %v4919_v5 = vld [vmem:[%s8051_s19] ss:$0 sm:$0xff] }
 0x3ef   :  { %5445 = vmatpush3.bf16.msra.mxu1 %v6022_v7  ;;  %5710 = vmatpush3.bf16.msra.mxu0 %v6023_v8 }
 0x3f0   :  { %5446 = vmatprep.subr.bf16.mxu1 %v6024_v11  ;;  %5711 = vmatprep.subr.bf16.mxu0 %v6026_v63 }
 0x3f3   :  { %5447 = vmatpush3.bf16.msra.mxu1 %v6025_v26  ;;  %5712 = vmatpush3.bf16.msra.mxu0 %v6026_v63 }
 0x3f4   :  { %5448 = vmatprep.subr.bf16.mxu1 %v6027_v13  ;;  %5713 = vmatprep.subr.bf16.mxu0 %v6029_v18 }
 0x3f7   :  { %5449 = vmatpush3.bf16.msra.mxu1 %v6028_v24  ;;  %5714 = vmatpush3.bf16.msra.mxu0 %v6029_v18 }
 0x3f8   :  { %5719 = vmatprep.subr.bf16.mxu1 %v7527_v30 }
 0x48c   :  { %v5374_v34 = vpop.f32.mrb[40].mxu1  ;;  %v5677_v36 = vpop.f32.mrb[40].mxu0 }
 0x48d   :  { %v5375_v44 = vpop.f32.mrb[41].mxu1  ;;  %v2674_v19 = vpop.f32.mrb[41].mxu0 }
 0x48e   :  { %v5376_v25 = vadd.f32 %v5375_v44, %v5374_v34  ;;  %v5377_v47 = vpop.f32.mrb[42].mxu1  ;;  %v5678_v37 = vpop.f32.mrb[42].mxu0 }
 0x48f   :  { %v5378_v41 = vpop.f32.mrb[43].mxu1  ;;  %v2677_v45 = vpop.f32.mrb[43].mxu0 }
 0x490   :  { %v2626_v20 = vadd.f32 %v5376_v25, %v4878_v12  ;;  %v5379_v33 = vadd.f32 %v5378_v41, %v5377_v47 }
 0x492   :  { %v7533_v32 = vadd.f32 %v2674_v19, %v2626_v20  ;;  %v2629_v1 = vadd.f32 %v5379_v33, %v4878_v12 }
 0x494   :  { %v7535_v61 = vadd.f32 %v2677_v45, %v2629_v1  ;;  %v5380_v4 = vpop.f32.mrb[44].mxu1 }
 0x495   :  { %v5381_v43 = vpop.f32.mrb[45].mxu1 }
 0x496   :  { %v5382_v38 = vadd.f32 %v5381_v43, %v5380_v4  ;;  %v5383_v22 = vpop.f32.mrb[46].mxu1 }
 0x497   :  { %v5384_v9 = vpop.f32.mrb[47].mxu1 }
 0x498   :  { %v2634_v14 = vadd.f32 %v5382_v38, %v4878_v12  ;;  %v5385_v10 = vadd.f32 %v5384_v9, %v5383_v22 }
 0x49a   :  { %v7537_v6 = vadd.f32 %v5677_v36, %v2634_v14  ;;  %v2637_v28 = vadd.f32 %v5385_v10, %v4878_v12 }
 0x49c   :  { %v7539_v3 = vadd.f32 %v5678_v37, %v2637_v28 }
 0x4ac   :  { %v5412_v27 = vpop.f32.mrb[48].mxu1 }
 0x4ad   :  { %v5413_v0 = vpop.f32.mrb[49].mxu1  ;;  %v5697_v2 = vpop.f32.mrb[44].mxu0 }
 0x4ae   :  { %v5414_v7 = vadd.f32 %v5413_v0, %v5412_v27  ;;  %v5415_v8 = vpop.f32.mrb[50].mxu1  ;;  %v3023_v11 = vpop.f32.mrb[45].mxu0 }
 0x4af   :  { %v5416_v26 = vpop.f32.mrb[51].mxu1  ;;  %v5698_v63 = vpop.f32.mrb[46].mxu0 }
 0x4b0   :  { %v5417_v13 = vadd.f32 %v5416_v26, %v5415_v8  ;;  %v2975_v24 = vadd.f32 %v5414_v7, %v4919_v5  ;;  %v3026_v18 = vpop.f32.mrb[47].mxu0 }
 0x4b2   :  { %v3024_v34 = vadd.f32 %v3023_v11, %v2975_v24  ;;  %v2978_v36 = vadd.f32 %v5417_v13, %v4919_v5 }
 0x4b4   :  { %v3038_v44 = vmax.f32 %v3024_v34, 0.0  ;;  %v3027_v12 = vadd.f32 %v3026_v18, %v2978_v36  ;;  %v5418_v19 = vpop.f32.mrb[52].mxu1 }
 0x4b5   :  { %v5419_v25 = vpop.f32.mrb[53].mxu1 }
 0x4b6   :  { %v3039_v47 = vmax.f32 %v3027_v12, 0.0  ;;  %v5420_v37 = vadd.f32 %v5419_v25, %v5418_v19  ;;  %v5421_v41 = vpop.f32.mrb[54].mxu1  ;;  %v3048_v45 = vrot.slane %v3038_v44, 7  ;;  %v3063_v20 = vrot.slane %v3038_v44, 1 }
 0x4b7   :  { %v5422_v33 = vpop.f32.mrb[55].mxu1 }
 0x4b8   :  { %v3049_v1 = vrot.slane %v3039_v47, 7  ;;  %v3064_v4 = vrot.slane %v3039_v47, 1  ;;  %v2983_v43 = vadd.f32 %v5420_v37, %v4919_v5  ;;  %v5423_v38 = vadd.f32 %v5422_v33, %v5421_v41 }
 0x4b9   :  { %v3081_v22 = vpack.c.bf16 %v3039_v47, %v3038_v44  ;;  %v6031_v47 = vld [vmem:[%s8049_s22 + $0x8] sm:$0xff]  }
 0x4ba   :  { %v3050_v9 = vsel %vm159_vm1, %v3048_v45, %v3049_v1  ;;  %v3032_v14 = vadd.f32 %v5697_v2, %v2983_v43  ;;  %v2986_v10 = vadd.f32 %v5423_v38, %v4919_v5  ;;  %v3065_v28 = vsel %vm198_vm8, %v3063_v20, %v3064_v4  ;;  %v6036_v43 = vld [vmem:[%s8049_s22 + $0x30] sm:$0xff]  }
 0x4bb   :  { %3317 = vmatprep.mubr.bf16.mxu1 %v3081_v22  ;;  %v6037_v22 = vld [vmem:[%s8049_s22 + $0x38] sm:$0xff]  }
 0x4bc   :  { %v3040_v27 = vmax.f32 %v3032_v14, 0.0  ;;  %v3035_v0 = vadd.f32 %v5698_v63, %v2986_v10  ;;  %v4782_v63 = vld [vmem:[%s8052_s13] ss:$0 sm:$0xff]  ;;  %v8071_v10 = vmax.f32 %v7535_v61, 0.0 }
 0x4bd   :  { %v7561_v41 = vadd.f32 %v4782_v63, %v7301_v60  ;;  %v7595_v38 = vadd.f32 %v4782_v63, %v7305_v62 }
 0x4be   :  { %v3051_v7 = vrot.slane %v3040_v27, 7  ;;  %v3066_v8 = vrot.slane %v3040_v27, 1  ;;  %v3041_v11 = vmax.f32 %v3035_v0, 0.0  ;;  %v8073_v0 = vmax.f32 %v7539_v3, 0.0 }
 0x4bf   :  { %v8072_v60 = vmax.f32 %v7561_v41, 0.0  ;;  %v8074_v14 = vmax.f32 %v7595_v38, 0.0 }
 0x4c0   :  { %v3043_v26 = vrot.slane %v3041_v11, 7  ;;  %v3068_v13 = vrot.slane %v3041_v11, 1  ;;  %v3067_v24 = vsel %vm198_vm8, %v3064_v4, %v3066_v8  ;;  %v3084_v18 = vpack.c.bf16 %v3041_v11, %v3040_v27  ;;  %v6035_v4 = vld [vmem:[%s8049_s22 + $0x28] sm:$0xff]   ;;  %v7624_v11 = vld [vmem:[%s8053_s3] sm:$0xff] }
 0x4c1   :  { %v4995_v34 = vpack.c.bf16 %v3067_v24, %v3065_v28  ;;  %v3052_v36 = vsel %vm159_vm1, %v3049_v1, %v3051_v7  ;;  %v6033_v1 = vld [vmem:[%s8049_s22 + $0x18] sm:$0xff]   ;;  %v8075_v27 = vmax.f32 %v7533_v32, 0.0  ;;  %v7636_v24 = vld [vmem:[%s8053_s3 + $0x10] sm:$0xff] }
 0x4c2   :  { %v3058_v44 = vsel %vm159_vm1, %v3043_v26, %v3048_v45  ;;  %v3069_v2 = vsel %vm198_vm8, %v3066_v8, %v3068_v13  ;;  %v3075_v5 = vsel %vm198_vm8, %v3068_v13, %v3063_v20  ;;  %v3053_v12 = vsel %vm159_vm1, %v3051_v7, %v3043_v26  ;;  %v6032_v20 = vld [vmem:[%s8049_s22 + $0x10] sm:$0xff]   ;;  %v7629_v26 = vld [vmem:[%s8053_s3 + $0x8] sm:$0xff] }
 0x4c3   :  { %v4987_v19 = vpack.c.bf16 %v3050_v9, %v3058_v44  ;;  %5715 = vmatprep.mubr.msk.bf16.mxu0 %vm6520_vm11, %v4995_v34  ;;  %v4999_v25 = vpack.c.bf16 %v3075_v5, %v3069_v2  ;;  %v4991_v37 = vpack.c.bf16 %v3053_v12, %v3052_v36  ;;  %v7568_v45 = vadd.f32 %v4782_v63, %v7299_v17  ;;  %v4960_v5 = vld [vmem:[%s8054_s21] ss:$0 sm:$0xff] }
 0x4c4   :  { %v7601_v9 = vadd.f32 %v4782_v63, %v7303_v59  ;;  %v3393_v59 = vpack.c.bf16 %v8071_v10, %v8075_v27  ;;  %v8077_v7 = vmax.f32 %v7537_v6, 0.0  ;;  %v3395_v13 = vpack.c.bf16 %v7629_v26, %v7624_v11 }
 0x4c5   :  { %4988 = vmatmul.mubr.msk.bf16.vlgmr.msra.gmra.mrb[56].mxu1 %vm6411_vm4, %v4987_v19  ;;  %5716 = vmatmul.mubr.msk.bf16.vlgmr.msra.gmra.mrb[48].mxu0 %vm6564_vm14, %v4999_v25  ;;  %v8076_v33 = vmax.f32 %v7568_v45, 0.0 }
 0x4c6   :  { %5720 = vmatpush3.bf16.msra.mxu1 %v7527_v30  ;;  %3325 = vmatprep.mubr.bf16.mxu1 %v3084_v18  ;;  %v6034_v30 = vld [vmem:[%s8049_s22 + $0x20] sm:$0xff]   ;;  %v8078_v28 = vmax.f32 %v7601_v9, 0.0  ;;  %v3394_v8 = vpack.c.bf16 %v8073_v0, %v8077_v7  ;;  %v7641_v18 = vld [vmem:[%s8053_s3 + $0x18] sm:$0xff] }
 0x4c7   :  { %5721 = vmatprep.subr.bf16.mxu1 %v6031_v47  ;;  %v3391_v17 = vpack.c.bf16 %v8072_v60, %v8076_v33  ;;  %v3396_v34 = vpack.c.bf16 %v7641_v18, %v7636_v24 }
 0x4c8   :  { %v3392_v62 = vpack.c.bf16 %v8074_v14, %v8078_v28 }
 0x4ca   :  { %5722 = vmatpush3.bf16.msra.mxu1 %v6031_v47 }
 0x4cb   :  { %5723 = vmatprep.subr.bf16.mxu1 %v6032_v20 }
 0x4cd   :  { %4992 = vmatmul.mubr.msk.bf16.gmra.mrb[60].mxu1 %vm6498_vm9, %v4991_v37 }
 0x4ce   :  { %5724 = vmatpush3.bf16.msra.mxu1 %v6032_v20  ;;  %5735 = vmatprep.mubr.bf16.mxu1 %v3391_v17 }
 0x4cf   :  { %5725 = vmatprep.subr.bf16.mxu1 %v6033_v1 }
 0x4d2   :  { %5726 = vmatpush3.bf16.msra.mxu1 %v6033_v1 }
 0x4d3   :  { %5727 = vmatprep.subr.bf16.mxu1 %v6034_v30 }
 0x4d6   :  { %5728 = vmatpush3.bf16.msra.mxu1 %v6034_v30 }
 0x4d7   :  { %5729 = vmatprep.subr.bf16.mxu1 %v6035_v4 }
 0x4da   :  { %5730 = vmatpush3.bf16.msra.mxu1 %v6035_v4 }
 0x4db   :  { %5731 = vmatprep.subr.bf16.mxu1 %v6036_v43 }
 0x4de   :  { %5732 = vmatpush3.bf16.msra.mxu1 %v6036_v43 }
 0x4df   :  { %5733 = vmatprep.subr.bf16.mxu1 %v6037_v22 }
 0x4e2   :  { %5734 = vmatpush3.bf16.msra.mxu1 %v6037_v22 }
 0x4e5   :  { %5736 = vmatmul.mubr.bf16.vlgmr.msra.gmra.mrb[64].mxu1 %v3392_v62 }
 0x4e6   :  { %5739 = vmatprep.mubr.bf16.mxu1 %v3393_v59 }
 0x4ed   :  { %5740 = vmatmul.mubr.bf16.gmra.mrb[68].mxu1 %v3394_v8 }
 0x4ee   :  { %5743 = vmatprep.mubr.bf16.mxu1 %v3395_v13 }
 0x4f5   :  { %5744 = vmatmul.mubr.bf16.gmra.mrb[72].mxu1 %v3396_v34 }
 0x598   :  { %v5450_v36 = vpop.f32.mrb[56].mxu1  ;;  %v5717_v44 = vpop.f32.mrb[48].mxu0 }
 0x599   :  { %v5451_v2 = vpop.f32.mrb[57].mxu1  ;;  %v3368_v12 = vpop.f32.mrb[49].mxu0 }
 0x59a   :  { %v5452_v63 = vadd.f32 %v5451_v2, %v5450_v36  ;;  %v5453_v19 = vpop.f32.mrb[58].mxu1  ;;  %v5718_v25 = vpop.f32.mrb[50].mxu0 }
 0x59b   :  { %v5454_v47 = vpop.f32.mrb[59].mxu1  ;;  %v3371_v37 = vpop.f32.mrb[51].mxu0 }
 0x59c   :  { %v3320_v20 = vadd.f32 %v5452_v63, %v4960_v5  ;;  %v5455_v1 = vadd.f32 %v5454_v47, %v5453_v19 }
 0x59e   :  { %v7648_v17 = vadd.f32 %v3368_v12, %v3320_v20  ;;  %v3323_v30 = vadd.f32 %v5455_v1, %v4960_v5 }
 0x5a0   :  { %v7650_v4 = vadd.f32 %v3371_v37, %v3323_v30  ;;  %v5456_v43 = vpop.f32.mrb[60].mxu1  ;;  %v8069_v62 = vmax.f32 %v7648_v17, 0.0 }
 0x5a1   :  { %v5457_v22 = vpop.f32.mrb[61].mxu1 }
 0x5a2   :  { %v8067_v59 = vmax.f32 %v7650_v4, 0.0  ;;  %v5458_v8 = vadd.f32 %v5457_v22, %v5456_v43  ;;  %v5459_v13 = vpop.f32.mrb[62].mxu1 }
 0x5a3   :  { %v5460_v34 = vpop.f32.mrb[63].mxu1 }
 0x5a4   :  { %v3397_v36 = vpack.c.bf16 %v8067_v59, %v8069_v62  ;;  %v3328_v2 = vadd.f32 %v5458_v8, %v4960_v5  ;;  %v5461_v12 = vadd.f32 %v5460_v34, %v5459_v13 }
 0x5a6   :  { %v7658_v63 = vadd.f32 %v5717_v44, %v3328_v2  ;;  %v3331_v19 = vadd.f32 %v5461_v12, %v4960_v5  ;;  %5747 = vmatprep.mubr.bf16.mxu1 %v3397_v36 }
 0x5a8   :  { %v7660_v47 = vadd.f32 %v5718_v25, %v3331_v19  ;;  %v8070_v37 = vmax.f32 %v7658_v63, 0.0 }
 0x5aa   :  { %v8068_v20 = vmax.f32 %v7660_v47, 0.0 }
 0x5ac   :  { %v3398_v1 = vpack.c.bf16 %v8068_v20, %v8070_v37 }
 0x5ae   :  { %5748 = vmatmul.mubr.bf16.gmra.mrb[76].mxu1 %v3398_v1  ;;  %v6038_v1 = vld [vmem:[%s8055_s23] sm:$0xff]  }
 0x5af   :  { %4395 = vmatprep.mubr.bf16.mxu1 %v3921_v31  ;;  %5751 = vmatprep.subr.bf16.mxu0 %v6038_v1 }
 0x5b0   :  { %5752 = vmatpush3.bf16.msra.mxu0 %v6038_v1 }
 0x5b8   :  { %v5737_v44 = vpop.f32.mrb[64].mxu1 }
 0x5b9   :  { %v3497_v30 = vpop.f32.mrb[65].mxu1 }
 0x5ba   :  { %v7671_v5 = vpop.f32.mrb[66].mxu1 }
 0x5bb   :  { %v7673_v25 = vpop.f32.mrb[67].mxu1 }
 0x5c0   :  { %v5741_v43 = vpop.f32.mrb[68].mxu1 }
 0x5c1   :  { %v3562_v22 = vmax.f32 %v5737_v44, %v5741_v43  ;;  %v3513_v8 = vpop.f32.mrb[69].mxu1 }
 0x5c2   :  { %v3560_v13 = vmax.f32 %v3497_v30, %v3513_v8  ;;  %v7675_v34 = vpop.f32.mrb[70].mxu1 }
 0x5c3   :  { %v3563_v36 = vmax.f32 %v7671_v5, %v7675_v34  ;;  %v7679_v2 = vpop.f32.mrb[71].mxu1 }
 0x5c4   :  { %v3561_v15 = vmax.f32 %v7673_v25, %v7679_v2 }
 0x5c8   :  { %v5745_v21 = vpop.f32.mrb[72].mxu1 }
 0x5c9   :  { %v3529_v31 = vpop.f32.mrb[73].mxu1 }
 0x5ca   :  { %v5746_v12 = vpop.f32.mrb[74].mxu1 }
 0x5cb   :  { %v7683_v19 = vpop.f32.mrb[75].mxu1 }
 0x681   :  { %v5749_v58 = vpop.f32.mrb[76].mxu1 }
 0x682   :  { %v3566_v54 = vmax.f32 %v5745_v21, %v5749_v58  ;;  %v3545_v56 = vpop.f32.mrb[77].mxu1 }
 0x683   :  { %v3564_v48 = vmax.f32 %v3529_v31, %v3545_v56  ;;  %v5750_v59 = vpop.f32.mrb[78].mxu1 }
 0x684   :  { %v3570_v20 = vmax.f32 %v3562_v22, %v3566_v54  ;;  %v3567_v62 = vmax.f32 %v5746_v12, %v5750_v59  ;;  %v7688_v37 = vpop.f32.mrb[79].mxu1 }
 0x685   :  { %v3568_v10 = vmax.f32 %v3560_v13, %v3564_v48  ;;  %v3565_v60 = vmax.f32 %v7683_v19, %v7688_v37 }
 0x686   :  { %v3574_v0 = vmax.f32 %v3570_v20, 0.0  ;;  %v3571_v14 = vmax.f32 %v3563_v36, %v3567_v62 }
 0x687   :  { %v3572_v27 = vmax.f32 %v3568_v10, 0.0  ;;  %v3569_v33 = vmax.f32 %v3561_v15, %v3565_v60 }
 0x688   :  { %v3578_v7 = vsub.f32 %v5737_v44, %v3574_v0  ;;  %v3590_v28 = vsub.f32 %v5741_v43, %v3574_v0  ;;  %v3602_v1 = vsub.f32 %v5745_v21, %v3574_v0  ;;  %v3614_v49 = vsub.f32 %v5749_v58, %v3574_v0 }
 0x689   :  { %v3638_v53 = vsub.f32 0.0, %v3574_v0  ;;  %v3576_v55 = vsub.f32 %v3497_v30, %v3572_v27  ;;  %v3588_v57 = vsub.f32 %v3513_v8, %v3572_v27  ;;  %v3600_v29 = vsub.f32 %v3529_v31, %v3572_v27 }
 0x68a   :  { %v3584_v54 = vmul.f32 1.442695, %v3578_v7  ;;  %v3596_v22 = vmul.f32 1.442695, %v3590_v28  ;;  %v3608_v40 = vmul.f32 1.442695, %v3602_v1  ;;  %v3612_v51 = vsub.f32 %v3545_v56, %v3572_v27 }
 0x68b   :  { %v3620_v48 = vmul.f32 1.442695, %v3614_v49  ;;  %v3644_v13 = vmul.f32 1.442695, %v3638_v53  ;;  %v3580_v16 = vmul.f32 1.442695, %v3576_v55 }
 0x68c   :  { %6087 = vpow2.f32 %v3584_v54  ;;  %v3636_v62 = vsub.f32 0.0, %v3572_v27  ;;  %v3575_v10 = vmax.f32 %v3571_v14, 0.0  ;;  %v3573_v60 = vmax.f32 %v3569_v33, 0.0 }
 0x68d   :  { %6089 = vpow2.f32 %v3596_v22  ;;  %v3592_v20 = vmul.f32 1.442695, %v3588_v57  ;;  %v3604_v58 = vmul.f32 1.442695, %v3600_v29  ;;  %v3616_v28 = vmul.f32 1.442695, %v3612_v51 }
 0x68e   :  { %6091 = vpow2.f32 %v3608_v40  ;;  %v3579_v0 = vsub.f32 %v7671_v5, %v3575_v10  ;;  %v3591_v44 = vsub.f32 %v7675_v34, %v3575_v10  ;;  %v3603_v7 = vsub.f32 %v5746_v12, %v3575_v10 }
 0x68f   :  { %6093 = vpow2.f32 %v3620_v48  ;;  %v3615_v56 = vsub.f32 %v5750_v59, %v3575_v10  ;;  %v3640_v49 = vmul.f32 1.442695, %v3636_v62  ;;  %v3577_v53 = vsub.f32 %v7673_v25, %v3573_v60 }
 0x690   :  { %6095 = vpow2.f32 %v3644_v13  ;;  %v3586_v55 = vmul.f32 1.442695, %v3579_v0  ;;  %v3639_v14 = vsub.f32 0.0, %v3575_v10  ;;  %v3598_v40 = vmul.f32 1.442695, %v3591_v44 }
 0x691   :  { %6097 = vpow2.f32 %v3580_v16  ;;  %v3589_v57 = vsub.f32 %v7679_v2, %v3573_v60  ;;  %v3601_v29 = vsub.f32 %v7683_v19, %v3573_v60  ;;  %v3610_v33 = vmul.f32 1.442695, %v3603_v7 }
 0x692   :  { %6099 = vpow2.f32 %v3592_v20  ;;  %v3613_v27 = vsub.f32 %v7688_v37, %v3573_v60  ;;  %v3622_v51 = vmul.f32 1.442695, %v3615_v56  ;;  %v3646_v16 = vmul.f32 1.442695, %v3639_v14 }
 0x693   :  { %6101 = vpow2.f32 %v3604_v58  ;;  %v3582_v5 = vmul.f32 1.442695, %v3577_v53  ;;  %v3637_v25 = vsub.f32 0.0, %v3573_v60  ;;  %v3594_v34 = vmul.f32 1.442695, %v3589_v57 }
 0x694   :  { %6103 = vpow2.f32 %v3616_v28  ;;  %v3606_v2 = vmul.f32 1.442695, %v3601_v29  ;;  %v3618_v37 = vmul.f32 1.442695, %v3613_v27 }
 0x695   :  { %6105 = vpow2.f32 %v3640_v49  ;;  %v3642_v12 = vmul.f32 1.442695, %v3637_v25 }
 0x696   :  { %v6088_v59 = vpop.eup %6087  ;;  %6107 = vpow2.f32 %v3586_v55 }
 0x697   :  { %v6090_v30 = vpop.eup %6089  ;;  %6109 = vpow2.f32 %v3598_v40 }
 0x698   :  { %v6092_v43 = vpop.eup %6091  ;;  %v3626_v8 = vadd.f32 %v6090_v30, %v6088_v59  ;;  %6111 = vpow2.f32 %v3610_v33 }
 0x699   :  { %v6094_v36 = vpop.eup %6093  ;;  %6113 = vpow2.f32 %v3622_v51 }
 0x69a   :  { %v6096_v15 = vpop.eup %6095  ;;  %v3630_v21 = vadd.f32 %v6092_v43, %v3626_v8  ;;  %6115 = vpow2.f32 %v3646_v16 }
 0x69b   :  { %v6098_v31 = vpop.eup %6097  ;;  %6117 = vpow2.f32 %v3582_v5  ;;  %v3650_v54 = vmul.f32 1e-05, %v6096_v15 }
 0x69c   :  { %v6100_v19 = vpop.eup %6099  ;;  %v3634_v1 = vadd.f32 %v6094_v36, %v3630_v21  ;;  %6119 = vpow2.f32 %v3594_v34 }
 0x69d   :  { %v6102_v22 = vpop.eup %6101  ;;  %v3624_v48 = vadd.f32 %v6100_v19, %v6098_v31  ;;  %6121 = vpow2.f32 %v3606_v2 }
 0x69e   :  { %v6104_v13 = vpop.eup %6103  ;;  %v3654_v62 = vadd.f32 %v3650_v54, %v3634_v1  ;;  %6123 = vpow2.f32 %v3618_v37 }
 0x69f   :  { %v6106_v10 = vpop.eup %6105  ;;  %v3628_v60 = vadd.f32 %v6102_v22, %v3624_v48  ;;  %6125 = vpow2.f32 %v3642_v12 }
 0x6a0   :  { %v6108_v20 = vpop.eup %6107  ;;  %6127 = vrcp.f32 %v3654_v62  ;;  %v3648_v44 = vmul.f32 1e-05, %v6106_v10 }
 0x6a1   :  { %v6110_v58 = vpop.eup %6109  ;;  %v3632_v0 = vadd.f32 %v6104_v13, %v3628_v60 }
 0x6a2   :  { %v6112_v28 = vpop.eup %6111  ;;  %v3627_v7 = vadd.f32 %v6110_v58, %v6108_v20 }
 0x6a3   :  { %v6114_v56 = vpop.eup %6113  ;;  %v3652_v49 = vadd.f32 %v3648_v44, %v3632_v0 }
 0x6a4   :  { %v6116_v53 = vpop.eup %6115  ;;  %v3631_v55 = vadd.f32 %v6112_v28, %v3627_v7 }
 0x6a5   :  { %v6118_v14 = vpop.eup %6117  ;;  %6129 = vrcp.f32 %v3652_v49  ;;  %v3651_v29 = vmul.f32 1e-05, %v6116_v53 }
 0x6a6   :  { %v6120_v40 = vpop.eup %6119  ;;  %v3635_v57 = vadd.f32 %v6114_v56, %v3631_v55 }
 0x6a7   :  { %v6122_v33 = vpop.eup %6121  ;;  %v3625_v27 = vadd.f32 %v6120_v40, %v6118_v14 }
 0x6a8   :  { %v6124_v51 = vpop.eup %6123  ;;  %v3655_v16 = vadd.f32 %v3651_v29, %v3635_v57 }
 0x6a9   :  { %v6126_v5 = vpop.eup %6125  ;;  %v3629_v25 = vadd.f32 %v6122_v33, %v3625_v27 }
 0x6aa   :  { %v6128_v8 = vpop.eup %6127  ;;  %6131 = vrcp.f32 %v3655_v16  ;;  %v3649_v34 = vmul.f32 1e-05, %v6126_v5 }
 0x6ab   :  { %v3633_v2 = vadd.f32 %v6124_v51, %v3629_v25  ;;  %v3662_v15 = vmul.f32 %v6128_v8, %v6088_v59  ;;  %v3666_v21 = vmul.f32 %v6128_v8, %v6090_v30  ;;  %v3670_v37 = vmul.f32 %v6128_v8, %v6092_v43  ;;  %v6049_v25 = vld [vmem:[%s8056_s9 + $0x50] sm:$0xff]  }
 0x6ac   :  { %v3674_v12 = vmul.f32 %v6128_v8, %v6094_v36  ;;  %v6050_v8 = vld [vmem:[%s8056_s9 + $0x10] sm:$0xff]  }
 0x6ad   :  { %v3653_v1 = vadd.f32 %v3649_v34, %v3633_v2  ;;  %v6051_v34 = vld [vmem:[%s8056_s9 + $0xd8] sm:$0xff]  }
 0x6ae   :  { %v6052_v2 = vld [vmem:[%s8056_s9 + $0x98] sm:$0xff]  }
 0x6af   :  { %v6130_v54 = vpop.eup %6129  ;;  %6133 = vrcp.f32 %v3653_v1  ;;  %v6057_v1 = vld [vmem:[%s8056_s9 + $0x60] sm:$0xff]  }
 0x6b0   :  { %v3660_v48 = vmul.f32 %v6130_v54, %v6098_v31  ;;  %v3664_v62 = vmul.f32 %v6130_v54, %v6100_v19  ;;  %v3668_v10 = vmul.f32 %v6130_v54, %v6102_v22  ;;  %v3672_v60 = vmul.f32 %v6130_v54, %v6104_v13  ;;  %v6058_v54 = vld [vmem:[%s8056_s9 + $0x20] sm:$0xff]  }
 0x6b1   :  { %v8130_v13 = vpack.c.bf16 %v6898_v39, %v6920_v52  ;;  %v6042_v39 = vld [vmem:[%s8056_s9] sm:$0xff]   ;;  %v6043_v52 = vld [vmem:[%s8056_s9 + $0xc8] sm:$0xff]  }
 0x6b4   :  { %v6132_v0 = vpop.eup %6131 }
 0x6b5   :  { %v3663_v44 = vmul.f32 %v6132_v0, %v6108_v20  ;;  %v3667_v7 = vmul.f32 %v6132_v0, %v6110_v58  ;;  %v3671_v49 = vmul.f32 %v6132_v0, %v6112_v28  ;;  %v3675_v53 = vmul.f32 %v6132_v0, %v6114_v56  ;;  %v6039_v20 = vld [vmem:[%s8056_s9 + $0xc0] sm:$0xff]   ;;  %v6044_v56 = vld [vmem:[%s8056_s9 + $0x88] sm:$0xff]   ;;  %v6063_v0 = vld [vmem:[%s8056_s9 + $0xf0] sm:$0xff]  }
 0x6b6   :  { %v6040_v58 = vld [vmem:[%s8056_s9 + $0x80] sm:$0xff]   ;;  %5525 = vmatprep.subr.bf16.mxu1 %v6039_v20 }
 0x6b7   :  { %v3677_v55 = vpack.c.bf16 %v3663_v44, %v3662_v15  ;;  %v3679_v57 = vpack.c.bf16 %v3667_v7, %v3666_v21  ;;  %v3681_v29 = vpack.c.bf16 %v3671_v49, %v3670_v37  ;;  %v3683_v27 = vpack.c.bf16 %v3675_v53, %v3674_v12  ;;  %v6041_v28 = vld [vmem:[%s8056_s9 + $0x40] sm:$0xff]   ;;  %5526 = vmatpush3.bf16.msra.mxu1 %v6040_v58  ;;  %v6053_v15 = vld [vmem:[%s8056_s9 + $0x58] sm:$0xff]   ;;  %v6064_v44 = vld [vmem:[%s8056_s9 + $0xb0] sm:$0xff]  }
 0x6b8   :  { %5497 = vmatprep.subr.bf16.mxu0 %v6041_v28  ;;  %5527 = vmatprep.subr.bf16.mxu1 %v6043_v52  ;;  %v6054_v21 = vld [vmem:[%s8056_s9 + $0x18] sm:$0xff]   ;;  %v6055_v37 = vld [vmem:[%s8056_s9 + $0xe0] sm:$0xff]   ;;  %v6065_v7 = vld [vmem:[%s8056_s9 + $0x70] sm:$0xff]   ;;  %v8133_v58 = vmax.f32 %v7568_v45, 0.0 }
 0x6b9   :  { %v6134_v59 = vpop.eup %6133  ;;  %v6056_v12 = vld [vmem:[%s8056_s9 + $0xa0] sm:$0xff]   ;;  %v6066_v49 = vld [vmem:[%s8056_s9 + $0x30] sm:$0xff]   ;;  %v6067_v53 = vld [vmem:[%s8056_s9 + $0xf8] sm:$0xff]  }
 0x6ba   :  { %v3661_v30 = vmul.f32 %v6134_v59, %v6118_v14  ;;  %v3665_v43 = vmul.f32 %v6134_v59, %v6120_v40  ;;  %v3669_v36 = vmul.f32 %v6134_v59, %v6122_v33  ;;  %v3673_v16 = vmul.f32 %v6134_v59, %v6124_v51  ;;  %v6045_v14 = vld [vmem:[%s8056_s9 + $0x48] sm:$0xff]   ;;  %v6047_v33 = vld [vmem:[%s8056_s9 + $0xd0] sm:$0xff]   ;;  %v6135_v59 = vld [vmem:[%s8119_s12 + $0x40] sm:$0xff]  }
 0x6bb   :  { %5528 = vmatpush3.bf16.msra.mxu1 %v6044_v56  ;;  %v6046_v40 = vld [vmem:[%s8056_s9 + $0x8] sm:$0xff]   ;;  %v6048_v51 = vld [vmem:[%s8056_s9 + $0x90] sm:$0xff]  }
 0x6bc   :  { %v3676_v5 = vpack.c.bf16 %v3661_v30, %v3660_v48  ;;  %v3678_v31 = vpack.c.bf16 %v3665_v43, %v3664_v62  ;;  %v3680_v19 = vpack.c.bf16 %v3669_v36, %v3668_v10  ;;  %v3682_v22 = vpack.c.bf16 %v3673_v16, %v3672_v60  ;;  %5529 = vmatprep.subr.bf16.mxu1 %v6047_v33  ;;  %v6059_v48 = vld [vmem:[%s8056_s9 + $0xe8] sm:$0xff]  }
 0x6bd   :  { %v6060_v62 = vld [vmem:[%s8056_s9 + $0xa8] sm:$0xff]  }
 0x6be   :  { %5753 = vmatprep.mubr.msk.bf16.mxu0 %vm3692_vm0, %v3676_v5  ;;  %v6061_v10 = vld [vmem:[%s8056_s9 + $0x68] sm:$0xff]  }
 0x6bf   :  { %5754 = vmatmul.mubr.msk.bf16.vlgmr.msra.gmra.mrb[52].mxu0 %vm3692_vm0, %v3677_v55  ;;  %5530 = vmatpush3.bf16.msra.mxu1 %v6048_v51  ;;  %v6062_v60 = vld [vmem:[%s8056_s9 + $0x28] sm:$0xff]   ;;  %v6068_v55 = vld [vmem:[%s8056_s9 + $0xb8] sm:$0xff]   ;;  %v8136_v51 = vmax.f32 %v7539_v3, 0.0 }
 0x6c0   :  { %5757 = vmatprep.mubr.msk.bf16.mxu0 %vm3692_vm0, %v3678_v31  ;;  %5498 = vmatpush3.bf16.msra.mxu0 %v6042_v39  ;;  %v8131_v31 = vmax.f32 %v7601_v9, 0.0  ;;  %v8134_v39 = vmax.f32 %v7533_v32, 0.0 }
 0x6c1   :  { %5499 = vmatprep.subr.bf16.mxu0 %v6045_v14  ;;  %5531 = vmatprep.subr.bf16.mxu1 %v6051_v34  ;;  %v8135_v14 = vmax.f32 %v7595_v38, 0.0 }
 0x6c3   :  { %5532 = vmatpush3.bf16.msra.mxu1 %v6052_v2  ;;  %v8138_v2 = vmax.f32 %v7535_v61, 0.0 }
 0x6c4   :  { %5500 = vmatpush3.bf16.msra.mxu0 %v6046_v40  ;;  %5533 = vmatprep.subr.bf16.mxu1 %v6055_v37 }
 0x6c5   :  { %5501 = vmatprep.subr.bf16.mxu0 %v6049_v25 }
 0x6c7   :  { %5758 = vmatmul.mubr.msk.bf16.gmra.mrb[56].mxu0 %vm3692_vm0, %v3679_v57  ;;  %5534 = vmatpush3.bf16.msra.mxu1 %v6056_v12  ;;  %v6069_v57 = vld [vmem:[%s8056_s9 + $0x78] sm:$0xff]  }
 0x6c8   :  { %5761 = vmatprep.mubr.msk.bf16.mxu0 %vm3692_vm0, %v3680_v19  ;;  %5502 = vmatpush3.bf16.msra.mxu0 %v6050_v8  ;;  %v8137_v8 = vmax.f32 %v7561_v41, 0.0 }
 0x6c9   :  { %5503 = vmatprep.subr.bf16.mxu0 %v6053_v15  ;;  %5535 = vmatprep.subr.bf16.mxu1 %v6059_v48 }
 0x6cb   :  { %5536 = vmatpush3.bf16.msra.mxu1 %v6060_v62 }
 0x6cc   :  { %5504 = vmatpush3.bf16.msra.mxu0 %v6054_v21  ;;  %5537 = vmatprep.subr.bf16.mxu1 %v6063_v0  ;;  %v8139_v0 = vmax.f32 %v7658_v63, 0.0 }
 0x6cd   :  { %5505 = vmatprep.subr.bf16.mxu0 %v6057_v1 }
 0x6cf   :  { %5762 = vmatmul.mubr.msk.bf16.gmra.mrb[60].mxu0 %vm3692_vm0, %v3681_v29  ;;  %5538 = vmatpush3.bf16.msra.mxu1 %v6064_v44  ;;  %v6070_v29 = vld [vmem:[%s8056_s9 + $0x38] sm:$0xff]  }
 0x6d0   :  { %5765 = vmatprep.mubr.msk.bf16.mxu0 %vm3692_vm0, %v3682_v22  ;;  %5506 = vmatpush3.bf16.msra.mxu0 %v6058_v54  ;;  %v8132_v22 = vmax.f32 %v7537_v6, 0.0 }
 0x6d1   :  { %5507 = vmatprep.subr.bf16.mxu0 %v6061_v10  ;;  %5539 = vmatprep.subr.bf16.mxu1 %v6067_v53 }
 0x6d3   :  { %5540 = vmatpush3.bf16.msra.mxu1 %v6068_v55  ;;  %v8141_v55 = vmax.f32 %v7660_v47, 0.0 }
 0x6d4   :  { %5508 = vmatpush3.bf16.msra.mxu0 %v6062_v60  ;;  %5581 = vmatprep.subr.bf16.mxu1 %v6135_v59 }
 0x6d5   :  { %5509 = vmatprep.subr.bf16.mxu0 %v6065_v7 }
 0x6d7   :  { %5766 = vmatmul.mubr.msk.bf16.gmra.mrb[64].mxu0 %vm3692_vm0, %v3683_v27  ;;  %v6071_v27 = vld [vmem:[%s8056_s9 + $0x140] sm:$0xff]  }
 0x6d8   :  { %5069 = vmatprep.mubr.msk.bf16.mxu0 %vm6411_vm4, %v8130_v13  ;;  %5510 = vmatpush3.bf16.msra.mxu0 %v6066_v49 }
 0x6d9   :  { %5511 = vmatprep.subr.bf16.mxu0 %v6069_v57 }
 0x6dc   :  { %5512 = vmatpush3.bf16.msra.mxu0 %v6070_v29 }
 0x6dd   :  { %5553 = vmatprep.subr.bf16.mxu0 %v6071_v27  ;;  %v8142_v27 = vmax.f32 %v7650_v4, 0.0 }
 0x792   :  { %v5755_v30 = vpop.f32.mrb[52].mxu0 }
 0x793   :  { %v3751_v43 = vpop.f32.mrb[53].mxu0  ;;  %v3816_v19 = vmul.f32 %v5755_v30, %v8131_v31 }
 0x794   :  { %v5756_v36 = vpop.f32.mrb[54].mxu0  ;;  %v3814_v28 = vmul.f32 %v3751_v43, %v8133_v58 }
 0x795   :  { %v3754_v16 = vpop.f32.mrb[55].mxu0  ;;  %v3817_v40 = vmul.f32 %v5756_v36, %v8135_v14 }
 0x796   :  { %v3815_v6 = vmul.f32 %v3754_v16, %v8137_v8 }
 0x79a   :  { %v5759_v5 = vpop.f32.mrb[56].mxu0 }
 0x79b   :  { %v3820_v13 = vmul.f32 %v5759_v5, %v8132_v22  ;;  %v3767_v20 = vpop.f32.mrb[57].mxu0 }
 0x79c   :  { %v3818_v52 = vmul.f32 %v3767_v20, %v8134_v39  ;;  %v5760_v56 = vpop.f32.mrb[58].mxu0 }
 0x79d   :  { %v3832_v33 = vadd.f32 %v3820_v13, %v3816_v19  ;;  %v3821_v25 = vmul.f32 %v5760_v56, %v8136_v51  ;;  %v3770_v9 = vpop.f32.mrb[59].mxu0  ;;  %v6072_v56 = vld [vmem:[%s8056_s9 + $0x100] sm:$0xff]   ;;  %v8143_v51 = vpack.c.bf16 %v6907_v46, %v6903_v23  ;;  %v6137_v23 = vld [vmem:[%s8119_s12 + $0x48] sm:$0xff]   ;;  %v8144_v46 = vpack.c.bf16 %v6923_v35, %v6914_v50  ;;  %v6139_v50 = vld [vmem:[%s8119_s12 + $0x50] sm:$0xff]  }
 0x79e   :  { %v3830_v34 = vadd.f32 %v3818_v52, %v3814_v28  ;;  %v3819_v45 = vmul.f32 %v3770_v9, %v8138_v2  ;;  %v6074_v2 = vld [vmem:[%s8056_s9 + $0x108] sm:$0xff]   ;;  %v6076_v35 = vld [vmem:[%s8056_s9 + $0x110] sm:$0xff]  }
 0x79f   :  { %v3833_v15 = vadd.f32 %v3821_v25, %v3817_v40  ;;  %v6073_v25 = vld [vmem:[%s8056_s9 + $0x148] sm:$0xff]  }
 0x7a0   :  { %v3831_v21 = vadd.f32 %v3819_v45, %v3815_v6  ;;  %v6136_v6 = vld [vmem:[%s8119_s12] sm:$0xff]   ;;  %v6075_v45 = vld [vmem:[%s8056_s9 + $0x150] sm:$0xff]  }
 0x7a2   :  { %v5763_v32 = vpop.f32.mrb[60].mxu0 }
 0x7a3   :  { %v3824_v37 = vmul.f32 %v5763_v32, %v7636_v24  ;;  %v3783_v12 = vpop.f32.mrb[61].mxu0  ;;  %v8140_v24 = vmax.f32 %v7648_v17, 0.0  ;;  %v6140_v32 = vld [vmem:[%s8119_s12 + $0x10] sm:$0xff]  }
 0x7a4   :  { %v3822_v38 = vmul.f32 %v3783_v12, %v7624_v11  ;;  %v5764_v1 = vpop.f32.mrb[62].mxu0  ;;  %v8146_v12 = vld [vmem:[#allocation6_spill] sm:$0xff] }
 0x7a5   :  { %v3836_v54 = vadd.f32 %v3832_v33, %v3824_v37  ;;  %v3825_v3 = vmul.f32 %v5764_v1, %v7641_v18  ;;  %v3786_v48 = vpop.f32.mrb[63].mxu0  ;;  %v6141_v37 = vld [vmem:[%s8119_s12 + $0x58] sm:$0xff]  }
 0x7a6   :  { %v3834_v62 = vadd.f32 %v3830_v34, %v3822_v38  ;;  %v3823_v41 = vmul.f32 %v3786_v48, %v7629_v26  ;;  %v8147_v38 = vld [vmem:[#allocation5_spill] sm:$0xff]  ;;  %v6079_v48 = vld [vmem:[%s8056_s9 + $0x160] sm:$0xff]  }
 0x7a7   :  { %v3837_v10 = vadd.f32 %v3833_v15, %v3825_v3  ;;  %v6138_v15 = vld [vmem:[%s8119_s12 + $0x8] sm:$0xff]   ;;  %v8148_v1 = vpack.c.bf16 %v8146_v12, %v8147_v38  ;;  %v6078_v3 = vld [vmem:[%s8056_s9 + $0x118] sm:$0xff]  }
 0x7a8   :  { %v3835_v60 = vadd.f32 %v3831_v21, %v3823_v41  ;;  %v6077_v21 = vld [vmem:[%s8056_s9 + $0x158] sm:$0xff]   ;;  %v6143_v41 = vld [vmem:[%s8119_s12 + $0x60] sm:$0xff]  }
 0x7aa   :  { %v5767_v61 = vpop.f32.mrb[64].mxu0 }
 0x7ab   :  { %v3828_v44 = vmul.f32 %v5767_v61, %v8139_v0  ;;  %v3799_v7 = vpop.f32.mrb[65].mxu0  ;;  %v6144_v61 = vld [vmem:[%s8119_s12 + $0x20] sm:$0xff]   ;;  %v6145_v0 = vld [vmem:[%s8119_s12 + $0x68] sm:$0xff]  }
 0x7ac   :  { %v3826_v49 = vmul.f32 %v3799_v7, %v8140_v24  ;;  %v5768_v53 = vpop.f32.mrb[66].mxu0  ;;  %v6083_v7 = vld [vmem:[%s8056_s9 + $0x170] sm:$0xff]   ;;  %v6146_v24 = vld [vmem:[%s8119_s12 + $0x28] sm:$0xff]  }
 0x7ad   :  { %v3840_v11 = vadd.f32 %v3836_v54, %v3828_v44  ;;  %v3829_v57 = vmul.f32 %v5768_v53, %v8141_v55  ;;  %v3802_v18 = vpop.f32.mrb[67].mxu0  ;;  %v6082_v44 = vld [vmem:[%s8056_s9 + $0x128] sm:$0xff]   ;;  %v6084_v53 = vld [vmem:[%s8056_s9 + $0x130] sm:$0xff]  }
 0x7ae   :  { %v3838_v29 = vadd.f32 %v3834_v62, %v3826_v49  ;;  %v3827_v26 = vmul.f32 %v3802_v18, %v8142_v27  ;;  %v6142_v62 = vld [vmem:[%s8119_s12 + $0x18] sm:$0xff]   ;;  %v6147_v49 = vld [vmem:[%s8119_s12 + $0x70] sm:$0xff]   ;;  %v6151_v27 = vld [vmem:[%s8119_s12 + $0x80] sm:$0xff]  }
 0x7af   :  { %v3841_v59 = vadd.f32 %v3837_v10, %v3829_v57  ;;  %v3860_v30 = vrot.slane %v3840_v11, 7  ;;  %v3890_v16 = vrot.slane %v3840_v11, 1  ;;  %v6080_v10 = vld [vmem:[%s8056_s9 + $0x120] sm:$0xff]   ;;  %v6148_v55 = vld [vmem:[%s8119_s12 + $0x30] sm:$0xff]   ;;  %v6149_v57 = vld [vmem:[%s8119_s12 + $0x78] sm:$0xff]  }
 0x7b0   :  { %v3854_v43 = vrot.slane %v3838_v29, 7  ;;  %v3884_v36 = vrot.slane %v3838_v29, 1  ;;  %v3839_v63 = vadd.f32 %v3835_v60, %v3827_v26  ;;  %v6081_v60 = vld [vmem:[%s8056_s9 + $0x168] sm:$0xff]   ;;  %v6086_v18 = vld [vmem:[%s8056_s9 + $0x138] sm:$0xff]   ;;  %v8150_v26 = vld [vmem:[#allocation8_spill] sm:$0xff] }
 0x7b1   :  { %v3844_v5 = vrot.slane %v3841_v59, 7  ;;  %v3894_v31 = vrot.slane %v3841_v59, 1  ;;  %v3926_v17 = vpack.c.bf16 %v3841_v59, %v3840_v11  ;;  %v6085_v11 = vld [vmem:[%s8056_s9 + $0x178] sm:$0xff]   ;;  %v8151_v59 = vld [vmem:[#allocation7_spill] sm:$0xff] }
 0x7b2   :  { %v3856_v19 = vrot.slane %v3839_v63, 7  ;;  %v3885_v22 = vrot.slane %v3839_v63, 1  ;;  %v3920_v13 = vpack.c.bf16 %v3839_v63, %v3838_v29  ;;  %v6150_v29 = vld [vmem:[%s8119_s12 + $0x38] sm:$0xff]   ;;  %v6153_v63 = vld [vmem:[%s8119_s12 + $0x90] sm:$0xff]  }
 0x7b3   :  { %v3874_v47 = vsel %vm159_vm1, %v3844_v5, %v3854_v43  ;;  %v3864_v20 = vsel %vm159_vm1, %v3860_v30, %v3844_v5  ;;  %v7836_v58 = vsel %vm198_vm8, %v3890_v16, %v3894_v31  ;;  %v7839_v4 = vsel %vm198_vm8, %v3894_v31, %v3884_v36  ;;  %v6155_v5 = vld [vmem:[%s8119_s12 + $0xa0] sm:$0xff]   ;;  %v6156_v31 = vld [vmem:[%s8119_s12 + $0xa8] sm:$0xff]  }
 0x7b4   :  { %v3857_v28 = vsel %vm159_vm1, %v3854_v43, %v3856_v19  ;;  %v7843_v39 = vsel %vm198_vm8, %v3884_v36, %v3885_v22  ;;  %v7846_v52 = vsel %vm198_vm8, %v3885_v22, %v3890_v16  ;;  %4396 = vmatmul.mubr.bf16.vlgmr.msra.gmra.mrb[80].mxu1 %v3920_v13  ;;  %v3861_v14 = vsel %vm159_vm1, %v3856_v19, %v3860_v30  ;;  %v6152_v36 = vld [vmem:[%s8119_s12 + $0x88] sm:$0xff]   ;;  %v6154_v16 = vld [vmem:[%s8119_s12 + $0x98] sm:$0xff]  }
 0x7b5   :  { %v5072_v40 = vpack.c.bf16 %v3857_v28, %v3874_v47  ;;  %v5088_v33 = vpack.c.bf16 %v7846_v52, %v7843_v39  ;;  %4403 = vmatprep.mubr.bf16.mxu1 %v8143_v51  ;;  %v5080_v9 = vpack.c.bf16 %v3864_v20, %v3861_v14  ;;  %v5096_v8 = vpack.c.bf16 %v7839_v4, %v7836_v58  ;;  %v6158_v19 = vld [vmem:[%s8119_s12 + $0xb8] sm:$0xff]  }
 0x7b6   :  { %5582 = vmatpush3.bf16.msra.mxu1 %v6136_v6  ;;  %v8152_v30 = vpack.c.bf16 %v8150_v26, %v8151_v59 }
 0x7b7   :  { %5073 = vmatmul.mubr.msk.bf16.vlgmr.msra.gmra.mrb[68].mxu0 %vm6411_vm4, %v5072_v40  ;;  %5583 = vmatprep.subr.bf16.mxu1 %v6137_v23  ;;  %v6159_v40 = vld [vmem:[%s8121_s26] ss:$0 sm:$0xff] }
 0x7b8   :  { %5554 = vmatpush3.bf16.msra.mxu0 %v6072_v56  ;;  %5077 = vmatprep.mubr.msk.bf16.mxu0 %vm6498_vm9, %v8144_v46 }
 0x7b9   :  { %5555 = vmatprep.subr.bf16.mxu0 %v6073_v25 }
 0x7ba   :  { %5584 = vmatpush3.bf16.msra.mxu1 %v6138_v15 }
 0x7bb   :  { %5585 = vmatprep.subr.bf16.mxu1 %v6139_v50 }
 0x7bc   :  { %5556 = vmatpush3.bf16.msra.mxu0 %v6074_v2  ;;  %4404 = vmatmul.mubr.bf16.gmra.mrb[84].mxu1 %v3926_v17  ;;  %v6157_v17 = vld [vmem:[%s8119_s12 + $0xb0] sm:$0xff]  }
 0x7bd   :  { %5557 = vmatprep.subr.bf16.mxu0 %v6075_v45 }
 0x7be   :  { %5586 = vmatpush3.bf16.msra.mxu1 %v6140_v32 }
 0x7bf   :  { %5081 = vmatmul.mubr.msk.bf16.gmra.mrb[72].mxu0 %vm6498_vm9, %v5080_v9  ;;  %5587 = vmatprep.subr.bf16.mxu1 %v6141_v37 }
 0x7c0   :  { %5558 = vmatpush3.bf16.msra.mxu0 %v6076_v35  ;;  %5085 = vmatprep.mubr.msk.bf16.mxu0 %vm6520_vm11, %v8148_v1 }
 0x7c1   :  { %5559 = vmatprep.subr.bf16.mxu0 %v6077_v21 }
 0x7c2   :  { %5588 = vmatpush3.bf16.msra.mxu1 %v6142_v62 }
 0x7c3   :  { %5589 = vmatprep.subr.bf16.mxu1 %v6143_v41 }
 0x7c4   :  { %5560 = vmatpush3.bf16.msra.mxu0 %v6078_v3 }
 0x7c5   :  { %5561 = vmatprep.subr.bf16.mxu0 %v6079_v48 }
 0x7c6   :  { %5590 = vmatpush3.bf16.msra.mxu1 %v6144_v61 }
 0x7c7   :  { %5591 = vmatprep.subr.bf16.mxu1 %v6145_v0 }
 0x7c8   :  { %5562 = vmatpush3.bf16.msra.mxu0 %v6080_v10 }
 0x7c9   :  { %5563 = vmatprep.subr.bf16.mxu0 %v6081_v60 }
 0x7ca   :  { %5592 = vmatpush3.bf16.msra.mxu1 %v6146_v24 }
 0x7cb   :  { %5593 = vmatprep.subr.bf16.mxu1 %v6147_v49 }
 0x7cc   :  { %5564 = vmatpush3.bf16.msra.mxu0 %v6082_v44 }
 0x7cd   :  { %5565 = vmatprep.subr.bf16.mxu0 %v6083_v7 }
 0x7ce   :  { %5594 = vmatpush3.bf16.msra.mxu1 %v6148_v55 }
 0x7cf   :  { %5595 = vmatprep.subr.bf16.mxu1 %v6149_v57 }
 0x7d0   :  { %5566 = vmatpush3.bf16.msra.mxu0 %v6084_v53 }
 0x7d1   :  { %5567 = vmatprep.subr.bf16.mxu0 %v6085_v11 }
 0x7d2   :  { %5596 = vmatpush3.bf16.msra.mxu1 %v6150_v29 }
 0x7d4   :  { %5568 = vmatpush3.bf16.msra.mxu0 %v6086_v18 }
 0x7d5   :  { %5769 = vmatprep.subr.bf16.mxu0 %v6151_v27 }
 0x7d7   :  { %5089 = vmatmul.mubr.msk.bf16.vlgmr.msra.gmra.mrb[76].mxu0 %vm6520_vm11, %v5088_v33 }
 0x7d8   :  { %5093 = vmatprep.mubr.msk.bf16.mxu0 %vm6564_vm14, %v8152_v30  ;;  %5770 = vmatpush3.bf16.msra.mxu0 %v6151_v27 }
 0x7d9   :  { %5771 = vmatprep.subr.bf16.mxu0 %v6152_v36 }
 0x7dc   :  { %5772 = vmatpush3.bf16.msra.mxu0 %v6152_v36 }
 0x7dd   :  { %5773 = vmatprep.subr.bf16.mxu0 %v6153_v63 }
 0x7df   :  { %5097 = vmatmul.mubr.msk.bf16.gmra.mrb[80].mxu0 %vm6564_vm14, %v5096_v8 }
 0x7e0   :  { %5774 = vmatpush3.bf16.msra.mxu0 %v6153_v63 }
 0x7e1   :  { %5775 = vmatprep.subr.bf16.mxu0 %v6154_v16 }
 0x7e4   :  { %5776 = vmatpush3.bf16.msra.mxu0 %v6154_v16 }
 0x7e5   :  { %5777 = vmatprep.subr.bf16.mxu0 %v6155_v5 }
 0x7e8   :  { %5778 = vmatpush3.bf16.msra.mxu0 %v6155_v5 }
 0x7e9   :  { %5779 = vmatprep.subr.bf16.mxu0 %v6156_v31 }
 0x7ec   :  { %5780 = vmatpush3.bf16.msra.mxu0 %v6156_v31 }
 0x7ed   :  { %5781 = vmatprep.subr.bf16.mxu0 %v6157_v17 }
 0x7f0   :  { %5782 = vmatpush3.bf16.msra.mxu0 %v6157_v17 }
 0x7f1   :  { %5783 = vmatprep.subr.bf16.mxu0 %v6158_v19 }
 0x7f4   :  { %5784 = vmatpush3.bf16.msra.mxu0 %v6158_v19 }
 0x887   :  { %v5541_v22 = vpop.f32.mrb[80].mxu1 }
 0x888   :  { %v5542_v13 = vpop.f32.mrb[81].mxu1 }
 0x889   :  { %v5543_v47 = vadd.f32 %v5542_v13, %v5541_v22  ;;  %v5544_v20 = vpop.f32.mrb[82].mxu1 }
 0x88a   :  { %v5513_v58 = vpop.f32.mrb[68].mxu0  ;;  %v5545_v4 = vpop.f32.mrb[83].mxu1 }
 0x88b   :  { %v5546_v28 = vadd.f32 %v5545_v4, %v5544_v20  ;;  %v5514_v39 = vpop.f32.mrb[69].mxu0 }
 0x88c   :  { %v5515_v52 = vadd.f32 %v5514_v39, %v5513_v58  ;;  %v5516_v56 = vpop.f32.mrb[70].mxu0 }
 0x88d   :  { %v5517_v14 = vpop.f32.mrb[71].mxu0 }
 0x88e   :  { %v4349_v33 = vadd.f32 %v6159_v40, %v5515_v52  ;;  %v5518_v51 = vadd.f32 %v5517_v14, %v5516_v56 }
 0x88f   :  { %v5547_v25 = vpop.f32.mrb[84].mxu1 }
 0x890   :  { %v4352_v9 = vadd.f32 %v6159_v40, %v5518_v51  ;;  %v5548_v8 = vpop.f32.mrb[85].mxu1  ;;  %v4398_v6 = vadd.f32 %v5543_v47, %v4349_v33 }
 0x891   :  { %v5549_v23 = vadd.f32 %v5548_v8, %v5547_v25  ;;  %v5550_v46 = vpop.f32.mrb[86].mxu1 }
 0x892   :  { %v5519_v2 = vpop.f32.mrb[72].mxu0  ;;  %v5551_v45 = vpop.f32.mrb[87].mxu1  ;;  %v4401_v15 = vadd.f32 %v5546_v28, %v4352_v9 }
 0x893   :  { %v5552_v50 = vadd.f32 %v5551_v45, %v5550_v46  ;;  %v5520_v35 = vpop.f32.mrb[73].mxu0 }
 0x894   :  { %v5521_v21 = vadd.f32 %v5520_v35, %v5519_v2  ;;  %v5522_v32 = vpop.f32.mrb[74].mxu0 }
 0x895   :  { %v5523_v37 = vpop.f32.mrb[75].mxu0 }
 0x896   :  { %v4357_v12 = vadd.f32 %v6159_v40, %v5521_v21  ;;  %v5524_v38 = vadd.f32 %v5523_v37, %v5522_v32 }
 0x898   :  { %v4360_v1 = vadd.f32 %v6159_v40, %v5524_v38  ;;  %v4406_v3 = vadd.f32 %v5549_v23, %v4357_v12 }
 0x89a   :  { %v4409_v48 = vadd.f32 %v5552_v50, %v4360_v1 }
 0x8aa   :  { %v5569_v62 = vpop.f32.mrb[76].mxu0 }
 0x8ab   :  { %v5570_v41 = vpop.f32.mrb[77].mxu0 }
 0x8ac   :  { %v5571_v10 = vadd.f32 %v5570_v41, %v5569_v62  ;;  %v5572_v60 = vpop.f32.mrb[78].mxu0 }
 0x8ad   :  { %v5573_v61 = vpop.f32.mrb[79].mxu0 }
 0x8ae   :  { %v4447_v0 = vadd.f32 %v5571_v10, %v4398_v6  ;;  %v5574_v44 = vadd.f32 %v5573_v61, %v5572_v60 }
 0x8b0   :  { %v4461_v7 = vmax.f32 %v4447_v0, 0.0  ;;  %v4450_v24 = vadd.f32 %v5574_v44, %v4401_v15 }
 0x8b2   :  { %v4462_v49 = vmax.f32 %v4450_v24, 0.0  ;;  %v5575_v53 = vpop.f32.mrb[80].mxu0  ;;  %v4471_v11 = vrot.slane %v4461_v7, 7  ;;  %v4486_v55 = vrot.slane %v4461_v7, 1 }
 0x8b3   :  { %v5576_v57 = vpop.f32.mrb[81].mxu0 }
 0x8b4   :  { %v4472_v18 = vrot.slane %v4462_v49, 7  ;;  %v4487_v29 = vrot.slane %v4462_v49, 1  ;;  %v5577_v27 = vadd.f32 %v5576_v57, %v5575_v53  ;;  %v5578_v26 = vpop.f32.mrb[82].mxu0  ;;  %v4504_v59 = vpack.c.bf16 %v4462_v49, %v4461_v7 }
 0x8b5   :  { %v5579_v30 = vpop.f32.mrb[83].mxu0 }
 0x8b6   :  { %v4473_v36 = vsel %vm159_vm1, %v4471_v11, %v4472_v18  ;;  %v4455_v63 = vadd.f32 %v5577_v27, %v4406_v3  ;;  %v5580_v16 = vadd.f32 %v5579_v30, %v5578_v26  ;;  %4541 = vmatprep.mubr.bf16.mxu1 %v4504_v59  ;;  %v4488_v5 = vsel %vm198_vm8, %v4486_v55, %v4487_v29 }
 0x8b8   :  { %v4463_v31 = vmax.f32 %v4455_v63, 0.0  ;;  %v4458_v17 = vadd.f32 %v5580_v16, %v4409_v48 }
 0x8ba   :  { %v4474_v19 = vrot.slane %v4463_v31, 7  ;;  %v4489_v22 = vrot.slane %v4463_v31, 1  ;;  %v4464_v13 = vmax.f32 %v4458_v17, 0.0 }
 0x8bc   :  { %v4466_v47 = vrot.slane %v4464_v13, 7  ;;  %v4491_v20 = vrot.slane %v4464_v13, 1  ;;  %v4490_v58 = vsel %vm198_vm8, %v4487_v29, %v4489_v22  ;;  %v4507_v4 = vpack.c.bf16 %v4464_v13, %v4463_v31 }
 0x8bd   :  { %v5108_v28 = vpack.c.bf16 %v4490_v58, %v4488_v5  ;;  %v4475_v39 = vsel %vm159_vm1, %v4472_v18, %v4474_v19 }
 0x8be   :  { %v4481_v52 = vsel %vm159_vm1, %v4466_v47, %v4471_v11  ;;  %v4492_v56 = vsel %vm198_vm8, %v4489_v22, %v4491_v20  ;;  %v4498_v14 = vsel %vm198_vm8, %v4491_v20, %v4486_v55  ;;  %v4476_v40 = vsel %vm159_vm1, %v4474_v19, %v4466_v47 }
 0x8bf   :  { %v5100_v33 = vpack.c.bf16 %v4473_v36, %v4481_v52  ;;  %v5112_v51 = vpack.c.bf16 %v4498_v14, %v4492_v56  ;;  %5785 = vmatprep.mubr.msk.bf16.mxu0 %vm6520_vm11, %v5108_v28  ;;  %v5104_v25 = vpack.c.bf16 %v4476_v40, %v4475_v39 }
 0x8c1   :  { %5101 = vmatmul.mubr.msk.bf16.vlgmr.msra.gmra.mrb[88].mxu1 %vm6411_vm4, %v5100_v33  ;;  %5786 = vmatmul.mubr.msk.bf16.vlgmr.msra.gmra.mrb[84].mxu0 %vm6564_vm14, %v5112_v51 }
 0x8c2   :  { %4549 = vmatprep.mubr.bf16.mxu1 %v4507_v4 }
 0x8c9   :  { %5105 = vmatmul.mubr.msk.bf16.gmra.mrb[92].mxu1 %vm6498_vm9, %v5104_v25 }
 0x994   :  { %v5597_v9 = vpop.f32.mrb[88].mxu1  ;;  %v5787_v8 = vpop.f32.mrb[84].mxu0 }
 0x995   :  { %v5598_v6 = vpop.f32.mrb[89].mxu1  ;;  %v4592_v23 = vpop.f32.mrb[85].mxu0 }
 0x996   :  { %v5599_v46 = vadd.f32 %v5598_v6, %v5597_v9  ;;  %v5600_v2 = vpop.f32.mrb[90].mxu1  ;;  %v5788_v45 = vpop.f32.mrb[86].mxu0 }
 0x997   :  { %v5601_v54 = vpop.f32.mrb[91].mxu1  ;;  %v4595_v15 = vpop.f32.mrb[87].mxu0 }
 0x998   :  { %v4544_v50 = vadd.f32 %v6160_v42, %v5599_v46  ;;  %v5602_v43 = vadd.f32 %v5601_v54, %v5600_v2 }
 0x99a   :  { %v4593_v35 = vadd.f32 %v4592_v23, %v4544_v50  ;;  %v4547_v21 = vadd.f32 %v6160_v42, %v5602_v43 }
 0x99c   :  { %v4607_v32 = vmax.f32 %v4593_v35, 0.0  ;;  %v4596_v34 = vadd.f32 %v4595_v15, %v4547_v21  ;;  %v5603_v37 = vpop.f32.mrb[92].mxu1 }
 0x99d   :  { %v5604_v12 = vpop.f32.mrb[93].mxu1 }
 0x99e   :  { %4611 = vst [vmem:[%s8057_s24] sm:$0xff] %v4607_v32  ;;  %v4608_v38 = vmax.f32 %v4596_v34, 0.0  ;;  %v5605_v1 = vadd.f32 %v5604_v12, %v5603_v37  ;;  %v5606_v3 = vpop.f32.mrb[94].mxu1 }
 0x99f   :  { %v5607_v48 = vpop.f32.mrb[95].mxu1 }
 0x9a0   :  { %4612 = vst [vmem:[%s8057_s24 + $0x8] sm:$0xff] %v4608_v38  ;;  %v4552_v62 = vadd.f32 %v6160_v42, %v5605_v1  ;;  %v5608_v41 = vadd.f32 %v5607_v48, %v5606_v3 }
 0x9a2   :  { %v4601_v10 = vadd.f32 %v5787_v8, %v4552_v62  ;;  %v4555_v60 = vadd.f32 %v6160_v42, %v5608_v41 }
 0x9a4   :  { %v4609_v61 = vmax.f32 %v4601_v10, 0.0  ;;  %v4604_v0 = vadd.f32 %v5788_v45, %v4555_v60 }
 0x9a6   :  { %4613 = vst [vmem:[%s8057_s24 + $0x10] sm:$0xff] %v4609_v61  ;;  %v4610_v44 = vmax.f32 %v4604_v0, 0.0 }
 0x9a8   :  { %4614 = vst [vmem:[%s8057_s24 + $0x18] sm:$0xff] %v4610_v44 }

</bundles_post_ra>
